<compile_context>
chip_gen: v6e
topology: v6e:2x2x1
jax: 0.10.0
libtpu: 0.0.40
codegen_flags: <defaults>
</compile_context>

<pallas_src>
import math

import jax
import jax.numpy as jnp
from jax.experimental import pallas as pl
from jax.experimental.pallas import tpu as pltpu

# ---------------- config (scaled-down DistilBERT) ----------------
VOCAB = 100
MAX_POS = 16
D_MODEL = 32
N_HEADS = 4
HEAD_DIM = D_MODEL // N_HEADS
N_LAYERS = 2
D_FFN = 64
N_LABELS = 2
LANE_PAD = 128          # lane-dense width for the classifier output slab
LN_EPS = 1e-12          # BERT/DistilBERT LayerNorm eps

# ---------------- packed-parameter slab layout ----------------
# w_slab: (N_LAYERS, W_ROWS, W_COLS) f32 — ALL matmul weights in one array.
OFF_WQKV = 0                        # rows 0:D,    (D, 3D)  fused Q|K|V (Q pre-scaled)
OFF_WO   = OFF_WQKV + 3 * D_MODEL   # rows 0:D,    (D, D)   attention out proj
OFF_W1   = OFF_WO + D_MODEL         # rows 0:D,    (D, F)   FFN in
OFF_CLS  = OFF_W1 + D_FFN           # rows 0:D,    (D, 128) classifier (layer 0 only)
OFF_W2   = OFF_CLS + LANE_PAD       # rows 0:F,    (F, D)   FFN out
W_COLS   = OFF_W2 + D_MODEL
W_ROWS   = max(D_MODEL, D_FFN)

# v_slab: (N_LAYERS, 1, V_COLS) f32 — ALL bias / LayerNorm vectors in one array.
OFF_BQKV = 0
OFF_BO   = OFF_BQKV + 3 * D_MODEL
OFF_G1   = OFF_BO + D_MODEL         # sa_layer_norm gamma
OFF_BE1  = OFF_G1 + D_MODEL         # sa_layer_norm beta
OFF_B1   = OFF_BE1 + D_MODEL
OFF_B2   = OFF_B1 + D_FFN
OFF_G2   = OFF_B2 + D_MODEL         # output_layer_norm gamma
OFF_BE2  = OFF_G2 + D_MODEL         # output_layer_norm beta
OFF_EG   = OFF_BE2 + D_MODEL        # embedding LN gamma   (layer-0 row only)
OFF_EB   = OFF_EG + D_MODEL         # embedding LN beta    (layer-0 row only)
OFF_CB   = OFF_EB + D_MODEL         # classifier bias      (layer-0 row, 128 wide)
V_COLS   = OFF_CB + LANE_PAD


# ---------------- in-kernel helpers ----------------
def _ln(x, g, b):
    mu = jnp.mean(x, axis=-1, keepdims=True)
    var = jnp.mean((x - mu) ** 2, axis=-1, keepdims=True)
    return (x - mu) * jax.lax.rsqrt(var + LN_EPS) * g + b


# ---------------- fused Pallas kernel (whole forward pass) ----------------
def fused_forward_kernel(emb_ref, mask_ref, w_ref, v_ref, o_ref):
    """emb:(B,S,D) word+pos embeddings, mask:(B,1,S) (1=keep, 0=pad),
    w:(L,W_ROWS,W_COLS) packed matmul weights, v:(L,1,V_COLS) packed vectors,
    out:(B*S, LANE_PAD) lane-dense logits slab."""
    B, S, D = emb_ref.shape
    BS = B * S
    NHB = N_HEADS * B

    def wmat(l, c0, width, rows=D_MODEL):        # static slice of the weight slab
        return w_ref[l, 0:rows, c0:c0 + width]

    def vvec(l, c0, width):                      # static slice of the vector slab
        return v_ref[l, :, c0:c0 + width]        # (1, width)

    # embedding LayerNorm (dropout == identity in eval mode)
    x = emb_ref[...].reshape(BS, D)
    h = _ln(x, vvec(0, OFF_EG, D), vvec(0, OFF_EB, D))

    # hoisted attention constants (shared by all layers / heads) — ONE broadcast
    neg_inf = float(jnp.finfo(jnp.float32).min)  # DistilBERT masked_fill value
    maskf = jnp.concatenate([mask_ref[...]] * N_HEADS, axis=0)     # (NHB, 1, S), head-major
    km = jnp.broadcast_to(maskf, (NHB, S, S)) == 0.0               # (NHB, S, S) bool

    for l in range(N_LAYERS):                    # static unroll (N_LAYERS == 2)
        # fused QKV projection over the whole flattened batch (Q pre-scaled at init)
        qkv = (jnp.dot(h, wmat(l, OFF_WQKV, 3 * D), preferred_element_type=jnp.float32)
               + vvec(l, OFF_BQKV, 3 * D))        # (BS, 3D)

        # split heads onto the einsum batch axis (head-major): (NHB, S, HEAD_DIM)
        def heads(base):
            parts = [qkv[:, base + hh * HEAD_DIM: base + (hh + 1) * HEAD_DIM]
                     .reshape(B, S, HEAD_DIM) for hh in range(N_HEADS)]
            return jnp.concatenate(parts, axis=0)

        qh, kh, vh = heads(0), heads(D), heads(2 * D)

        # batched multi-head attention: one einsum for scores, one for PV
        s = jnp.einsum('bqd,bkd->bqk', qh, kh,
                       preferred_element_type=jnp.float32)          # (NHB, S, S)
        s = jnp.where(km, neg_inf, s)            # mask KEY positions (masked_fill)
        m = jnp.max(s, axis=-1, keepdims=True)
        e = jnp.exp(s - m)
        denom = jnp.sum(e, axis=-1, keepdims=True)                  # (NHB, S, 1)
        ctx = jnp.einsum('bqk,bkd->bqd', e, vh,
                         preferred_element_type=jnp.float32)         # (NHB, S, dh)
        ctx = ctx * pl.reciprocal(denom, approx=True)   # flash-style: divide after PV

        # merge heads back to (BS, D) feature order [h0|h1|h2|h3], single Wo matmul
        ctx2 = jnp.concatenate([ctx[hh * B:(hh + 1) * B] for hh in range(N_HEADS)],
                               axis=-1).reshape(BS, D)
        attn = (jnp.dot(ctx2, wmat(l, OFF_WO, D), preferred_element_type=jnp.float32)
                + vvec(l, OFF_BO, D))

        # residual + sa_layer_norm
        h = _ln(attn + h, vvec(l, OFF_G1, D), vvec(l, OFF_BE1, D))

        # FFN over the whole flattened batch
        f = (jnp.dot(h, wmat(l, OFF_W1, D_FFN), preferred_element_type=jnp.float32)
             + vvec(l, OFF_B1, D_FFN))
        # TODO(synk): HF DistilBERT uses exact (erf-based) GELU; tanh approximation used here.
        f = jax.nn.gelu(f, approximate=True)
        f = (jnp.dot(f, wmat(l, OFF_W2, D, rows=D_FFN), preferred_element_type=jnp.float32)
             + vvec(l, OFF_B2, D))

        # residual + output_layer_norm
        h = _ln(f + h, vvec(l, OFF_G2, D), vvec(l, OFF_BE2, D))

    # token-classification head, lane-dense (D, 128) weight slab (cols >= 2 are zero)
    o_ref[...] = (jnp.dot(h, wmat(0, OFF_CLS, LANE_PAD), preferred_element_type=jnp.float32)
                  + vvec(0, OFF_CB, LANE_PAD)).astype(o_ref.dtype)


# ---------------- wrapper (single pallas_call, 4 input DMAs) ----------------
def trait_classifier_forward(params, input_ids, attention_mask):
    B, S = input_ids.shape
    # TODO(synk): embedding gather (data-dependent) kept in plain JAX; everything
    # downstream runs in the single fused Pallas kernel.
    emb = params["word_emb"][input_ids] + params["pos_emb"][None, :S, :]
    mask3 = attention_mask.astype(jnp.float32).reshape(B, 1, S)

    # rough cost hint so XLA can overlap the gather with the kernel launch
    flops = N_LAYERS * (2 * B * S * D_MODEL * 3 * D_MODEL        # qkv
                        + 4 * B * S * S * D_MODEL                # scores + pv
                        + 2 * B * S * D_MODEL * D_MODEL          # wo
                        + 4 * B * S * D_MODEL * D_FFN)           # ffn
    flops += 2 * B * S * D_MODEL * LANE_PAD                      # classifier
    bytes_accessed = 4 * (B * S * D_MODEL + B * S
                          + N_LAYERS * W_ROWS * W_COLS
                          + N_LAYERS * V_COLS
                          + B * S * LANE_PAD)
    cost = pl.CostEstimate(
        flops=flops,
        transcendentals=N_LAYERS * B * (N_HEADS * S * S + S * D_FFN),
        bytes_accessed=bytes_accessed)

    logits_pad = pl.pallas_call(
        fused_forward_kernel,
        out_shape=jax.ShapeDtypeStruct((B * S, LANE_PAD), jnp.float32),
        in_specs=[pl.BlockSpec(memory_space=pltpu.MemorySpace.VMEM)] * 4,
        out_specs=pl.BlockSpec(memory_space=pltpu.MemorySpace.VMEM),
        cost_estimate=cost,
    )(emb.astype(jnp.float32), mask3, params["w_slab"], params["v_slab"])

    return logits_pad[:, :N_LABELS].reshape(B, S, N_LABELS)


# ---------------- parameters (deterministic synthetic init, packed slabs) ----------------
def init_params(key):
    std = 0.02
    keys = iter(jax.random.split(key, 64))

    def nrm(shape):
        return jax.random.normal(next(keys), shape, jnp.float32) * std

    def linear(din, dout):
        w_pt = nrm((dout, din))                 # PyTorch nn.Linear layout (out, in)
        b_pt = nrm((dout,))
        return w_pt.T, b_pt                     # kernel layout (in, out), (out,)

    params = {
        "word_emb": nrm((VOCAB, D_MODEL)),
        "pos_emb": nrm((MAX_POS, D_MODEL)),
    }

    w_slab = jnp.zeros((N_LAYERS, W_ROWS, W_COLS), jnp.float32)
    v_slab = jnp.zeros((N_LAYERS, 1, V_COLS), jnp.float32)

    scale = 1.0 / math.sqrt(HEAD_DIM)
    for l in range(N_LAYERS):
        wq, bq = linear(D_MODEL, D_MODEL)
        wk, bk = linear(D_MODEL, D_MODEL)
        wv, bv = linear(D_MODEL, D_MODEL)
        # fold the 1/sqrt(head_dim) attention scale into the Q projection
        wqkv = jnp.concatenate([wq * scale, wk, wv], axis=1)     # (D, 3D)
        bqkv = jnp.concatenate([bq * scale, bk, bv], axis=0)     # (3D,)
        wo, bo = linear(D_MODEL, D_MODEL)
        w1, b1 = linear(D_MODEL, D_FFN)
        w2, b2 = linear(D_FFN, D_MODEL)

        w_slab = w_slab.at[l, :D_MODEL, OFF_WQKV:OFF_WQKV + 3 * D_MODEL].set(wqkv)
        w_slab = w_slab.at[l, :D_MODEL, OFF_WO:OFF_WO + D_MODEL].set(wo)
        w_slab = w_slab.at[l, :D_MODEL, OFF_W1:OFF_W1 + D_FFN].set(w1)
        w_slab = w_slab.at[l, :D_FFN, OFF_W2:OFF_W2 + D_MODEL].set(w2)

        v_slab = v_slab.at[l, 0, OFF_BQKV:OFF_BQKV + 3 * D_MODEL].set(bqkv)
        v_slab = v_slab.at[l, 0, OFF_BO:OFF_BO + D_MODEL].set(bo)
        v_slab = v_slab.at[l, 0, OFF_B1:OFF_B1 + D_FFN].set(b1)
        v_slab = v_slab.at[l, 0, OFF_B2:OFF_B2 + D_MODEL].set(b2)
        v_slab = v_slab.at[l, 0, OFF_G1:OFF_G1 + D_MODEL].set(1.0)  # sa LN gamma
        v_slab = v_slab.at[l, 0, OFF_G2:OFF_G2 + D_MODEL].set(1.0)  # out LN gamma
        # LN betas (BE1 / BE2) stay zero

    # classifier head (lane-dense, cols >= N_LABELS stay zero) and embedding LN
    # packed into layer 0's spare columns
    wc, bc = linear(D_MODEL, N_LABELS)
    w_slab = w_slab.at[0, :D_MODEL, OFF_CLS:OFF_CLS + N_LABELS].set(wc)
    v_slab = v_slab.at[0, 0, OFF_CB:OFF_CB + N_LABELS].set(bc)
    v_slab = v_slab.at[0, 0, OFF_EG:OFF_EG + D_MODEL].set(1.0)      # embedding LN gamma
    # embedding LN beta stays zero

    params["w_slab"] = w_slab
    params["v_slab"] = v_slab
    return params


if __name__ == "__main__":
    B, S = 2, 16
    key = jax.random.PRNGKey(0)
    k_param, k_ids = jax.random.split(key)

    params = init_params(k_param)
    input_ids = jax.random.randint(k_ids, (B, S), 0, VOCAB, dtype=jnp.int32)
    attention_mask = jnp.ones((B, S), dtype=jnp.int32).at[1, S - 4:].set(0)

    fwd = jax.jit(trait_classifier_forward)
    logits = jax.block_until_ready(fwd(params, input_ids, attention_mask))

    assert logits.shape == (B, S, N_LABELS)
    assert logits.dtype == jnp.float32
    assert bool(jnp.all(jnp.isfinite(logits)))
    print("KERNEL_OK")
</pallas_src>

<mosaic_0001>
module attributes {stable_mosaic.version = 11 : i64} {
  func.func @fused_forward_kernel(%arg0: memref<2x16x32xf32, #tpu.memory_space<vmem>>, %arg1: memref<2x1x16xf32, #tpu.memory_space<vmem>>, %arg2: memref<2x64x352xf32, #tpu.memory_space<vmem>>, %arg3: memref<2x1x544xf32, #tpu.memory_space<vmem>>, %arg4: memref<32x128xf32, #tpu.memory_space<vmem>>) attributes {dimension_semantics = [], scalar_prefetch = 0 : i64, scratch_operands = 0 : i64, tpu.core_type = #tpu.core_type<tc>} {
    %c0 = arith.constant 0 : index
    %c0_0 = arith.constant 0 : index
    %c0_1 = arith.constant 0 : index
    %0 = vector.load %arg0[%c0, %c0_0, %c0_1] : memref<2x16x32xf32, #tpu.memory_space<vmem>>, vector<2x16x32xf32>
    %1 = vector.shape_cast %0 : vector<2x16x32xf32> to vector<32x32xf32>
    %c0_2 = arith.constant 0 : index
    %c0_3 = arith.constant 0 : index
    %c352 = arith.constant 352 : index
    %2 = vector.load %arg3[%c0_2, %c0_3, %c352] : memref<2x1x544xf32, #tpu.memory_space<vmem>>, vector<1x1x32xf32>
    %3 = vector.shape_cast %2 : vector<1x1x32xf32> to vector<1x32xf32>
    %c0_4 = arith.constant 0 : index
    %c0_5 = arith.constant 0 : index
    %c384 = arith.constant 384 : index
    %4 = vector.load %arg3[%c0_4, %c0_5, %c384] : memref<2x1x544xf32, #tpu.memory_space<vmem>>, vector<1x1x32xf32>
    %5 = vector.shape_cast %4 : vector<1x1x32xf32> to vector<1x32xf32>
    %cst = arith.constant dense<0.000000e+00> : vector<32xf32>
    %6 = vector.multi_reduction <add>, %1, %cst [1] : vector<32x32xf32> to vector<32xf32>
    %7 = vector.shape_cast %6 : vector<32xf32> to vector<32x1xf32>
    %cst_6 = arith.constant 3.200000e+01 : f32
    %8 = vector.broadcast %cst_6 : f32 to vector<32x1xf32>
    %9 = arith.divf %7, %8 : vector<32x1xf32>
    %10 = vector.broadcast %9 : vector<32x1xf32> to vector<32x32xf32>
    %11 = arith.subf %1, %10 : vector<32x32xf32>
    %12 = arith.mulf %11, %11 : vector<32x32xf32>
    %cst_7 = arith.constant dense<0.000000e+00> : vector<32xf32>
    %13 = vector.multi_reduction <add>, %12, %cst_7 [1] : vector<32x32xf32> to vector<32xf32>
    %14 = vector.shape_cast %13 : vector<32xf32> to vector<32x1xf32>
    %cst_8 = arith.constant 3.200000e+01 : f32
    %15 = vector.broadcast %cst_8 : f32 to vector<32x1xf32>
    %16 = arith.divf %14, %15 : vector<32x1xf32>
    %17 = vector.broadcast %9 : vector<32x1xf32> to vector<32x32xf32>
    %18 = arith.subf %1, %17 : vector<32x32xf32>
    %cst_9 = arith.constant 9.99999996E-13 : f32
    %19 = vector.broadcast %cst_9 : f32 to vector<32x1xf32>
    %20 = arith.addf %16, %19 : vector<32x1xf32>
    %21 = math.rsqrt %20 : vector<32x1xf32>
    %22 = vector.broadcast %21 : vector<32x1xf32> to vector<32x32xf32>
    %23 = arith.mulf %18, %22 : vector<32x32xf32>
    %24 = vector.broadcast %3 : vector<1x32xf32> to vector<32x32xf32>
    %25 = arith.mulf %23, %24 : vector<32x32xf32>
    %26 = vector.broadcast %5 : vector<1x32xf32> to vector<32x32xf32>
    %27 = arith.addf %25, %26 : vector<32x32xf32>
    %c0_10 = arith.constant 0 : index
    %c0_11 = arith.constant 0 : index
    %c0_12 = arith.constant 0 : index
    %28 = vector.load %arg1[%c0_10, %c0_11, %c0_12] : memref<2x1x16xf32, #tpu.memory_space<vmem>>, vector<2x1x16xf32>
    %29 = tpu.concatenate %28, %28, %28, %28 in 0 : vector<2x1x16xf32>, vector<2x1x16xf32>, vector<2x1x16xf32>, vector<2x1x16xf32> -> vector<8x1x16xf32>
    %30 = vector.shape_cast %29 : vector<8x1x16xf32> to vector<8x1x16xf32>
    %31 = vector.broadcast %30 : vector<8x1x16xf32> to vector<8x16x16xf32>
    %cst_13 = arith.constant 0.000000e+00 : f32
    %32 = vector.broadcast %cst_13 : f32 to vector<8x16x16xf32>
    %33 = arith.cmpf oeq, %31, %32 : vector<8x16x16xf32>
    %c0_14 = arith.constant 0 : index
    %c0_15 = arith.constant 0 : index
    %c0_16 = arith.constant 0 : index
    %34 = vector.load %arg2[%c0_14, %c0_15, %c0_16] : memref<2x64x352xf32, #tpu.memory_space<vmem>>, vector<1x32x96xf32>
    %35 = vector.shape_cast %34 : vector<1x32x96xf32> to vector<32x96xf32>
    %cst_17 = arith.constant dense<0.000000e+00> : vector<32x96xf32>
    %36 = tpu.matmul %27, %35, %cst_17 {dimension_numbers = #tpu.dot_dimension_numbers<[1], [0], [0], [1], [0, 0, 1, 1], [], []>} : vector<32x32xf32>, vector<32x96xf32>, vector<32x96xf32> -> vector<32x96xf32>
    %c0_18 = arith.constant 0 : index
    %c0_19 = arith.constant 0 : index
    %c0_20 = arith.constant 0 : index
    %37 = vector.load %arg3[%c0_18, %c0_19, %c0_20] : memref<2x1x544xf32, #tpu.memory_space<vmem>>, vector<1x1x96xf32>
    %38 = vector.shape_cast %37 : vector<1x1x96xf32> to vector<1x96xf32>
    %39 = vector.broadcast %38 : vector<1x96xf32> to vector<32x96xf32>
    %40 = arith.addf %36, %39 : vector<32x96xf32>
    %41 = vector.extract_strided_slice %40 {offsets = [0, 0], sizes = [32, 8], strides = [1, 1]} : vector<32x96xf32> to vector<32x8xf32>
    %42 = vector.shape_cast %41 : vector<32x8xf32> to vector<2x16x8xf32>
    %43 = vector.extract_strided_slice %40 {offsets = [0, 8], sizes = [32, 8], strides = [1, 1]} : vector<32x96xf32> to vector<32x8xf32>
    %44 = vector.shape_cast %43 : vector<32x8xf32> to vector<2x16x8xf32>
    %45 = vector.extract_strided_slice %40 {offsets = [0, 16], sizes = [32, 8], strides = [1, 1]} : vector<32x96xf32> to vector<32x8xf32>
    %46 = vector.shape_cast %45 : vector<32x8xf32> to vector<2x16x8xf32>
    %47 = vector.extract_strided_slice %40 {offsets = [0, 24], sizes = [32, 8], strides = [1, 1]} : vector<32x96xf32> to vector<32x8xf32>
    %48 = vector.shape_cast %47 : vector<32x8xf32> to vector<2x16x8xf32>
    %49 = tpu.concatenate %42, %44, %46, %48 in 0 : vector<2x16x8xf32>, vector<2x16x8xf32>, vector<2x16x8xf32>, vector<2x16x8xf32> -> vector<8x16x8xf32>
    %50 = vector.extract_strided_slice %40 {offsets = [0, 32], sizes = [32, 8], strides = [1, 1]} : vector<32x96xf32> to vector<32x8xf32>
    %51 = vector.shape_cast %50 : vector<32x8xf32> to vector<2x16x8xf32>
    %52 = vector.extract_strided_slice %40 {offsets = [0, 40], sizes = [32, 8], strides = [1, 1]} : vector<32x96xf32> to vector<32x8xf32>
    %53 = vector.shape_cast %52 : vector<32x8xf32> to vector<2x16x8xf32>
    %54 = vector.extract_strided_slice %40 {offsets = [0, 48], sizes = [32, 8], strides = [1, 1]} : vector<32x96xf32> to vector<32x8xf32>
    %55 = vector.shape_cast %54 : vector<32x8xf32> to vector<2x16x8xf32>
    %56 = vector.extract_strided_slice %40 {offsets = [0, 56], sizes = [32, 8], strides = [1, 1]} : vector<32x96xf32> to vector<32x8xf32>
    %57 = vector.shape_cast %56 : vector<32x8xf32> to vector<2x16x8xf32>
    %58 = tpu.concatenate %51, %53, %55, %57 in 0 : vector<2x16x8xf32>, vector<2x16x8xf32>, vector<2x16x8xf32>, vector<2x16x8xf32> -> vector<8x16x8xf32>
    %59 = vector.extract_strided_slice %40 {offsets = [0, 64], sizes = [32, 8], strides = [1, 1]} : vector<32x96xf32> to vector<32x8xf32>
    %60 = vector.shape_cast %59 : vector<32x8xf32> to vector<2x16x8xf32>
    %61 = vector.extract_strided_slice %40 {offsets = [0, 72], sizes = [32, 8], strides = [1, 1]} : vector<32x96xf32> to vector<32x8xf32>
    %62 = vector.shape_cast %61 : vector<32x8xf32> to vector<2x16x8xf32>
    %63 = vector.extract_strided_slice %40 {offsets = [0, 80], sizes = [32, 8], strides = [1, 1]} : vector<32x96xf32> to vector<32x8xf32>
    %64 = vector.shape_cast %63 : vector<32x8xf32> to vector<2x16x8xf32>
    %65 = vector.extract_strided_slice %40 {offsets = [0, 88], sizes = [32, 8], strides = [1, 1]} : vector<32x96xf32> to vector<32x8xf32>
    %66 = vector.shape_cast %65 : vector<32x8xf32> to vector<2x16x8xf32>
    %67 = tpu.concatenate %60, %62, %64, %66 in 0 : vector<2x16x8xf32>, vector<2x16x8xf32>, vector<2x16x8xf32>, vector<2x16x8xf32> -> vector<8x16x8xf32>
    "tpu.trace_start"() <{level = 10 : i32, message = "bqd,bkd->bqk"}> : () -> ()
    %cst_21 = arith.constant dense<0.000000e+00> : vector<8x16x16xf32>
    %68 = tpu.matmul %49, %58, %cst_21 {dimension_numbers = #tpu.dot_dimension_numbers<[2], [2], [1], [1], [0, 0, 0, 1, 1, 1], [0], [0]>} : vector<8x16x8xf32>, vector<8x16x8xf32>, vector<8x16x16xf32> -> vector<8x16x16xf32>
    %cst_22 = arith.constant -3.40282347E+38 : f32
    "tpu.trace_stop"() : () -> ()
    %69 = vector.broadcast %cst_22 : f32 to vector<8x16x16xf32>
    %70 = arith.select %33, %69, %68 : vector<8x16x16xi1>, vector<8x16x16xf32>
    %cst_23 = arith.constant dense<0xFF800000> : vector<8x16xf32>
    %71 = vector.multi_reduction <maximumf>, %70, %cst_23 [2] : vector<8x16x16xf32> to vector<8x16xf32>
    %72 = vector.shape_cast %71 : vector<8x16xf32> to vector<8x16x1xf32>
    %73 = vector.broadcast %72 : vector<8x16x1xf32> to vector<8x16x16xf32>
    %74 = arith.subf %70, %73 : vector<8x16x16xf32>
    %75 = math.exp %74 : vector<8x16x16xf32>
    %cst_24 = arith.constant dense<0.000000e+00> : vector<8x16xf32>
    %76 = vector.multi_reduction <add>, %75, %cst_24 [2] : vector<8x16x16xf32> to vector<8x16xf32>
    %77 = vector.shape_cast %76 : vector<8x16xf32> to vector<8x16x1xf32>
    "tpu.trace_start"() <{level = 10 : i32, message = "bqk,bkd->bqd"}> : () -> ()
    %cst_25 = arith.constant dense<0.000000e+00> : vector<8x16x8xf32>
    %78 = tpu.matmul %75, %67, %cst_25 {dimension_numbers = #tpu.dot_dimension_numbers<[2], [1], [1], [2], [0, 0, 0, 1, 1, 2], [0], [0]>} : vector<8x16x16xf32>, vector<8x16x8xf32>, vector<8x16x8xf32> -> vector<8x16x8xf32>
    "tpu.trace_stop"() : () -> ()
    %79 = tpu.reciprocal %77 {approx = true} : vector<8x16x1xf32> -> vector<8x16x1xf32>
    %80 = vector.broadcast %79 : vector<8x16x1xf32> to vector<8x16x8xf32>
    %81 = arith.mulf %78, %80 : vector<8x16x8xf32>
    %82 = vector.extract_strided_slice %81 {offsets = [0, 0, 0], sizes = [2, 16, 8], strides = [1, 1, 1]} : vector<8x16x8xf32> to vector<2x16x8xf32>
    %83 = vector.extract_strided_slice %81 {offsets = [2, 0, 0], sizes = [2, 16, 8], strides = [1, 1, 1]} : vector<8x16x8xf32> to vector<2x16x8xf32>
    %84 = vector.extract_strided_slice %81 {offsets = [4, 0, 0], sizes = [2, 16, 8], strides = [1, 1, 1]} : vector<8x16x8xf32> to vector<2x16x8xf32>
    %85 = vector.extract_strided_slice %81 {offsets = [6, 0, 0], sizes = [2, 16, 8], strides = [1, 1, 1]} : vector<8x16x8xf32> to vector<2x16x8xf32>
    %86 = tpu.concatenate %82, %83, %84, %85 in 2 : vector<2x16x8xf32>, vector<2x16x8xf32>, vector<2x16x8xf32>, vector<2x16x8xf32> -> vector<2x16x32xf32>
    %87 = vector.shape_cast %86 : vector<2x16x32xf32> to vector<32x32xf32>
    %c0_26 = arith.constant 0 : index
    %c0_27 = arith.constant 0 : index
    %c96 = arith.constant 96 : index
    %88 = vector.load %arg2[%c0_26, %c0_27, %c96] : memref<2x64x352xf32, #tpu.memory_space<vmem>>, vector<1x32x32xf32>
    %89 = vector.shape_cast %88 : vector<1x32x32xf32> to vector<32x32xf32>
    %cst_28 = arith.constant dense<0.000000e+00> : vector<32x32xf32>
    %90 = tpu.matmul %87, %89, %cst_28 {dimension_numbers = #tpu.dot_dimension_numbers<[1], [0], [0], [1], [0, 0, 1, 1], [], []>} : vector<32x32xf32>, vector<32x32xf32>, vector<32x32xf32> -> vector<32x32xf32>
    %c0_29 = arith.constant 0 : index
    %c0_30 = arith.constant 0 : index
    %c96_31 = arith.constant 96 : index
    %91 = vector.load %arg3[%c0_29, %c0_30, %c96_31] : memref<2x1x544xf32, #tpu.memory_space<vmem>>, vector<1x1x32xf32>
    %92 = vector.shape_cast %91 : vector<1x1x32xf32> to vector<1x32xf32>
    %93 = vector.broadcast %92 : vector<1x32xf32> to vector<32x32xf32>
    %94 = arith.addf %90, %93 : vector<32x32xf32>
    %95 = arith.addf %94, %27 : vector<32x32xf32>
    %c0_32 = arith.constant 0 : index
    %c0_33 = arith.constant 0 : index
    %c128 = arith.constant 128 : index
    %96 = vector.load %arg3[%c0_32, %c0_33, %c128] : memref<2x1x544xf32, #tpu.memory_space<vmem>>, vector<1x1x32xf32>
    %97 = vector.shape_cast %96 : vector<1x1x32xf32> to vector<1x32xf32>
    %c0_34 = arith.constant 0 : index
    %c0_35 = arith.constant 0 : index
    %c160 = arith.constant 160 : index
    %98 = vector.load %arg3[%c0_34, %c0_35, %c160] : memref<2x1x544xf32, #tpu.memory_space<vmem>>, vector<1x1x32xf32>
    %99 = vector.shape_cast %98 : vector<1x1x32xf32> to vector<1x32xf32>
    %cst_36 = arith.constant dense<0.000000e+00> : vector<32xf32>
    %100 = vector.multi_reduction <add>, %95, %cst_36 [1] : vector<32x32xf32> to vector<32xf32>
    %101 = vector.shape_cast %100 : vector<32xf32> to vector<32x1xf32>
    %cst_37 = arith.constant 3.200000e+01 : f32
    %102 = vector.broadcast %cst_37 : f32 to vector<32x1xf32>
    %103 = arith.divf %101, %102 : vector<32x1xf32>
    %104 = vector.broadcast %103 : vector<32x1xf32> to vector<32x32xf32>
    %105 = arith.subf %95, %104 : vector<32x32xf32>
    %106 = arith.mulf %105, %105 : vector<32x32xf32>
    %cst_38 = arith.constant dense<0.000000e+00> : vector<32xf32>
    %107 = vector.multi_reduction <add>, %106, %cst_38 [1] : vector<32x32xf32> to vector<32xf32>
    %108 = vector.shape_cast %107 : vector<32xf32> to vector<32x1xf32>
    %cst_39 = arith.constant 3.200000e+01 : f32
    %109 = vector.broadcast %cst_39 : f32 to vector<32x1xf32>
    %110 = arith.divf %108, %109 : vector<32x1xf32>
    %111 = vector.broadcast %103 : vector<32x1xf32> to vector<32x32xf32>
    %112 = arith.subf %95, %111 : vector<32x32xf32>
    %cst_40 = arith.constant 9.99999996E-13 : f32
    %113 = vector.broadcast %cst_40 : f32 to vector<32x1xf32>
    %114 = arith.addf %110, %113 : vector<32x1xf32>
    %115 = math.rsqrt %114 : vector<32x1xf32>
    %116 = vector.broadcast %115 : vector<32x1xf32> to vector<32x32xf32>
    %117 = arith.mulf %112, %116 : vector<32x32xf32>
    %118 = vector.broadcast %97 : vector<1x32xf32> to vector<32x32xf32>
    %119 = arith.mulf %117, %118 : vector<32x32xf32>
    %120 = vector.broadcast %99 : vector<1x32xf32> to vector<32x32xf32>
    %121 = arith.addf %119, %120 : vector<32x32xf32>
    %c0_41 = arith.constant 0 : index
    %c0_42 = arith.constant 0 : index
    %c128_43 = arith.constant 128 : index
    %122 = vector.load %arg2[%c0_41, %c0_42, %c128_43] : memref<2x64x352xf32, #tpu.memory_space<vmem>>, vector<1x32x64xf32>
    %123 = vector.shape_cast %122 : vector<1x32x64xf32> to vector<32x64xf32>
    %cst_44 = arith.constant dense<0.000000e+00> : vector<32x64xf32>
    %124 = tpu.matmul %121, %123, %cst_44 {dimension_numbers = #tpu.dot_dimension_numbers<[1], [0], [0], [1], [0, 0, 1, 1], [], []>} : vector<32x32xf32>, vector<32x64xf32>, vector<32x64xf32> -> vector<32x64xf32>
    %c0_45 = arith.constant 0 : index
    %c0_46 = arith.constant 0 : index
    %c192 = arith.constant 192 : index
    %125 = vector.load %arg3[%c0_45, %c0_46, %c192] : memref<2x1x544xf32, #tpu.memory_space<vmem>>, vector<1x1x64xf32>
    %126 = vector.shape_cast %125 : vector<1x1x64xf32> to vector<1x64xf32>
    %127 = vector.broadcast %126 : vector<1x64xf32> to vector<32x64xf32>
    %128 = arith.addf %124, %127 : vector<32x64xf32>
    %129 = arith.mulf %128, %128 : vector<32x64xf32>
    %130 = arith.mulf %128, %129 : vector<32x64xf32>
    %cst_47 = arith.constant 4.471500e-02 : f32
    %131 = vector.broadcast %cst_47 : f32 to vector<32x64xf32>
    %132 = arith.mulf %131, %130 : vector<32x64xf32>
    %133 = arith.addf %128, %132 : vector<32x64xf32>
    %cst_48 = arith.constant 0.797884583 : f32
    %134 = vector.broadcast %cst_48 : f32 to vector<32x64xf32>
    %135 = arith.mulf %134, %133 : vector<32x64xf32>
    %136 = math.tanh %135 : vector<32x64xf32>
    %cst_49 = arith.constant 1.000000e+00 : f32
    %137 = vector.broadcast %cst_49 : f32 to vector<32x64xf32>
    %138 = arith.addf %137, %136 : vector<32x64xf32>
    %cst_50 = arith.constant 5.000000e-01 : f32
    %139 = vector.broadcast %cst_50 : f32 to vector<32x64xf32>
    %140 = arith.mulf %139, %138 : vector<32x64xf32>
    %141 = arith.mulf %128, %140 : vector<32x64xf32>
    %c0_51 = arith.constant 0 : index
    %c0_52 = arith.constant 0 : index
    %c320 = arith.constant 320 : index
    %142 = vector.load %arg2[%c0_51, %c0_52, %c320] : memref<2x64x352xf32, #tpu.memory_space<vmem>>, vector<1x64x32xf32>
    %143 = vector.shape_cast %142 : vector<1x64x32xf32> to vector<64x32xf32>
    %cst_53 = arith.constant dense<0.000000e+00> : vector<32x32xf32>
    %144 = tpu.matmul %141, %143, %cst_53 {dimension_numbers = #tpu.dot_dimension_numbers<[1], [0], [0], [1], [0, 0, 1, 1], [], []>} : vector<32x64xf32>, vector<64x32xf32>, vector<32x32xf32> -> vector<32x32xf32>
    %c0_54 = arith.constant 0 : index
    %c0_55 = arith.constant 0 : index
    %c256 = arith.constant 256 : index
    %145 = vector.load %arg3[%c0_54, %c0_55, %c256] : memref<2x1x544xf32, #tpu.memory_space<vmem>>, vector<1x1x32xf32>
    %146 = vector.shape_cast %145 : vector<1x1x32xf32> to vector<1x32xf32>
    %147 = vector.broadcast %146 : vector<1x32xf32> to vector<32x32xf32>
    %148 = arith.addf %144, %147 : vector<32x32xf32>
    %149 = arith.addf %148, %121 : vector<32x32xf32>
    %c0_56 = arith.constant 0 : index
    %c0_57 = arith.constant 0 : index
    %c288 = arith.constant 288 : index
    %150 = vector.load %arg3[%c0_56, %c0_57, %c288] : memref<2x1x544xf32, #tpu.memory_space<vmem>>, vector<1x1x32xf32>
    %151 = vector.shape_cast %150 : vector<1x1x32xf32> to vector<1x32xf32>
    %c0_58 = arith.constant 0 : index
    %c0_59 = arith.constant 0 : index
    %c320_60 = arith.constant 320 : index
    %152 = vector.load %arg3[%c0_58, %c0_59, %c320_60] : memref<2x1x544xf32, #tpu.memory_space<vmem>>, vector<1x1x32xf32>
    %153 = vector.shape_cast %152 : vector<1x1x32xf32> to vector<1x32xf32>
    %cst_61 = arith.constant dense<0.000000e+00> : vector<32xf32>
    %154 = vector.multi_reduction <add>, %149, %cst_61 [1] : vector<32x32xf32> to vector<32xf32>
    %155 = vector.shape_cast %154 : vector<32xf32> to vector<32x1xf32>
    %cst_62 = arith.constant 3.200000e+01 : f32
    %156 = vector.broadcast %cst_62 : f32 to vector<32x1xf32>
    %157 = arith.divf %155, %156 : vector<32x1xf32>
    %158 = vector.broadcast %157 : vector<32x1xf32> to vector<32x32xf32>
    %159 = arith.subf %149, %158 : vector<32x32xf32>
    %160 = arith.mulf %159, %159 : vector<32x32xf32>
    %cst_63 = arith.constant dense<0.000000e+00> : vector<32xf32>
    %161 = vector.multi_reduction <add>, %160, %cst_63 [1] : vector<32x32xf32> to vector<32xf32>
    %162 = vector.shape_cast %161 : vector<32xf32> to vector<32x1xf32>
    %cst_64 = arith.constant 3.200000e+01 : f32
    %163 = vector.broadcast %cst_64 : f32 to vector<32x1xf32>
    %164 = arith.divf %162, %163 : vector<32x1xf32>
    %165 = vector.broadcast %157 : vector<32x1xf32> to vector<32x32xf32>
    %166 = arith.subf %149, %165 : vector<32x32xf32>
    %cst_65 = arith.constant 9.99999996E-13 : f32
    %167 = vector.broadcast %cst_65 : f32 to vector<32x1xf32>
    %168 = arith.addf %164, %167 : vector<32x1xf32>
    %169 = math.rsqrt %168 : vector<32x1xf32>
    %170 = vector.broadcast %169 : vector<32x1xf32> to vector<32x32xf32>
    %171 = arith.mulf %166, %170 : vector<32x32xf32>
    %172 = vector.broadcast %151 : vector<1x32xf32> to vector<32x32xf32>
    %173 = arith.mulf %171, %172 : vector<32x32xf32>
    %174 = vector.broadcast %153 : vector<1x32xf32> to vector<32x32xf32>
    %175 = arith.addf %173, %174 : vector<32x32xf32>
    %c1 = arith.constant 1 : index
    %c0_66 = arith.constant 0 : index
    %c0_67 = arith.constant 0 : index
    %176 = vector.load %arg2[%c1, %c0_66, %c0_67] : memref<2x64x352xf32, #tpu.memory_space<vmem>>, vector<1x32x96xf32>
    %177 = vector.shape_cast %176 : vector<1x32x96xf32> to vector<32x96xf32>
    %cst_68 = arith.constant dense<0.000000e+00> : vector<32x96xf32>
    %178 = tpu.matmul %175, %177, %cst_68 {dimension_numbers = #tpu.dot_dimension_numbers<[1], [0], [0], [1], [0, 0, 1, 1], [], []>} : vector<32x32xf32>, vector<32x96xf32>, vector<32x96xf32> -> vector<32x96xf32>
    %c1_69 = arith.constant 1 : index
    %c0_70 = arith.constant 0 : index
    %c0_71 = arith.constant 0 : index
    %179 = vector.load %arg3[%c1_69, %c0_70, %c0_71] : memref<2x1x544xf32, #tpu.memory_space<vmem>>, vector<1x1x96xf32>
    %180 = vector.shape_cast %179 : vector<1x1x96xf32> to vector<1x96xf32>
    %181 = vector.broadcast %180 : vector<1x96xf32> to vector<32x96xf32>
    %182 = arith.addf %178, %181 : vector<32x96xf32>
    %183 = vector.extract_strided_slice %182 {offsets = [0, 0], sizes = [32, 8], strides = [1, 1]} : vector<32x96xf32> to vector<32x8xf32>
    %184 = vector.shape_cast %183 : vector<32x8xf32> to vector<2x16x8xf32>
    %185 = vector.extract_strided_slice %182 {offsets = [0, 8], sizes = [32, 8], strides = [1, 1]} : vector<32x96xf32> to vector<32x8xf32>
    %186 = vector.shape_cast %185 : vector<32x8xf32> to vector<2x16x8xf32>
    %187 = vector.extract_strided_slice %182 {offsets = [0, 16], sizes = [32, 8], strides = [1, 1]} : vector<32x96xf32> to vector<32x8xf32>
    %188 = vector.shape_cast %187 : vector<32x8xf32> to vector<2x16x8xf32>
    %189 = vector.extract_strided_slice %182 {offsets = [0, 24], sizes = [32, 8], strides = [1, 1]} : vector<32x96xf32> to vector<32x8xf32>
    %190 = vector.shape_cast %189 : vector<32x8xf32> to vector<2x16x8xf32>
    %191 = tpu.concatenate %184, %186, %188, %190 in 0 : vector<2x16x8xf32>, vector<2x16x8xf32>, vector<2x16x8xf32>, vector<2x16x8xf32> -> vector<8x16x8xf32>
    %192 = vector.extract_strided_slice %182 {offsets = [0, 32], sizes = [32, 8], strides = [1, 1]} : vector<32x96xf32> to vector<32x8xf32>
    %193 = vector.shape_cast %192 : vector<32x8xf32> to vector<2x16x8xf32>
    %194 = vector.extract_strided_slice %182 {offsets = [0, 40], sizes = [32, 8], strides = [1, 1]} : vector<32x96xf32> to vector<32x8xf32>
    %195 = vector.shape_cast %194 : vector<32x8xf32> to vector<2x16x8xf32>
    %196 = vector.extract_strided_slice %182 {offsets = [0, 48], sizes = [32, 8], strides = [1, 1]} : vector<32x96xf32> to vector<32x8xf32>
    %197 = vector.shape_cast %196 : vector<32x8xf32> to vector<2x16x8xf32>
    %198 = vector.extract_strided_slice %182 {offsets = [0, 56], sizes = [32, 8], strides = [1, 1]} : vector<32x96xf32> to vector<32x8xf32>
    %199 = vector.shape_cast %198 : vector<32x8xf32> to vector<2x16x8xf32>
    %200 = tpu.concatenate %193, %195, %197, %199 in 0 : vector<2x16x8xf32>, vector<2x16x8xf32>, vector<2x16x8xf32>, vector<2x16x8xf32> -> vector<8x16x8xf32>
    %201 = vector.extract_strided_slice %182 {offsets = [0, 64], sizes = [32, 8], strides = [1, 1]} : vector<32x96xf32> to vector<32x8xf32>
    %202 = vector.shape_cast %201 : vector<32x8xf32> to vector<2x16x8xf32>
    %203 = vector.extract_strided_slice %182 {offsets = [0, 72], sizes = [32, 8], strides = [1, 1]} : vector<32x96xf32> to vector<32x8xf32>
    %204 = vector.shape_cast %203 : vector<32x8xf32> to vector<2x16x8xf32>
    %205 = vector.extract_strided_slice %182 {offsets = [0, 80], sizes = [32, 8], strides = [1, 1]} : vector<32x96xf32> to vector<32x8xf32>
    %206 = vector.shape_cast %205 : vector<32x8xf32> to vector<2x16x8xf32>
    %207 = vector.extract_strided_slice %182 {offsets = [0, 88], sizes = [32, 8], strides = [1, 1]} : vector<32x96xf32> to vector<32x8xf32>
    %208 = vector.shape_cast %207 : vector<32x8xf32> to vector<2x16x8xf32>
    %209 = tpu.concatenate %202, %204, %206, %208 in 0 : vector<2x16x8xf32>, vector<2x16x8xf32>, vector<2x16x8xf32>, vector<2x16x8xf32> -> vector<8x16x8xf32>
    "tpu.trace_start"() <{level = 10 : i32, message = "bqd,bkd->bqk"}> : () -> ()
    %cst_72 = arith.constant dense<0.000000e+00> : vector<8x16x16xf32>
    %210 = tpu.matmul %191, %200, %cst_72 {dimension_numbers = #tpu.dot_dimension_numbers<[2], [2], [1], [1], [0, 0, 0, 1, 1, 1], [0], [0]>} : vector<8x16x8xf32>, vector<8x16x8xf32>, vector<8x16x16xf32> -> vector<8x16x16xf32>
    %cst_73 = arith.constant -3.40282347E+38 : f32
    "tpu.trace_stop"() : () -> ()
    %211 = vector.broadcast %cst_73 : f32 to vector<8x16x16xf32>
    %212 = arith.select %33, %211, %210 : vector<8x16x16xi1>, vector<8x16x16xf32>
    %cst_74 = arith.constant dense<0xFF800000> : vector<8x16xf32>
    %213 = vector.multi_reduction <maximumf>, %212, %cst_74 [2] : vector<8x16x16xf32> to vector<8x16xf32>
    %214 = vector.shape_cast %213 : vector<8x16xf32> to vector<8x16x1xf32>
    %215 = vector.broadcast %214 : vector<8x16x1xf32> to vector<8x16x16xf32>
    %216 = arith.subf %212, %215 : vector<8x16x16xf32>
    %217 = math.exp %216 : vector<8x16x16xf32>
    %cst_75 = arith.constant dense<0.000000e+00> : vector<8x16xf32>
    %218 = vector.multi_reduction <add>, %217, %cst_75 [2] : vector<8x16x16xf32> to vector<8x16xf32>
    %219 = vector.shape_cast %218 : vector<8x16xf32> to vector<8x16x1xf32>
    "tpu.trace_start"() <{level = 10 : i32, message = "bqk,bkd->bqd"}> : () -> ()
    %cst_76 = arith.constant dense<0.000000e+00> : vector<8x16x8xf32>
    %220 = tpu.matmul %217, %209, %cst_76 {dimension_numbers = #tpu.dot_dimension_numbers<[2], [1], [1], [2], [0, 0, 0, 1, 1, 2], [0], [0]>} : vector<8x16x16xf32>, vector<8x16x8xf32>, vector<8x16x8xf32> -> vector<8x16x8xf32>
    "tpu.trace_stop"() : () -> ()
    %221 = tpu.reciprocal %219 {approx = true} : vector<8x16x1xf32> -> vector<8x16x1xf32>
    %222 = vector.broadcast %221 : vector<8x16x1xf32> to vector<8x16x8xf32>
    %223 = arith.mulf %220, %222 : vector<8x16x8xf32>
    %224 = vector.extract_strided_slice %223 {offsets = [0, 0, 0], sizes = [2, 16, 8], strides = [1, 1, 1]} : vector<8x16x8xf32> to vector<2x16x8xf32>
    %225 = vector.extract_strided_slice %223 {offsets = [2, 0, 0], sizes = [2, 16, 8], strides = [1, 1, 1]} : vector<8x16x8xf32> to vector<2x16x8xf32>
    %226 = vector.extract_strided_slice %223 {offsets = [4, 0, 0], sizes = [2, 16, 8], strides = [1, 1, 1]} : vector<8x16x8xf32> to vector<2x16x8xf32>
    %227 = vector.extract_strided_slice %223 {offsets = [6, 0, 0], sizes = [2, 16, 8], strides = [1, 1, 1]} : vector<8x16x8xf32> to vector<2x16x8xf32>
    %228 = tpu.concatenate %224, %225, %226, %227 in 2 : vector<2x16x8xf32>, vector<2x16x8xf32>, vector<2x16x8xf32>, vector<2x16x8xf32> -> vector<2x16x32xf32>
    %229 = vector.shape_cast %228 : vector<2x16x32xf32> to vector<32x32xf32>
    %c1_77 = arith.constant 1 : index
    %c0_78 = arith.constant 0 : index
    %c96_79 = arith.constant 96 : index
    %230 = vector.load %arg2[%c1_77, %c0_78, %c96_79] : memref<2x64x352xf32, #tpu.memory_space<vmem>>, vector<1x32x32xf32>
    %231 = vector.shape_cast %230 : vector<1x32x32xf32> to vector<32x32xf32>
    %cst_80 = arith.constant dense<0.000000e+00> : vector<32x32xf32>
    %232 = tpu.matmul %229, %231, %cst_80 {dimension_numbers = #tpu.dot_dimension_numbers<[1], [0], [0], [1], [0, 0, 1, 1], [], []>} : vector<32x32xf32>, vector<32x32xf32>, vector<32x32xf32> -> vector<32x32xf32>
    %c1_81 = arith.constant 1 : index
    %c0_82 = arith.constant 0 : index
    %c96_83 = arith.constant 96 : index
    %233 = vector.load %arg3[%c1_81, %c0_82, %c96_83] : memref<2x1x544xf32, #tpu.memory_space<vmem>>, vector<1x1x32xf32>
    %234 = vector.shape_cast %233 : vector<1x1x32xf32> to vector<1x32xf32>
    %235 = vector.broadcast %234 : vector<1x32xf32> to vector<32x32xf32>
    %236 = arith.addf %232, %235 : vector<32x32xf32>
    %237 = arith.addf %236, %175 : vector<32x32xf32>
    %c1_84 = arith.constant 1 : index
    %c0_85 = arith.constant 0 : index
    %c128_86 = arith.constant 128 : index
    %238 = vector.load %arg3[%c1_84, %c0_85, %c128_86] : memref<2x1x544xf32, #tpu.memory_space<vmem>>, vector<1x1x32xf32>
    %239 = vector.shape_cast %238 : vector<1x1x32xf32> to vector<1x32xf32>
    %c1_87 = arith.constant 1 : index
    %c0_88 = arith.constant 0 : index
    %c160_89 = arith.constant 160 : index
    %240 = vector.load %arg3[%c1_87, %c0_88, %c160_89] : memref<2x1x544xf32, #tpu.memory_space<vmem>>, vector<1x1x32xf32>
    %241 = vector.shape_cast %240 : vector<1x1x32xf32> to vector<1x32xf32>
    %cst_90 = arith.constant dense<0.000000e+00> : vector<32xf32>
    %242 = vector.multi_reduction <add>, %237, %cst_90 [1] : vector<32x32xf32> to vector<32xf32>
    %243 = vector.shape_cast %242 : vector<32xf32> to vector<32x1xf32>
    %cst_91 = arith.constant 3.200000e+01 : f32
    %244 = vector.broadcast %cst_91 : f32 to vector<32x1xf32>
    %245 = arith.divf %243, %244 : vector<32x1xf32>
    %246 = vector.broadcast %245 : vector<32x1xf32> to vector<32x32xf32>
    %247 = arith.subf %237, %246 : vector<32x32xf32>
    %248 = arith.mulf %247, %247 : vector<32x32xf32>
    %cst_92 = arith.constant dense<0.000000e+00> : vector<32xf32>
    %249 = vector.multi_reduction <add>, %248, %cst_92 [1] : vector<32x32xf32> to vector<32xf32>
    %250 = vector.shape_cast %249 : vector<32xf32> to vector<32x1xf32>
    %cst_93 = arith.constant 3.200000e+01 : f32
    %251 = vector.broadcast %cst_93 : f32 to vector<32x1xf32>
    %252 = arith.divf %250, %251 : vector<32x1xf32>
    %253 = vector.broadcast %245 : vector<32x1xf32> to vector<32x32xf32>
    %254 = arith.subf %237, %253 : vector<32x32xf32>
    %cst_94 = arith.constant 9.99999996E-13 : f32
    %255 = vector.broadcast %cst_94 : f32 to vector<32x1xf32>
    %256 = arith.addf %252, %255 : vector<32x1xf32>
    %257 = math.rsqrt %256 : vector<32x1xf32>
    %258 = vector.broadcast %257 : vector<32x1xf32> to vector<32x32xf32>
    %259 = arith.mulf %254, %258 : vector<32x32xf32>
    %260 = vector.broadcast %239 : vector<1x32xf32> to vector<32x32xf32>
    %261 = arith.mulf %259, %260 : vector<32x32xf32>
    %262 = vector.broadcast %241 : vector<1x32xf32> to vector<32x32xf32>
    %263 = arith.addf %261, %262 : vector<32x32xf32>
    %c1_95 = arith.constant 1 : index
    %c0_96 = arith.constant 0 : index
    %c128_97 = arith.constant 128 : index
    %264 = vector.load %arg2[%c1_95, %c0_96, %c128_97] : memref<2x64x352xf32, #tpu.memory_space<vmem>>, vector<1x32x64xf32>
    %265 = vector.shape_cast %264 : vector<1x32x64xf32> to vector<32x64xf32>
    %cst_98 = arith.constant dense<0.000000e+00> : vector<32x64xf32>
    %266 = tpu.matmul %263, %265, %cst_98 {dimension_numbers = #tpu.dot_dimension_numbers<[1], [0], [0], [1], [0, 0, 1, 1], [], []>} : vector<32x32xf32>, vector<32x64xf32>, vector<32x64xf32> -> vector<32x64xf32>
    %c1_99 = arith.constant 1 : index
    %c0_100 = arith.constant 0 : index
    %c192_101 = arith.constant 192 : index
    %267 = vector.load %arg3[%c1_99, %c0_100, %c192_101] : memref<2x1x544xf32, #tpu.memory_space<vmem>>, vector<1x1x64xf32>
    %268 = vector.shape_cast %267 : vector<1x1x64xf32> to vector<1x64xf32>
    %269 = vector.broadcast %268 : vector<1x64xf32> to vector<32x64xf32>
    %270 = arith.addf %266, %269 : vector<32x64xf32>
    %271 = arith.mulf %270, %270 : vector<32x64xf32>
    %272 = arith.mulf %270, %271 : vector<32x64xf32>
    %cst_102 = arith.constant 4.471500e-02 : f32
    %273 = vector.broadcast %cst_102 : f32 to vector<32x64xf32>
    %274 = arith.mulf %273, %272 : vector<32x64xf32>
    %275 = arith.addf %270, %274 : vector<32x64xf32>
    %cst_103 = arith.constant 0.797884583 : f32
    %276 = vector.broadcast %cst_103 : f32 to vector<32x64xf32>
    %277 = arith.mulf %276, %275 : vector<32x64xf32>
    %278 = math.tanh %277 : vector<32x64xf32>
    %cst_104 = arith.constant 1.000000e+00 : f32
    %279 = vector.broadcast %cst_104 : f32 to vector<32x64xf32>
    %280 = arith.addf %279, %278 : vector<32x64xf32>
    %cst_105 = arith.constant 5.000000e-01 : f32
    %281 = vector.broadcast %cst_105 : f32 to vector<32x64xf32>
    %282 = arith.mulf %281, %280 : vector<32x64xf32>
    %283 = arith.mulf %270, %282 : vector<32x64xf32>
    %c1_106 = arith.constant 1 : index
    %c0_107 = arith.constant 0 : index
    %c320_108 = arith.constant 320 : index
    %284 = vector.load %arg2[%c1_106, %c0_107, %c320_108] : memref<2x64x352xf32, #tpu.memory_space<vmem>>, vector<1x64x32xf32>
    %285 = vector.shape_cast %284 : vector<1x64x32xf32> to vector<64x32xf32>
    %cst_109 = arith.constant dense<0.000000e+00> : vector<32x32xf32>
    %286 = tpu.matmul %283, %285, %cst_109 {dimension_numbers = #tpu.dot_dimension_numbers<[1], [0], [0], [1], [0, 0, 1, 1], [], []>} : vector<32x64xf32>, vector<64x32xf32>, vector<32x32xf32> -> vector<32x32xf32>
    %c1_110 = arith.constant 1 : index
    %c0_111 = arith.constant 0 : index
    %c256_112 = arith.constant 256 : index
    %287 = vector.load %arg3[%c1_110, %c0_111, %c256_112] : memref<2x1x544xf32, #tpu.memory_space<vmem>>, vector<1x1x32xf32>
    %288 = vector.shape_cast %287 : vector<1x1x32xf32> to vector<1x32xf32>
    %289 = vector.broadcast %288 : vector<1x32xf32> to vector<32x32xf32>
    %290 = arith.addf %286, %289 : vector<32x32xf32>
    %291 = arith.addf %290, %263 : vector<32x32xf32>
    %c1_113 = arith.constant 1 : index
    %c0_114 = arith.constant 0 : index
    %c288_115 = arith.constant 288 : index
    %292 = vector.load %arg3[%c1_113, %c0_114, %c288_115] : memref<2x1x544xf32, #tpu.memory_space<vmem>>, vector<1x1x32xf32>
    %293 = vector.shape_cast %292 : vector<1x1x32xf32> to vector<1x32xf32>
    %c1_116 = arith.constant 1 : index
    %c0_117 = arith.constant 0 : index
    %c320_118 = arith.constant 320 : index
    %294 = vector.load %arg3[%c1_116, %c0_117, %c320_118] : memref<2x1x544xf32, #tpu.memory_space<vmem>>, vector<1x1x32xf32>
    %295 = vector.shape_cast %294 : vector<1x1x32xf32> to vector<1x32xf32>
    %cst_119 = arith.constant dense<0.000000e+00> : vector<32xf32>
    %296 = vector.multi_reduction <add>, %291, %cst_119 [1] : vector<32x32xf32> to vector<32xf32>
    %297 = vector.shape_cast %296 : vector<32xf32> to vector<32x1xf32>
    %cst_120 = arith.constant 3.200000e+01 : f32
    %298 = vector.broadcast %cst_120 : f32 to vector<32x1xf32>
    %299 = arith.divf %297, %298 : vector<32x1xf32>
    %300 = vector.broadcast %299 : vector<32x1xf32> to vector<32x32xf32>
    %301 = arith.subf %291, %300 : vector<32x32xf32>
    %302 = arith.mulf %301, %301 : vector<32x32xf32>
    %cst_121 = arith.constant dense<0.000000e+00> : vector<32xf32>
    %303 = vector.multi_reduction <add>, %302, %cst_121 [1] : vector<32x32xf32> to vector<32xf32>
    %304 = vector.shape_cast %303 : vector<32xf32> to vector<32x1xf32>
    %cst_122 = arith.constant 3.200000e+01 : f32
    %305 = vector.broadcast %cst_122 : f32 to vector<32x1xf32>
    %306 = arith.divf %304, %305 : vector<32x1xf32>
    %307 = vector.broadcast %299 : vector<32x1xf32> to vector<32x32xf32>
    %308 = arith.subf %291, %307 : vector<32x32xf32>
    %cst_123 = arith.constant 9.99999996E-13 : f32
    %309 = vector.broadcast %cst_123 : f32 to vector<32x1xf32>
    %310 = arith.addf %306, %309 : vector<32x1xf32>
    %311 = math.rsqrt %310 : vector<32x1xf32>
    %312 = vector.broadcast %311 : vector<32x1xf32> to vector<32x32xf32>
    %313 = arith.mulf %308, %312 : vector<32x32xf32>
    %314 = vector.broadcast %293 : vector<1x32xf32> to vector<32x32xf32>
    %315 = arith.mulf %313, %314 : vector<32x32xf32>
    %316 = vector.broadcast %295 : vector<1x32xf32> to vector<32x32xf32>
    %317 = arith.addf %315, %316 : vector<32x32xf32>
    %c0_124 = arith.constant 0 : index
    %c0_125 = arith.constant 0 : index
    %c192_126 = arith.constant 192 : index
    %318 = vector.load %arg2[%c0_124, %c0_125, %c192_126] : memref<2x64x352xf32, #tpu.memory_space<vmem>>, vector<1x32x128xf32>
    %319 = vector.shape_cast %318 : vector<1x32x128xf32> to vector<32x128xf32>
    %cst_127 = arith.constant dense<0.000000e+00> : vector<32x128xf32>
    %320 = tpu.matmul %317, %319, %cst_127 {dimension_numbers = #tpu.dot_dimension_numbers<[1], [0], [0], [1], [0, 0, 1, 1], [], []>} : vector<32x32xf32>, vector<32x128xf32>, vector<32x128xf32> -> vector<32x128xf32>
    %c0_128 = arith.constant 0 : index
    %c0_129 = arith.constant 0 : index
    %c416 = arith.constant 416 : index
    %321 = vector.load %arg3[%c0_128, %c0_129, %c416] : memref<2x1x544xf32, #tpu.memory_space<vmem>>, vector<1x1x128xf32>
    %322 = vector.shape_cast %321 : vector<1x1x128xf32> to vector<1x128xf32>
    %323 = vector.broadcast %322 : vector<1x128xf32> to vector<32x128xf32>
    %324 = arith.addf %320, %323 : vector<32x128xf32>
    %c0_130 = arith.constant 0 : index
    %c0_131 = arith.constant 0 : index
    %325 = vector.load %arg4[%c0_130, %c0_131] : memref<32x128xf32, #tpu.memory_space<vmem>>, vector<32x128xf32>
    tpu.vector_store %arg4[%c0_130, %c0_131], %324 {strides = array<i32>} : memref<32x128xf32, #tpu.memory_space<vmem>>, vector<32x128xf32>,
    return
  }
}

</mosaic_0001>

<bundles_post_ra>
// kernel: trait_classifier_forward.1
= control target key start
LH: loop header
LB: loop body
LE: loop exit
PB: predicated region body
PF: predicated region fallthrough
CT: control target
= control target key end

     0   :  { %vm23_vm0 = vcmask 261120   ;;  %s5886_s24 = smov 32   ;;  %vm255_vm1 = vcmask 64512   ;;  %s5887_s11 = smov 120   ;;  %vm964_vm3 = vcmask 130048   ;;  %vm1893_vm5 = vcmask 195584   ;;  %s7205_s0 = inlined_call_operand.vmem [shape: f32[2,16,32], index: 0, kind: input, shape index: {}]   ;;  %s7206_s3 = inlined_call_operand.vmem [shape: f32[2,1,544], index: 3, kind: input, shape index: {}]   ;;  %s7207_s2 = inlined_call_operand.vmem [shape: f32[2,64,352], index: 2, kind: input, shape index: {}]   ;;  %s7208_s1 = inlined_call_operand.vmem [shape: f32[2,1,16], index: 1, kind: input, shape index: {}]   ;;  %s7209_s4 = inlined_call_operand.vmem [shape: f32[32,128], index: 4, kind: output, shape index: {}]  }
   0x1   :  { %v17_v0 = vld [vmem:[%s7205_s0] sm:$0xff]  ;;  %v19_v1 = vld [vmem:[%s7205_s0 + $0x10] sm:$0xff]  ;;  %v18_v2 = vld [vmem:[%s7205_s0 + $0x8] sm:$0xff]  ;;  %s5888_s12 = smov 112   ;;  %s5889_s13 = smov 104   ;;  %vm2285_vm6 = vcmask 523264  }
   0x2   :  { %v24_v3 = vsel %vm23_vm0, %v17_v0, 0.0  ;;  %v30_v4 = vsel %vm23_vm0, %v19_v1, 0.0  ;;  %v20_v5 = vld [vmem:[%s7205_s0 + $0x18] sm:$0xff]  ;;  %v27_v6 = vsel %vm23_vm0, %v18_v2, 0.0  ;;  %v4951_v28 = vld [vmem:[%s7206_s3 + $0x2] ss:$0 sm:$0xff] }
   0x3   :  { %25 = vadd.xlane.f32.xlu0 %v24_v3  ;;  %31 = vadd.xlane.f32.xlu1 %v30_v4  ;;  %v33_v7 = vsel %vm23_vm0, %v20_v5, 0.0  ;;  %v5947_v29 = vld [vmem:[%s7207_s2 + $0x48] sm:$0xff]  ;;  %v5954_v30 = vld [vmem:[%s7207_s2 + $0x30] sm:$0xff]  ;;  %v5961_v31 = vld [vmem:[%s7207_s2 + $0x18] sm:$0xff]  ;;  %s5890_s14 = smov 96   ;;  %s5891_s15 = smov 64  }
   0x4   :  { %5327 = vmatprep.subr.mxu0 %v5947_v29  ;;  %v5968_v32 = vld [vmem:[%s7207_s2] sm:$0xff]  ;;  %s5893_s20 = smov 16   ;;  %s5894_s21 = smov 24   ;;  %vm4843_vm7 = vcmask 785408  }
   0x5   :  { %5328 = vmatpush3.msra.mxu0 %v5947_v29  ;;  %v4952_v48 = vld [vmem:[%s7206_s3 + $0x3] ss:$0 sm:$0xff]  ;;  %v5994_v63 = vld [vmem:[%s7206_s3] ss:$0 sm:$0xff] }
   0x6   :  { %5329 = vmatprep.subr.mxu0 %v5954_v30 }
   0x7   :  { %28 = vadd.xlane.f32.xlu0 %v27_v6  ;;  %34 = vadd.xlane.f32.xlu1 %v33_v7 }
   0x8   :  { %5330 = vmatpush3.msra.mxu0 %v5954_v30 }
   0x9   :  { %5331 = vmatprep.subr.mxu0 %v5961_v31 }
   0xa   :  { %5332 = vmatpush3.msra.mxu0 %v5961_v31 }
   0xb   :  { %5333 = vmatprep.subr.mxu0 %v5968_v32 }
   0xc   :  { %5334 = vmatpush3.msra.mxu0 %v5968_v32 }
  0x8c   :  { %v26_v8 = vpop.xlane.xlu0 %25  ;;  %v32_v9 = vpop.xlane.xlu1 %31 }
  0x8d   :  { %v37_v10 = vmul.f32 0.03125, %v26_v8  ;;  %v39_v11 = vmul.f32 0.03125, %v32_v9 }
  0x8f   :  { %v41_v12 = vsub.f32 %v17_v0, %v37_v10  ;;  %v43_v13 = vsub.f32 %v19_v1, %v39_v11 }
  0x90   :  { %v29_v14 = vpop.xlane.xlu0 %28  ;;  %v35_v15 = vpop.xlane.xlu1 %34 }
  0x91   :  { %v38_v16 = vmul.f32 0.03125, %v29_v14  ;;  %v40_v17 = vmul.f32 0.03125, %v35_v15  ;;  %v45_v18 = vmul.f32 %v41_v12, %v41_v12  ;;  %v47_v19 = vmul.f32 %v43_v13, %v43_v13 }
  0x93   :  { %v42_v20 = vsub.f32 %v18_v2, %v38_v16  ;;  %v44_v21 = vsub.f32 %v20_v5, %v40_v17  ;;  %v49_v22 = vsel %vm23_vm0, %v45_v18, 0.0  ;;  %v55_v23 = vsel %vm23_vm0, %v47_v19, 0.0 }
  0x94   :  { %50 = vadd.xlane.f32.xlu0 %v49_v22 }
  0x95   :  { %v46_v24 = vmul.f32 %v42_v20, %v42_v20  ;;  %v48_v25 = vmul.f32 %v44_v21, %v44_v21 }
  0x97   :  { %v52_v26 = vsel %vm23_vm0, %v46_v24, 0.0  ;;  %v58_v27 = vsel %vm23_vm0, %v48_v25, 0.0 }
  0x98   :  { %56 = vadd.xlane.f32.xlu0 %v55_v23  ;;  %53 = vadd.xlane.f32.xlu1 %v52_v26 }
  0x9c   :  { %59 = vadd.xlane.f32.xlu1 %v58_v27 }
  0xae   :  { %82 = vrot.lane.b32.xlu0 %v4951_v28, %s5886_s24 }
 0x11d   :  { %v51_v33 = vpop.xlane.xlu0 %50 }
 0x11e   :  { %v61_v34 = vmul.f32 0.03125, %v51_v33 }
 0x120   :  { %v65_v35 = vadd.f32 1e-12, %v61_v34 }
 0x121   :  { %v54_v36 = vpop.xlane.xlu1 %53  ;;  %v57_v37 = vpop.xlane.xlu0 %56 }
 0x122   :  { %5702 = vrsqrt.f32 %v65_v35  ;;  %v62_v38 = vmul.f32 0.03125, %v54_v36  ;;  %v63_v39 = vmul.f32 0.03125, %v57_v37 }
 0x124   :  { %v66_v40 = vadd.f32 1e-12, %v62_v38  ;;  %v67_v41 = vadd.f32 1e-12, %v63_v39 }
 0x125   :  { %v60_v42 = vpop.xlane.xlu1 %59  ;;  %v83_v46 = vpop.permute.xlu0 %82 }
 0x126   :  { %5704 = vrsqrt.f32 %v66_v40  ;;  %v64_v43 = vmul.f32 0.03125, %v60_v42 }
 0x127   :  { %5706 = vrsqrt.f32 %v67_v41 }
 0x128   :  { %v68_v44 = vadd.f32 1e-12, %v64_v43 }
 0x12a   :  { %5708 = vrsqrt.f32 %v68_v44 }
 0x12f   :  { %v5703_v45 = vpop.eup %5702 }
 0x130   :  { %v73_v47 = vmul.f32 %v5703_v45, %v41_v12 }
 0x132   :  { %v85_v49 = vmul.f32 %v83_v46, %v73_v47  ;;  %v6160_v47 = vld [vmem:[%s7208_s1] ss:$0 sm:$0xff] }
 0x133   :  { %v5705_v50 = vpop.eup %5704  ;;  %vm113_vm2 = vcmp.eq.f32.partialorder %v6160_v47, 0.0 }
 0x134   :  { %v5707_v51 = vpop.eup %5706  ;;  %v74_v52 = vmul.f32 %v5705_v50, %v42_v20  ;;  %v5975_v53 = vadd.f32 %v4952_v48, %v85_v49 }
 0x135   :  { %v75_v54 = vmul.f32 %v5707_v51, %v43_v13 }
 0x136   :  { %v86_v55 = vmul.f32 %v83_v46, %v74_v52  ;;  %5335 = vmatprep.mubr.msk.f32.mxu0 %vm23_vm0, %v5975_v53 }
 0x137   :  { %v5709_v56 = vpop.eup %5708  ;;  %v87_v57 = vmul.f32 %v83_v46, %v75_v54 }
 0x138   :  { %v76_v58 = vmul.f32 %v5709_v56, %v44_v21  ;;  %v5979_v59 = vadd.f32 %v4952_v48, %v86_v55 }
 0x139   :  { %v5981_v60 = vadd.f32 %v4952_v48, %v87_v57 }
 0x13a   :  { %v88_v61 = vmul.f32 %v83_v46, %v76_v58  ;;  %5336 = vmatmul.mubr.msk.f32.vlgmr.msra.gmra.mxu0 %vm23_vm0, %v5979_v59 }
 0x13b   :  { %5338 = vmatprep.mubr.msk.f32.mxu0 %vm23_vm0, %v5981_v60 }
 0x13c   :  { %v5987_v62 = vadd.f32 %v4952_v48, %v88_v61  ;;  %v6166_v48 = vld [vmem:[%s7208_s1 + $0x1] ss:$0 sm:$0xff]  ;;  %s5892_s1 = smov 8  }
 0x13d   :  { %vm114_vm4 = vcmp.eq.f32.partialorder %v6166_v48, 0.0 }
 0x13e   :  { %5339 = vmatmul.mubr.msk.f32.gmra.mxu0 %vm23_vm0, %v5987_v62 }
 0x1fa   :  { %v5337_v0 = vpop.f32.mrf.mxu0 }
 0x1fb   :  { %v5997_v1 = vadd.f32 %v5337_v0, %v5994_v63 }
 0x1fc   :  { %v204_v2 = vpop.f32.mrf.mxu0 }
 0x1fd   :  { %v205_v3 = vadd.f32 %v5994_v63, %v204_v2  ;;  %229 = vrot.lane.b32.xlu1 %v5997_v1, %s5887_s11 }
 0x1fe   :  { %v5340_v4 = vpop.f32.mrf.mxu0 }
 0x1ff   :  { %5345 = vmatprep.mubr.msk.f32.mxu1 %vm255_vm1, %v205_v3  ;;  %v6006_v7 = vadd.f32 %v5340_v4, %v5994_v63 }
 0x200   :  { %v214_v5 = vpop.f32.mrf.mxu0 }
 0x201   :  { %v215_v6 = vadd.f32 %v5994_v63, %v214_v5  ;;  %227 = vrot.lane.b32.xlu1 %v205_v3, %s5887_s11 }
 0x203   :  { %231 = vrot.lane.b32.xlu0 %v215_v6, %s5887_s11  ;;  %5352 = vmatprep.mubr.msk.f32.mxu0 %vm255_vm1, %v215_v6 }
 0x205   :  { %233 = vrot.lane.b32.xlu1 %v6006_v7, %s5887_s11 }
 0x207   :  { %235 = vrot.lane.b32.xlu0 %v205_v3, %s5888_s12 }
 0x209   :  { %237 = vrot.lane.b32.xlu1 %v5997_v1, %s5888_s12 }
 0x20b   :  { %239 = vrot.lane.b32.xlu0 %v215_v6, %s5888_s12 }
 0x20d   :  { %241 = vrot.lane.b32.xlu1 %v6006_v7, %s5888_s12 }
 0x20f   :  { %243 = vrot.lane.b32.xlu0 %v205_v3, %s5889_s13 }
 0x211   :  { %245 = vrot.lane.b32.xlu1 %v5997_v1, %s5889_s13 }
 0x213   :  { %247 = vrot.lane.b32.xlu0 %v215_v6, %s5889_s13 }
 0x215   :  { %249 = vrot.lane.b32.xlu1 %v6006_v7, %s5889_s13 }
 0x217   :  { %251 = vrot.lane.b32.xlu0 %v205_v3, %s5890_s14 }
 0x219   :  { %253 = vrot.lane.b32.xlu1 %v5997_v1, %s5890_s14 }
 0x21b   :  { %339 = vrot.lane.b32.xlu0 %v215_v6, %s5890_s14 }
 0x21d   :  { %341 = vrot.lane.b32.xlu1 %v6006_v7, %s5890_s14 }
 0x26f   :  { %v6030_v8 = vpop.permute.xlu1 %229 }
 0x270   :  { %428 = vrot.lane.b32.xlu1 %v6030_v8, %s5890_s14 }
 0x273   :  { %v228_v9 = vpop.permute.xlu1 %227 }
 0x274   :  { %426 = vrot.lane.b32.xlu0 %v228_v9, %s5890_s14 }
 0x275   :  { %v232_v10 = vpop.permute.xlu0 %231 }
 0x277   :  { %v6035_v11 = vpop.permute.xlu1 %233 }
 0x278   :  { %513 = vrot.lane.b32.xlu0 %v232_v10, %s5890_s14  ;;  %515 = vrot.lane.b32.xlu1 %v6035_v11, %s5890_s14 }
 0x279   :  { %v236_v12 = vpop.permute.xlu0 %235 }
 0x27b   :  { %v6040_v13 = vpop.permute.xlu1 %237 }
 0x27c   :  { %600 = vrot.lane.b32.xlu0 %v236_v12, %s5890_s14  ;;  %602 = vrot.lane.b32.xlu1 %v6040_v13, %s5890_s14 }
 0x27d   :  { %v6045_v14 = vpop.permute.xlu0 %239 }
 0x27f   :  { %v6047_v15 = vpop.permute.xlu1 %241 }
 0x280   :  { %687 = vrot.lane.b32.xlu0 %v6045_v14, %s5890_s14  ;;  %689 = vrot.lane.b32.xlu1 %v6047_v15, %s5890_s14 }
 0x281   :  { %v6053_v16 = vpop.permute.xlu0 %243 }
 0x283   :  { %v6055_v17 = vpop.permute.xlu1 %245 }
 0x284   :  { %774 = vrot.lane.b32.xlu0 %v6053_v16, %s5890_s14  ;;  %776 = vrot.lane.b32.xlu1 %v6055_v17, %s5890_s14 }
 0x285   :  { %v6061_v18 = vpop.permute.xlu0 %247 }
 0x287   :  { %v6063_v19 = vpop.permute.xlu1 %249 }
 0x288   :  { %861 = vrot.lane.b32.xlu0 %v6061_v18, %s5890_s14  ;;  %863 = vrot.lane.b32.xlu1 %v6063_v19, %s5890_s14 }
 0x289   :  { %v252_v21 = vpop.permute.xlu0 %251 }
 0x28b   :  { %v254_v20 = vpop.permute.xlu1 %253 }
 0x28c   :  { %1109 = vrot.lane.b32.xlu0 %v205_v3, %s5891_s15  ;;  %1111 = vrot.lane.b32.xlu1 %v5997_v1, %s5891_s15 }
 0x28d   :  { %5341 = vmatprep.subr.msk.mxu1 %vm255_vm1, %v254_v20  ;;  %v340_v23 = vpop.permute.xlu0 %339 }
 0x28e   :  { %5342 = vmatpush3.xpose.msk.msra.mxu1 %vm255_vm1, %v254_v20 }
 0x28f   :  { %5343 = vmatprep.subr.msk.mxu1 %vm255_vm1, %v252_v21  ;;  %v342_v22 = vpop.permute.xlu1 %341 }
 0x290   :  { %1283 = vrot.lane.b32.xlu0 %v228_v9, %s5891_s15  ;;  %1198 = vrot.lane.b32.xlu1 %v6006_v7, %s5891_s15 }
 0x291   :  { %5348 = vmatprep.subr.msk.mxu0 %vm255_vm1, %v342_v22 }
 0x292   :  { %5344 = vmatpush3.xpose.msk.msra.mxu1 %vm255_vm1, %v252_v21  ;;  %5349 = vmatpush3.xpose.msk.msra.mxu0 %vm255_vm1, %v342_v22 }
 0x293   :  { %5350 = vmatprep.subr.msk.mxu0 %vm255_vm1, %v340_v23 }
 0x294   :  { %1459 = vrot.lane.b32.xlu0 %v6040_v13, %s5891_s15  ;;  %1196 = vrot.lane.b32.xlu1 %v215_v6, %s5891_s15 }
 0x295   :  { %5346 = vmatmul.mubr.msk.f32.vlgmr.msra.gmra.mxu1 %vm255_vm1, %v5997_v1 }
 0x296   :  { %5351 = vmatpush3.xpose.msk.msra.mxu0 %vm255_vm1, %v340_v23  ;;  %5359 = vmatprep.mubr.msk.f32.mxu1 %vm255_vm1, %v228_v9 }
 0x298   :  { %1457 = vrot.lane.b32.xlu0 %v236_v12, %s5891_s15  ;;  %1285 = vrot.lane.b32.xlu1 %v6030_v8, %s5891_s15 }
 0x299   :  { %5353 = vmatmul.mubr.msk.f32.vlgmr.msra.gmra.mxu0 %vm255_vm1, %v6006_v7 }
 0x29a   :  { %5366 = vmatprep.mubr.msk.f32.mxu0 %vm255_vm1, %v232_v10 }
 0x29c   :  { %1633 = vrot.lane.b32.xlu0 %v6055_v17, %s5891_s15  ;;  %1372 = vrot.lane.b32.xlu1 %v6035_v11, %s5891_s15 }
 0x2a0   :  { %1631 = vrot.lane.b32.xlu0 %v6053_v16, %s5891_s15  ;;  %1546 = vrot.lane.b32.xlu1 %v6047_v15, %s5891_s15 }
 0x2a4   :  { %1370 = vrot.lane.b32.xlu1 %v232_v10, %s5891_s15 }
 0x2a8   :  { %1544 = vrot.lane.b32.xlu1 %v6045_v14, %s5891_s15 }
 0x2e2   :  { %v429_v24 = vpop.permute.xlu1 %428 }
 0x2e3   :  { %5355 = vmatprep.subr.msk.mxu1 %vm255_vm1, %v429_v24 }
 0x2e4   :  { %5356 = vmatpush3.xpose.msk.msra.mxu1 %vm255_vm1, %v429_v24 }
 0x2e6   :  { %v427_v25 = vpop.permute.xlu0 %426 }
 0x2e7   :  { %5357 = vmatprep.subr.msk.mxu1 %vm255_vm1, %v427_v25 }
 0x2e8   :  { %5358 = vmatpush3.xpose.msk.msra.mxu1 %vm255_vm1, %v427_v25 }
 0x2ea   :  { %v514_v26 = vpop.permute.xlu0 %513  ;;  %v516_v27 = vpop.permute.xlu1 %515 }
 0x2eb   :  { %5360 = vmatmul.mubr.msk.f32.vlgmr.msra.gmra.mxu1 %vm255_vm1, %v6030_v8  ;;  %5362 = vmatprep.subr.msk.mxu0 %vm255_vm1, %v516_v27 }
 0x2ec   :  { %5363 = vmatpush3.xpose.msk.msra.mxu0 %vm255_vm1, %v516_v27  ;;  %5373 = vmatprep.mubr.msk.f32.mxu1 %vm255_vm1, %v236_v12 }
 0x2ed   :  { %5364 = vmatprep.subr.msk.mxu0 %vm255_vm1, %v514_v26 }
 0x2ee   :  { %v601_v28 = vpop.permute.xlu0 %600  ;;  %v603_v33 = vpop.permute.xlu1 %602 }
 0x2ef   :  { %5369 = vmatprep.subr.msk.mxu1 %vm255_vm1, %v603_v33 }
 0x2f0   :  { %5365 = vmatpush3.xpose.msk.msra.mxu0 %vm255_vm1, %v514_v26  ;;  %5370 = vmatpush3.xpose.msk.msra.mxu1 %vm255_vm1, %v603_v33 }
 0x2f1   :  { %5371 = vmatprep.subr.msk.mxu1 %vm255_vm1, %v601_v28 }
 0x2f2   :  { %v688_v34 = vpop.permute.xlu0 %687  ;;  %v690_v35 = vpop.permute.xlu1 %689 }
 0x2f3   :  { %5367 = vmatmul.mubr.msk.f32.vlgmr.msra.gmra.mxu0 %vm255_vm1, %v6035_v11  ;;  %5376 = vmatprep.subr.msk.mxu0 %vm255_vm1, %v690_v35 }
 0x2f4   :  { %5372 = vmatpush3.xpose.msk.msra.mxu1 %vm255_vm1, %v601_v28  ;;  %5377 = vmatpush3.xpose.msk.msra.mxu0 %vm255_vm1, %v690_v35 }
 0x2f5   :  { %5380 = vmatprep.mubr.msk.f32.mxu0 %vm255_vm1, %v6045_v14  ;;  %5378 = vmatprep.subr.msk.mxu0 %vm255_vm1, %v688_v34 }
 0x2f6   :  { %v775_v36 = vpop.permute.xlu0 %774  ;;  %v777_v37 = vpop.permute.xlu1 %776 }
 0x2f7   :  { %5374 = vmatmul.mubr.msk.f32.vlgmr.msra.gmra.mxu1 %vm255_vm1, %v6040_v13  ;;  %5383 = vmatprep.subr.msk.mxu1 %vm255_vm1, %v777_v37 }
 0x2f8   :  { %5379 = vmatpush3.xpose.msk.msra.mxu0 %vm255_vm1, %v688_v34  ;;  %5384 = vmatpush3.xpose.msk.msra.mxu1 %vm255_vm1, %v777_v37 }
 0x2f9   :  { %5387 = vmatprep.mubr.msk.f32.mxu1 %vm255_vm1, %v6053_v16  ;;  %5385 = vmatprep.subr.msk.mxu1 %vm255_vm1, %v775_v36 }
 0x2fa   :  { %v862_v38 = vpop.permute.xlu0 %861  ;;  %v864_v39 = vpop.permute.xlu1 %863 }
 0x2fb   :  { %5381 = vmatmul.mubr.msk.f32.vlgmr.msra.gmra.mxu0 %vm255_vm1, %v6047_v15  ;;  %5390 = vmatprep.subr.msk.mxu0 %vm255_vm1, %v864_v39 }
 0x2fc   :  { %5386 = vmatpush3.xpose.msk.msra.mxu1 %vm255_vm1, %v775_v36  ;;  %5391 = vmatpush3.xpose.msk.msra.mxu0 %vm255_vm1, %v864_v39 }
 0x2fd   :  { %5394 = vmatprep.mubr.msk.f32.mxu0 %vm255_vm1, %v6061_v18  ;;  %5392 = vmatprep.subr.msk.mxu0 %vm255_vm1, %v862_v38 }
 0x2fe   :  { %v1110_v40 = vpop.permute.xlu0 %1109  ;;  %v1112_v41 = vpop.permute.xlu1 %1111 }
 0x2ff   :  { %5388 = vmatmul.mubr.msk.f32.vlgmr.msra.gmra.mxu1 %vm255_vm1, %v6055_v17  ;;  %5397 = vmatprep.subr.mxu1 %v1112_v41 }
 0x300   :  { %5393 = vmatpush3.xpose.msk.msra.mxu0 %vm255_vm1, %v862_v38  ;;  %5398 = vmatpush3.msra.mxu1 %v1112_v41 }
 0x301   :  { %5399 = vmatprep.subr.mxu1 %v1110_v40 }
 0x302   :  { %v6147_v42 = vpop.permute.xlu0 %1283  ;;  %v6149_v43 = vpop.permute.xlu1 %1198  ;;  %5400 = vmatpush3.msra.mxu1 %v1110_v40 }
 0x303   :  { %5395 = vmatmul.mubr.msk.f32.vlgmr.msra.gmra.mxu0 %vm255_vm1, %v6063_v19  ;;  %5404 = vmatprep.subr.mxu1 %v6149_v43 }
 0x306   :  { %v1460_v44 = vpop.permute.xlu0 %1459  ;;  %v1197_v33 = vpop.permute.xlu1 %1196 }
 0x307   :  { %5425 = vmatprep.subr.mxu0 %v1460_v44 }
 0x308   :  { %5426 = vmatpush3.msra.mxu0 %v1460_v44 }
 0x30a   :  { %v1458_v45 = vpop.permute.xlu0 %1457 }
 0x30b   :  { %5427 = vmatprep.subr.mxu0 %v1458_v45 }
 0x30c   :  { %5428 = vmatpush3.msra.mxu0 %v1458_v45  ;;  %v1286_v45 = vpop.permute.xlu1 %1285 }
 0x30e   :  { %v6154_v46 = vpop.permute.xlu0 %1633 }
 0x30f   :  { %5439 = vmatprep.subr.mxu0 %v6154_v46 }
 0x355   :  { %v5347_v49 = vpop.f32.mrf.mxu1 }
 0x356   :  { %v6170_v50 = vsel %vm113_vm2, -3.4028235e+38, %v5347_v49 }
 0x357   :  { %v330_v51 = vpop.f32.mrf.mxu1  ;;  %v968_v52 = vsel %vm964_vm3, %v6170_v50, -inf }
 0x358   :  { %v6177_v54 = vsel %vm113_vm2, -3.4028235e+38, %v330_v51  ;;  %969 = vmax.xlane.f32.xlu0 %v968_v52  ;;  %v6265_v52 = vpop.permute.xlu1 %1372 }
 0x359   :  { %v5354_v55 = vpop.f32.mrf.mxu0  ;;  %v965_v56 = vsel %vm964_vm3, %v6177_v54, -inf }
 0x35a   :  { %v6183_v57 = vsel %vm114_vm4, -3.4028235e+38, %v5354_v55  ;;  %966 = vmax.xlane.f32.xlu1 %v965_v56 }
 0x35b   :  { %v417_v58 = vpop.f32.mrf.mxu0  ;;  %v974_v61 = vsel %vm964_vm3, %v6183_v57, -inf }
 0x35c   :  { %v6189_v0 = vsel %vm114_vm4, -3.4028235e+38, %v417_v58  ;;  %975 = vmax.xlane.f32.xlu0 %v974_v61  ;;  %v6267_v55 = vpop.permute.xlu1 %1546  ;;  %v6273_v58 = vpop.permute.xlu0 %1631 }
 0x35d   :  { %v971_v1 = vsel %vm964_vm3, %v6189_v0, -inf }
 0x360   :  { %972 = vmax.xlane.f32.xlu0 %v971_v1  ;;  %v6269_v56 = vpop.permute.xlu1 %1370 }
 0x364   :  { %v6275_v61 = vpop.permute.xlu1 %1544 }
 0x3ab   :  { %v5361_v2 = vpop.f32.mrf.mxu1 }
 0x3ac   :  { %v6195_v3 = vsel %vm113_vm2, -3.4028235e+38, %v5361_v2 }
 0x3ad   :  { %v504_v4 = vpop.f32.mrf.mxu1  ;;  %v980_v5 = vsel %vm964_vm3, %v6195_v3, -inf }
 0x3ae   :  { %v6201_v6 = vsel %vm113_vm2, -3.4028235e+38, %v504_v4  ;;  %981 = vmax.xlane.f32.xlu0 %v980_v5 }
 0x3af   :  { %v977_v7 = vsel %vm964_vm3, %v6201_v6, -inf }
 0x3b0   :  { %978 = vmax.xlane.f32.xlu1 %v977_v7 }
 0x3b3   :  { %v5368_v8 = vpop.f32.mrf.mxu0 }
 0x3b4   :  { %v6207_v9 = vsel %vm114_vm4, -3.4028235e+38, %v5368_v8 }
 0x3b5   :  { %v591_v10 = vpop.f32.mrf.mxu0  ;;  %v986_v11 = vsel %vm964_vm3, %v6207_v9, -inf }
 0x3b6   :  { %v6213_v12 = vsel %vm114_vm4, -3.4028235e+38, %v591_v10  ;;  %987 = vmax.xlane.f32.xlu1 %v986_v11 }
 0x3b7   :  { %v5375_v13 = vpop.f32.mrf.mxu1  ;;  %v983_v16 = vsel %vm964_vm3, %v6213_v12, -inf }
 0x3b8   :  { %v6217_v14 = vsel %vm113_vm2, -3.4028235e+38, %v5375_v13 }
 0x3b9   :  { %v678_v15 = vpop.f32.mrf.mxu1  ;;  %v992_v17 = vsel %vm964_vm3, %v6217_v14, -inf }
 0x3ba   :  { %v6225_v20 = vsel %vm113_vm2, -3.4028235e+38, %v678_v15  ;;  %984 = vmax.xlane.f32.xlu1 %v983_v16  ;;  %993 = vmax.xlane.f32.xlu0 %v992_v17 }
 0x3bb   :  { %v5382_v21 = vpop.f32.mrf.mxu0  ;;  %v989_v25 = vsel %vm964_vm3, %v6225_v20, -inf }
 0x3bc   :  { %v6229_v22 = vsel %vm114_vm4, -3.4028235e+38, %v5382_v21 }
 0x3bd   :  { %v765_v23 = vpop.f32.mrf.mxu0  ;;  %v998_v24 = vsel %vm964_vm3, %v6229_v22, -inf }
 0x3be   :  { %v6237_v26 = vsel %vm114_vm4, -3.4028235e+38, %v765_v23  ;;  %999 = vmax.xlane.f32.xlu1 %v998_v24  ;;  %990 = vmax.xlane.f32.xlu0 %v989_v25 }
 0x3bf   :  { %v5389_v27 = vpop.f32.mrf.mxu1  ;;  %v995_v35 = vsel %vm964_vm3, %v6237_v26, -inf }
 0x3c0   :  { %v6241_v28 = vsel %vm113_vm2, -3.4028235e+38, %v5389_v27 }
 0x3c1   :  { %v852_v34 = vpop.f32.mrf.mxu1  ;;  %v1004_v36 = vsel %vm964_vm3, %v6241_v28, -inf }
 0x3c2   :  { %v6249_v37 = vsel %vm113_vm2, -3.4028235e+38, %v852_v34  ;;  %996 = vmax.xlane.f32.xlu1 %v995_v35  ;;  %1005 = vmax.xlane.f32.xlu0 %v1004_v36 }
 0x3c3   :  { %v5396_v38 = vpop.f32.mrf.mxu0  ;;  %v1001_v40 = vsel %vm964_vm3, %v6249_v37, -inf }
 0x3c4   :  { %v6255_v41 = vsel %vm114_vm4, -3.4028235e+38, %v5396_v38 }
 0x3c5   :  { %v939_v39 = vpop.f32.mrf.mxu0  ;;  %v1010_v51 = vsel %vm964_vm3, %v6255_v41, -inf }
 0x3c6   :  { %v6259_v44 = vsel %vm114_vm4, -3.4028235e+38, %v939_v39  ;;  %1002 = vmax.xlane.f32.xlu0 %v1001_v40 }
 0x3c7   :  { %v1007_v49 = vsel %vm964_vm3, %v6259_v44, -inf }
 0x3c8   :  { %1008 = vmax.xlane.f32.xlu1 %v1007_v49 }
 0x3ca   :  { %1011 = vmax.xlane.f32.xlu0 %v1010_v51 }
 0x3d9   :  { %1720 = vrot.lane.b32.xlu1 %v6063_v19, %s5891_s15 }
 0x3e0   :  { %1718 = vrot.lane.b32.xlu0 %v6061_v18, %s5891_s15 }
 0x3e1   :  { %v970_v1 = vpop.xlane.xlu0 %969 }
 0x3e2   :  { %v1014_v2 = vsub.f32 %v6170_v50, %v970_v1 }
 0x3e3   :  { %v967_v4 = vpop.xlane.xlu1 %966 }
 0x3e4   :  { %v1013_v5 = vsub.f32 %v6177_v54, %v967_v4  ;;  %v1031_v7 = vmul.f32 1.442695, %v1014_v2 }
 0x3e5   :  { %v976_v8 = vpop.xlane.xlu0 %975 }
 0x3e6   :  { %v1029_v10 = vmul.f32 1.442695, %v1013_v5  ;;  %v1016_v11 = vsub.f32 %v6183_v57, %v976_v8 }
 0x3e8   :  { %5710 = vpow2.f32 %v1029_v10  ;;  %v1035_v15 = vmul.f32 1.442695, %v1016_v11 }
 0x3e9   :  { %5712 = vpow2.f32 %v1031_v7  ;;  %v973_v19 = vpop.xlane.xlu0 %972 }
 0x3ea   :  { %v1015_v13 = vsub.f32 %v6189_v0, %v973_v19 }
 0x3ec   :  { %v1033_v16 = vmul.f32 1.442695, %v1015_v13 }
 0x3ee   :  { %5714 = vpow2.f32 %v1033_v16 }
 0x3ef   :  { %5716 = vpow2.f32 %v1035_v15 }
 0x3f5   :  { %v6283_v18 = vpop.eup %5710 }
 0x3f6   :  { %v6285_v50 = vpop.eup %5712  ;;  %5401 = vmatprep.mubr.msk.f32.mxu1 %vm964_vm3, %v6283_v18 }
 0x3f7   :  { %5402 = vmatmul.mubr.msk.f32.vlgmr.msra.gmra.mxu1 %vm964_vm3, %v6285_v50 }
 0x3f8   :  { %5405 = vmatpush3.msra.mxu1 %v6149_v43 }
 0x3f9   :  { %5406 = vmatprep.subr.mxu1 %v1197_v33 }
 0x3fa   :  { %5407 = vmatpush3.msra.mxu1 %v1197_v33 }
 0x3fb   :  { %v6292_v54 = vpop.eup %5714  ;;  %5411 = vmatprep.subr.mxu1 %v1286_v45 }
 0x3fc   :  { %v6294_v57 = vpop.eup %5716  ;;  %5408 = vmatprep.mubr.msk.f32.mxu1 %vm964_vm3, %v6292_v54 }
 0x3fd   :  { %5409 = vmatmul.mubr.msk.f32.vlgmr.msra.gmra.mxu1 %vm964_vm3, %v6294_v57 }
 0x3fe   :  { %5412 = vmatpush3.msra.mxu1 %v1286_v45 }
 0x3ff   :  { %5413 = vmatprep.subr.mxu1 %v6147_v42 }
 0x400   :  { %5414 = vmatpush3.msra.mxu1 %v6147_v42 }
 0x401   :  { %5418 = vmatprep.subr.mxu1 %v6265_v52 }
 0x437   :  { %v982_v43 = vpop.xlane.xlu0 %981 }
 0x438   :  { %v1018_v0 = vsub.f32 %v6195_v3, %v982_v43 }
 0x439   :  { %v979_v17 = vpop.xlane.xlu1 %978 }
 0x43a   :  { %v1039_v21 = vmul.f32 1.442695, %v1018_v0  ;;  %v1017_v23 = vsub.f32 %v6201_v6, %v979_v17 }
 0x43c   :  { %5718 = vpow2.f32 %v1039_v21  ;;  %v1037_v24 = vmul.f32 1.442695, %v1017_v23 }
 0x43e   :  { %5720 = vpow2.f32 %v1037_v24 }
 0x43f   :  { %v988_v25 = vpop.xlane.xlu1 %987 }
 0x440   :  { %v1020_v27 = vsub.f32 %v6207_v9, %v988_v25 }
 0x442   :  { %v1043_v33 = vmul.f32 1.442695, %v1020_v27 }
 0x443   :  { %v985_v34 = vpop.xlane.xlu1 %984  ;;  %v994_v35 = vpop.xlane.xlu0 %993 }
 0x444   :  { %5722 = vpow2.f32 %v1043_v33  ;;  %v1019_v42 = vsub.f32 %v6213_v12, %v985_v34  ;;  %v1022_v36 = vsub.f32 %v6217_v14, %v994_v35 }
 0x446   :  { %v1041_v38 = vmul.f32 1.442695, %v1019_v42  ;;  %v1047_v3 = vmul.f32 1.442695, %v1022_v36 }
 0x447   :  { %v1000_v39 = vpop.xlane.xlu1 %999  ;;  %v991_v40 = vpop.xlane.xlu0 %990 }
 0x448   :  { %5724 = vpow2.f32 %v1041_v38  ;;  %v1024_v6 = vsub.f32 %v6229_v22, %v1000_v39  ;;  %v1021_v45 = vsub.f32 %v6225_v20, %v991_v40  ;;  %v1061_v38 = vsel %vm964_vm3, %v6283_v18, 0.0 }
 0x449   :  { %v5719_v49 = vpop.eup %5718  ;;  %5726 = vpow2.f32 %v1047_v3  ;;  %v1064_v3 = vsel %vm964_vm3, %v6285_v50, 0.0  ;;  %v1067_v39 = vsel %vm964_vm3, %v6292_v54, 0.0  ;;  %v1070_v40 = vsel %vm964_vm3, %v6294_v57, 0.0 }
 0x44a   :  { %v1045_v9 = vmul.f32 1.442695, %v1021_v45  ;;  %v1076_v51 = vsel %vm964_vm3, %v5719_v49, 0.0  ;;  %v1051_v2 = vmul.f32 1.442695, %v1024_v6 }
 0x44b   :  { %v5721_v1 = vpop.eup %5720  ;;  %v997_v4 = vpop.xlane.xlu1 %996  ;;  %1077 = vadd.xlane.f32.xlu0 %v1076_v51 }
 0x44c   :  { %v1006_v12 = vpop.xlane.xlu0 %1005  ;;  %v1023_v14 = vsub.f32 %v6237_v26, %v997_v4  ;;  %5415 = vmatprep.mubr.msk.f32.mxu1 %vm964_vm3, %v5721_v1  ;;  %v1073_v22 = vsel %vm964_vm3, %v5721_v1, 0.0  ;;  %5728 = vpow2.f32 %v1045_v9 }
 0x44d   :  { %v1026_v5 = vsub.f32 %v6241_v28, %v1006_v12  ;;  %5416 = vmatmul.mubr.msk.f32.vlgmr.msra.gmra.mxu1 %vm964_vm3, %v5719_v49  ;;  %1074 = vadd.xlane.f32.xlu1 %v1073_v22  ;;  %5730 = vpow2.f32 %v1051_v2 }
 0x44e   :  { %v1049_v20 = vmul.f32 1.442695, %v1023_v14  ;;  %5419 = vmatpush3.msra.mxu1 %v6265_v52 }
 0x44f   :  { %v1055_v7 = vmul.f32 1.442695, %v1026_v5  ;;  %5420 = vmatprep.subr.mxu1 %v6269_v56 }
 0x450   :  { %v1003_v8 = vpop.xlane.xlu0 %1002  ;;  %5732 = vpow2.f32 %v1049_v20  ;;  %5421 = vmatpush3.msra.mxu1 %v6269_v56 }
 0x451   :  { %v1025_v26 = vsub.f32 %v6249_v37, %v1003_v8  ;;  %v5723_v28 = vpop.eup %5722  ;;  %5432 = vmatprep.subr.mxu1 %v6267_v55  ;;  %v1009_v10 = vpop.xlane.xlu1 %1008  ;;  %5734 = vpow2.f32 %v1055_v7 }
 0x452   :  { %v1027_v19 = vsub.f32 %v6259_v44, %v1009_v10  ;;  %v1082_v13 = vsel %vm964_vm3, %v5723_v28, 0.0 }
 0x453   :  { %v1053_v11 = vmul.f32 1.442695, %v1025_v26  ;;  %1083 = vadd.xlane.f32.xlu0 %v1082_v13 }
 0x454   :  { %v1012_v52 = vpop.xlane.xlu0 %1011  ;;  %v1057_v15 = vmul.f32 1.442695, %v1027_v19 }
 0x455   :  { %5736 = vpow2.f32 %v1053_v11  ;;  %v1028_v16 = vsub.f32 %v6255_v41, %v1012_v52  ;;  %v5725_v43 = vpop.eup %5724  ;;  %v1721_v17 = vpop.permute.xlu1 %1720 }
 0x456   :  { %v5727_v56 = vpop.eup %5726  ;;  %5738 = vpow2.f32 %v1057_v15  ;;  %5422 = vmatprep.mubr.msk.f32.mxu1 %vm964_vm3, %v5725_v43  ;;  %v1079_v0 = vsel %vm964_vm3, %v5725_v43, 0.0 }
 0x457   :  { %v1059_v37 = vmul.f32 1.442695, %v1028_v16  ;;  %5423 = vmatmul.mubr.msk.f32.vlgmr.msra.gmra.mxu1 %vm964_vm3, %v5723_v28  ;;  %1080 = vadd.xlane.f32.xlu1 %v1079_v0  ;;  %v1088_v44 = vsel %vm964_vm3, %v5727_v56, 0.0 }
 0x458   :  { %5433 = vmatpush3.msra.mxu1 %v6267_v55  ;;  %1089 = vadd.xlane.f32.xlu0 %v1088_v44  ;;  %v1719_v25 = vpop.permute.xlu0 %1718 }
 0x459   :  { %5740 = vpow2.f32 %v1059_v37  ;;  %5434 = vmatprep.subr.mxu1 %v6275_v61  ;;  %v5729_v41 = vpop.eup %5728 }
 0x45a   :  { %5435 = vmatpush3.msra.mxu1 %v6275_v61  ;;  %5429 = vmatprep.mubr.msk.f32.mxu0 %vm964_vm3, %v5729_v41  ;;  %v1085_v21 = vsel %vm964_vm3, %v5729_v41, 0.0  ;;  %v5731_v23 = vpop.eup %5730 }
 0x45b   :  { %5446 = vmatprep.subr.mxu1 %v1721_v17  ;;  %5430 = vmatmul.mubr.msk.f32.vlgmr.msra.gmra.mxu0 %vm964_vm3, %v5727_v56  ;;  %v1094_v27 = vsel %vm964_vm3, %v5731_v23, 0.0 }
 0x45c   :  { %1086 = vadd.xlane.f32.xlu0 %v1085_v21  ;;  %5440 = vmatpush3.msra.mxu0 %v6154_v46 }
 0x45d   :  { %v5733_v24 = vpop.eup %5732  ;;  %5441 = vmatprep.subr.mxu0 %v6273_v58 }
 0x45e   :  { %5436 = vmatprep.mubr.msk.f32.mxu1 %vm964_vm3, %v5733_v24  ;;  %v1091_v55 = vsel %vm964_vm3, %v5733_v24, 0.0  ;;  %5442 = vmatpush3.msra.mxu0 %v6273_v58  ;;  %v5735_v61 = vpop.eup %5734 }
 0x45f   :  { %5437 = vmatmul.mubr.msk.f32.vlgmr.msra.gmra.mxu1 %vm964_vm3, %v5731_v23  ;;  %1092 = vadd.xlane.f32.xlu1 %v1091_v55  ;;  %v1100_v58 = vsel %vm964_vm3, %v5735_v61, 0.0 }
 0x460   :  { %5447 = vmatpush3.msra.mxu1 %v1721_v17  ;;  %1095 = vadd.xlane.f32.xlu0 %v1094_v27 }
 0x461   :  { %5448 = vmatprep.subr.mxu1 %v1719_v25 }
 0x462   :  { %v5737_v33 = vpop.eup %5736  ;;  %5449 = vmatpush3.msra.mxu1 %v1719_v25 }
 0x463   :  { %5443 = vmatprep.mubr.msk.f32.mxu0 %vm964_vm3, %v5737_v33  ;;  %v1097_v46 = vsel %vm964_vm3, %v5737_v33, 0.0  ;;  %v5739_v34 = vpop.eup %5738 }
 0x464   :  { %5444 = vmatmul.mubr.msk.f32.vlgmr.msra.gmra.mxu0 %vm964_vm3, %v5735_v61  ;;  %1098 = vadd.xlane.f32.xlu1 %v1097_v46  ;;  %v1103_v36 = vsel %vm964_vm3, %v5739_v34, 0.0 }
 0x465   :  { %5450 = vmatprep.mubr.msk.f32.mxu1 %vm964_vm3, %v5739_v34  ;;  %1101 = vadd.xlane.f32.xlu0 %v1100_v58 }
 0x466   :  { %v5741_v35 = vpop.eup %5740 }
 0x467   :  { %5451 = vmatmul.mubr.msk.f32.vlgmr.msra.gmra.mxu1 %vm964_vm3, %v5741_v35  ;;  %v1106_v42 = vsel %vm964_vm3, %v5741_v35, 0.0 }
 0x468   :  { %1104 = vadd.xlane.f32.xlu1 %v1103_v36 }
 0x469   :  { %1107 = vadd.xlane.f32.xlu0 %v1106_v42 }
 0x46c   :  { %1062 = vadd.xlane.f32.xlu1 %v1061_v38 }
 0x46d   :  { %1065 = vadd.xlane.f32.xlu0 %v1064_v3 }
 0x470   :  { %1068 = vadd.xlane.f32.xlu1 %v1067_v39 }
 0x471   :  { %1071 = vadd.xlane.f32.xlu0 %v1070_v40 }
 0x481   :  { %1918 = vrot.lane.b32.xlu1 %v5947_v29, %s5886_s24 }
 0x485   :  { %1914 = vrot.lane.b32.xlu1 %v5961_v31, %s5886_s24 }
 0x487   :  { %1916 = vrot.lane.b32.xlu0 %v5954_v30, %s5886_s24 }
 0x489   :  { %1912 = vrot.lane.b32.xlu1 %v5968_v32, %s5886_s24 }
 0x4b7   :  { %v6373_v14 = vpop.f32.mrf.mxu1 }
 0x4b9   :  { %v6375_v20 = vpop.f32.mrf.mxu1 }
 0x4bd   :  { %v6377_v7 = vpop.f32.mrf.mxu1 }
 0x4bf   :  { %v6379_v26 = vpop.f32.mrf.mxu1 }
 0x4d4   :  { %v1078_v18 = vpop.xlane.xlu0 %1077 }
 0x4d5   :  { %5742 = vrcp.f32 %v1078_v18 }
 0x4d6   :  { %v1075_v54 = vpop.xlane.xlu1 %1074 }
 0x4d7   :  { %5744 = vrcp.f32 %v1075_v54 }
 0x4dc   :  { %v1084_v50 = vpop.xlane.xlu0 %1083 }
 0x4dd   :  { %5746 = vrcp.f32 %v1084_v50 }
 0x4e0   :  { %v1081_v45 = vpop.xlane.xlu1 %1080 }
 0x4e1   :  { %v1090_v6 = vpop.xlane.xlu0 %1089  ;;  %5748 = vrcp.f32 %v1081_v45 }
 0x4e2   :  { %v5743_v28 = vpop.eup %5742  ;;  %5750 = vrcp.f32 %v1090_v6 }
 0x4e4   :  { %v5745_v13 = vpop.eup %5744 }
 0x4e5   :  { %v1087_v49 = vpop.xlane.xlu0 %1086 }
 0x4e6   :  { %5752 = vrcp.f32 %v1087_v49 }
 0x4e8   :  { %v1093_v57 = vpop.xlane.xlu1 %1092 }
 0x4e9   :  { %v1096_v9 = vpop.xlane.xlu0 %1095  ;;  %5754 = vrcp.f32 %v1093_v57 }
 0x4ea   :  { %v5747_v15 = vpop.eup %5746 }
 0x4ed   :  { %v1099_v51 = vpop.xlane.xlu1 %1098 }
 0x4ee   :  { %v1102_v1 = vpop.xlane.xlu0 %1101  ;;  %v5749_v56 = vpop.eup %5748 }
 0x4ef   :  { %5756 = vrcp.f32 %v1102_v1  ;;  %v5751_v41 = vpop.eup %5750 }
 0x4f0   :  { %5758 = vrcp.f32 %v1099_v51 }
 0x4f1   :  { %v1105_v29 = vpop.xlane.xlu1 %1104 }
 0x4f2   :  { %v1108_v2 = vpop.xlane.xlu0 %1107  ;;  %5760 = vrcp.f32 %v1105_v29 }
 0x4f3   :  { %v5753_v17 = vpop.eup %5752  ;;  %5762 = vrcp.f32 %v1096_v9 }
 0x4f4   :  { %5764 = vrcp.f32 %v1108_v2 }
 0x4f5   :  { %v6365_v4 = vpop.xlane.xlu1 %1062 }
 0x4f6   :  { %v6367_v31 = vpop.xlane.xlu0 %1065  ;;  %v5755_v61 = vpop.eup %5754  ;;  %5766 = vrcp.f32 %v6365_v4 }
 0x4f7   :  { %5768 = vrcp.f32 %v6367_v31 }
 0x4f9   :  { %v6369_v30 = vpop.xlane.xlu1 %1068 }
 0x4fa   :  { %v6371_v32 = vpop.xlane.xlu0 %1071  ;;  %5770 = vrcp.f32 %v6369_v30 }
 0x4fb   :  { %5772 = vrcp.f32 %v6371_v32 }
 0x4fc   :  { %v5757_v33 = vpop.eup %5756 }
 0x4fd   :  { %v1919_v12 = vpop.permute.xlu1 %1918  ;;  %v5759_v42 = vpop.eup %5758 }
 0x4fe   :  { %5453 = vmatprep.subr.mxu0 %v1919_v12  ;;  %v1917_v22 = vpop.permute.xlu0 %1916 }
 0x4ff   :  { %5454 = vmatpush3.msra.mxu0 %v1919_v12  ;;  %v5761_v36 = vpop.eup %5760 }
 0x500   :  { %5455 = vmatprep.subr.mxu0 %v1917_v22  ;;  %v5763_v40 = vpop.eup %5762 }
 0x501   :  { %v1915_v5 = vpop.permute.xlu1 %1914  ;;  %5456 = vmatpush3.msra.mxu0 %v1917_v22  ;;  %v5765_v50 = vpop.eup %5764 }
 0x502   :  { %5457 = vmatprep.subr.mxu0 %v1915_v5 }
 0x503   :  { %5458 = vmatpush3.msra.mxu0 %v1915_v5  ;;  %v5767_v1 = vpop.eup %5766 }
 0x504   :  { %v5769_v29 = vpop.eup %5768  ;;  %v1821_v12 = vmul.f32 %v5767_v1, %v6375_v20 }
 0x505   :  { %v1913_v8 = vpop.permute.xlu1 %1912  ;;  %v1822_v4 = vmul.f32 %v5769_v29, %v6373_v14  ;;  %v2101_v29 = vld [vmem:[%s7207_s2 + $0x50] sm:$0xff] }
 0x506   :  { %5459 = vmatprep.subr.mxu0 %v1913_v8  ;;  %5467 = vmatprep.subr.mxu1 %v2101_v29 }
 0x507   :  { %5460 = vmatpush3.msra.mxu0 %v1913_v8  ;;  %5468 = vmatpush3.msra.mxu1 %v2101_v29 }
 0x50d   :  { %v5417_v10 = vpop.f32.mrf.mxu1 }
 0x50e   :  { %v1826_v11 = vmul.f32 %v5743_v28, %v5417_v10 }
 0x50f   :  { %v1361_v19 = vpop.f32.mrf.mxu1 }
 0x510   :  { %1843 = vrot.lane.b32.xlu1 %v1826_v11, %s5892_s1  ;;  %v1825_v52 = vmul.f32 %v5745_v13, %v1361_v19 }
 0x514   :  { %1841 = vrot.lane.b32.xlu1 %v1825_v52, %s5892_s1 }
 0x517   :  { %v5424_v16 = vpop.f32.mrf.mxu1 }
 0x518   :  { %v1828_v43 = vmul.f32 %v5747_v15, %v5424_v16 }
 0x519   :  { %v1448_v37 = vpop.f32.mrf.mxu1 }
 0x51a   :  { %v1827_v0 = vmul.f32 %v5749_v56, %v1448_v37  ;;  %1847 = vrot.lane.b32.xlu0 %v1828_v43, %s5892_s1 }
 0x51b   :  { %v5431_v44 = vpop.f32.mrf.mxu0 }
 0x51c   :  { %1845 = vrot.lane.b32.xlu1 %v1827_v0, %s5892_s1  ;;  %v1830_v21 = vmul.f32 %v5751_v41, %v5431_v44 }
 0x51d   :  { %v1535_v23 = vpop.f32.mrf.mxu0 }
 0x51e   :  { %v1829_v24 = vmul.f32 %v5753_v17, %v1535_v23 }
 0x51f   :  { %v5438_v55 = vpop.f32.mrf.mxu1 }
 0x520   :  { %1859 = vrot.lane.b32.xlu1 %v1830_v21, %s5893_s20  ;;  %1857 = vrot.lane.b32.xlu0 %v1829_v24, %s5893_s20  ;;  %v1832_v18 = vmul.f32 %v5763_v40, %v5438_v55 }
 0x521   :  { %v1622_v25 = vpop.f32.mrf.mxu1 }
 0x522   :  { %v1831_v27 = vmul.f32 %v5755_v61, %v1622_v25 }
 0x524   :  { %v5445_v46 = vpop.f32.mrf.mxu0  ;;  %1861 = vrot.lane.b32.xlu1 %v1831_v27, %s5893_s20 }
 0x525   :  { %v1834_v34 = vmul.f32 %v5757_v33, %v5445_v46 }
 0x526   :  { %v1709_v58 = vpop.f32.mrf.mxu0 }
 0x527   :  { %v5452_v35 = vpop.f32.mrf.mxu1  ;;  %1875 = vrot.lane.b32.xlu0 %v1834_v34, %s5894_s21  ;;  %v1833_v38 = vmul.f32 %v5759_v42, %v1709_v58 }
 0x528   :  { %v1836_v54 = vmul.f32 %v5765_v50, %v5452_v35 }
 0x529   :  { %v1796_v3 = vpop.f32.mrf.mxu1 }
 0x52a   :  { %v1835_v39 = vmul.f32 %v5761_v36, %v1796_v3 }
 0x52b   :  { %1873 = vrot.lane.b32.xlu0 %v1833_v38, %s5894_s21 }
 0x52c   :  { %1877 = vrot.lane.b32.xlu1 %v1835_v39, %s5894_s21 }
 0x52f   :  { %1863 = vrot.lane.b32.xlu0 %v1832_v18, %s5893_s20 }
 0x530   :  { %1924 = vrot.lane.b32.xlu1 %v5994_v63, %s5886_s24  ;;  %v5771_v63 = vpop.eup %5770 }
 0x531   :  { %v1823_v31 = vmul.f32 %v5771_v63, %v6379_v26  ;;  %v5773_v14 = vpop.eup %5772  ;;  %v2100_v63 = vld [vmem:[%s7207_s2 + $0x38] sm:$0xff] }
 0x532   :  { %v1824_v15 = vmul.f32 %v5773_v14, %v6377_v7  ;;  %5469 = vmatprep.subr.mxu1 %v2100_v63 }
 0x533   :  { %1879 = vrot.lane.b32.xlu0 %v1836_v54, %s5894_s21  ;;  %5470 = vmatpush3.msra.mxu1 %v2100_v63 }
 0x582   :  { %v1844_v6 = vpop.permute.xlu1 %1843 }
 0x583   :  { %v1886_v22 = vsel %vm255_vm1, %v1822_v4, %v1844_v6  ;;  %v2245_v4 = vld [vmem:[%s7207_s2 + $0xb8] sm:$0xff] }
 0x586   :  { %v1842_v45 = vpop.permute.xlu1 %1841 }
 0x587   :  { %v1885_v30 = vsel %vm255_vm1, %v1821_v12, %v1842_v45  ;;  %v2099_v12 = vld [vmem:[%s7207_s2 + $0x20] sm:$0xff] }
 0x588   :  { %5471 = vmatprep.subr.mxu1 %v2099_v12 }
 0x589   :  { %5472 = vmatpush3.msra.mxu1 %v2099_v12 }
 0x58c   :  { %v1848_v57 = vpop.permute.xlu0 %1847 }
 0x58d   :  { %v1888_v16 = vsel %vm255_vm1, %v1824_v15, %v1848_v57 }
 0x58e   :  { %v1846_v49 = vpop.permute.xlu1 %1845 }
 0x58f   :  { %v1887_v32 = vsel %vm255_vm1, %v1823_v31, %v1846_v49  ;;  %v2243_v31 = vld [vmem:[%s7207_s2 + $0x88] sm:$0xff] }
 0x592   :  { %v1860_v9 = vpop.permute.xlu1 %1859  ;;  %v1858_v51 = vpop.permute.xlu0 %1857 }
 0x593   :  { %v1889_v8 = vsel %vm964_vm3, %v1885_v30, %v1858_v51  ;;  %v1890_v10 = vsel %vm964_vm3, %v1886_v22, %v1860_v9  ;;  %v2244_v30 = vld [vmem:[%s7207_s2 + $0xa0] sm:$0xff]  ;;  %v2241_v22 = vld [vmem:[%s7207_s2 + $0x58] sm:$0xff] }
 0x596   :  { %v1862_v5 = vpop.permute.xlu1 %1861 }
 0x597   :  { %v1891_v11 = vsel %vm964_vm3, %v1887_v32, %v1862_v5  ;;  %v2098_v5 = vld [vmem:[%s7207_s2 + $0x8] sm:$0xff]  ;;  %v2242_v32 = vld [vmem:[%s7207_s2 + $0x70] sm:$0xff] }
 0x598   :  { %5473 = vmatprep.subr.mxu1 %v2098_v5 }
 0x599   :  { %v1876_v2 = vpop.permute.xlu0 %1875  ;;  %5474 = vmatpush3.msra.mxu1 %v2098_v5 }
 0x59a   :  { %v1895_v26 = vsel %vm1893_vm5, %v1890_v10, %v1876_v2  ;;  %v6456_v2 = vld [vmem:[%s7206_s3 + $0x1] ss:$0 sm:$0xff]  ;;  %v2238_v10 = vld [vmem:[%s7207_s2 + $0x10] sm:$0xff] }
 0x59d   :  { %v1874_v28 = vpop.permute.xlu0 %1873 }
 0x59e   :  { %v1894_v20 = vsel %vm1893_vm5, %v1889_v8, %v1874_v28  ;;  %v1878_v19 = vpop.permute.xlu1 %1877  ;;  %v2239_v8 = vld [vmem:[%s7207_s2 + $0x28] sm:$0xff]  ;;  %v2240_v28 = vld [vmem:[%s7207_s2 + $0x40] sm:$0xff] }
 0x59f   :  { %v1896_v13 = vsel %vm1893_vm5, %v1891_v11, %v1878_v19  ;;  %5461 = vmatprep.mubr.msk.f32.mxu0 %vm23_vm0, %v1894_v20 }
 0x5a0   :  { %5462 = vmatmul.mubr.msk.f32.vlgmr.msra.gmra.mxu0 %vm23_vm0, %v1895_v26 }
 0x5a1   :  { %5464 = vmatprep.mubr.msk.f32.mxu0 %vm23_vm0, %v1896_v13  ;;  %v1864_v52 = vpop.permute.xlu0 %1863 }
 0x5a2   :  { %v1892_v43 = vsel %vm964_vm3, %v1888_v16, %v1864_v52  ;;  %v1925_v0 = vpop.permute.xlu1 %1924 }
 0x5a5   :  { %v1880_v56 = vpop.permute.xlu0 %1879 }
 0x5a6   :  { %v1897_v37 = vsel %vm1893_vm5, %v1892_v43, %v1880_v56 }
 0x5a7   :  { %5465 = vmatmul.mubr.msk.f32.gmra.mxu0 %vm23_vm0, %v1897_v37 }
 0x660   :  { %v5463_v44 = vpop.f32.mrf.mxu0 }
 0x661   :  { %v2011_v41 = vadd.f32 %v5463_v44, %v1925_v0 }
 0x662   :  { %v2005_v17 = vpop.f32.mrf.mxu0 }
 0x663   :  { %v2025_v21 = vadd.f32 %v2011_v41, %v5979_v59  ;;  %v2006_v23 = vadd.f32 %v2005_v17, %v1925_v0 }
 0x665   :  { %v2024_v24 = vadd.f32 %v2006_v23, %v5975_v53  ;;  %v2032_v7 = vsel %vm23_vm0, %v2025_v21, 0.0 }
 0x666   :  { %2033 = vadd.xlane.f32.xlu1 %v2032_v7 }
 0x667   :  { %v5466_v55 = vpop.f32.mrf.mxu0  ;;  %v2029_v61 = vsel %vm23_vm0, %v2024_v24, 0.0 }
 0x668   :  { %2030 = vadd.xlane.f32.xlu0 %v2029_v61  ;;  %v2021_v27 = vadd.f32 %v5466_v55, %v1925_v0 }
 0x669   :  { %v2015_v25 = vpop.f32.mrf.mxu0 }
 0x66a   :  { %v2016_v33 = vadd.f32 %v2015_v25, %v1925_v0  ;;  %v2027_v34 = vadd.f32 %v2021_v27, %v5987_v62 }
 0x66c   :  { %v2026_v46 = vadd.f32 %v2016_v33, %v5981_v60  ;;  %v2038_v59 = vsel %vm23_vm0, %v2027_v34, 0.0 }
 0x66e   :  { %v2035_v58 = vsel %vm23_vm0, %v2026_v46, 0.0 }
 0x66f   :  { %2036 = vadd.xlane.f32.xlu0 %v2035_v58 }
 0x673   :  { %2039 = vadd.xlane.f32.xlu0 %v2038_v59 }
 0x6ef   :  { %v2034_v53 = vpop.xlane.xlu1 %2033 }
 0x6f0   :  { %v2042_v35 = vmul.f32 0.03125, %v2034_v53 }
 0x6f1   :  { %v2031_v42 = vpop.xlane.xlu0 %2030 }
 0x6f2   :  { %v6427_v36 = vsub.f32 %v2025_v21, %v2042_v35  ;;  %v2041_v38 = vmul.f32 0.03125, %v2031_v42 }
 0x6f4   :  { %v6429_v3 = vsub.f32 %v2024_v24, %v2041_v38  ;;  %v2050_v39 = vmul.f32 %v6427_v36, %v6427_v36 }
 0x6f6   :  { %v2056_v60 = vsel %vm23_vm0, %v2050_v39, 0.0  ;;  %v2049_v62 = vmul.f32 %v6429_v3, %v6429_v3 }
 0x6f7   :  { %2057 = vadd.xlane.f32.xlu1 %v2056_v60 }
 0x6f8   :  { %v2037_v40 = vpop.xlane.xlu0 %2036  ;;  %v2053_v18 = vsel %vm23_vm0, %v2049_v62, 0.0 }
 0x6f9   :  { %v2043_v50 = vmul.f32 0.03125, %v2037_v40  ;;  %2054 = vadd.xlane.f32.xlu0 %v2053_v18 }
 0x6fb   :  { %v6437_v54 = vsub.f32 %v2026_v46, %v2043_v50 }
 0x6fc   :  { %v2040_v6 = vpop.xlane.xlu0 %2039 }
 0x6fd   :  { %v2044_v45 = vmul.f32 0.03125, %v2040_v6  ;;  %v2051_v49 = vmul.f32 %v6437_v54, %v6437_v54 }
 0x6ff   :  { %v6441_v57 = vsub.f32 %v2027_v34, %v2044_v45  ;;  %v2059_v9 = vsel %vm23_vm0, %v2051_v49, 0.0 }
 0x700   :  { %2060 = vadd.xlane.f32.xlu0 %v2059_v9 }
 0x701   :  { %v2052_v51 = vmul.f32 %v6441_v57, %v6441_v57 }
 0x703   :  { %v2062_v1 = vsel %vm23_vm0, %v2052_v51, 0.0 }
 0x704   :  { %2063 = vadd.xlane.f32.xlu1 %v2062_v1 }
 0x715   :  { %2102 = vrot.lane.b32.xlu1 %v6456_v2, %s5891_s15 }
 0x716   :  { %2091 = vrot.lane.b32.xlu0 %v6456_v2, %s5890_s14 }
 0x719   :  { %2275 = vrot.lane.b32.xlu1 %v2245_v4, %s5891_s15 }
 0x71a   :  { %2271 = vrot.lane.b32.xlu0 %v2243_v31, %s5891_s15 }
 0x71d   :  { %2273 = vrot.lane.b32.xlu1 %v2244_v30, %s5891_s15 }
 0x71e   :  { %2267 = vrot.lane.b32.xlu0 %v2241_v22, %s5891_s15 }
 0x721   :  { %2269 = vrot.lane.b32.xlu1 %v2242_v32, %s5891_s15 }
 0x722   :  { %2263 = vrot.lane.b32.xlu0 %v2239_v8, %s5891_s15 }
 0x725   :  { %2265 = vrot.lane.b32.xlu1 %v2240_v28, %s5891_s15 }
 0x729   :  { %2261 = vrot.lane.b32.xlu1 %v2238_v10, %s5891_s15 }
 0x780   :  { %v2058_v11 = vpop.xlane.xlu1 %2057 }
 0x781   :  { %v2066_v20 = vmul.f32 0.03125, %v2058_v11 }
 0x782   :  { %v2055_v19 = vpop.xlane.xlu0 %2054 }
 0x783   :  { %v2070_v14 = vadd.f32 1e-12, %v2066_v20  ;;  %v2065_v26 = vmul.f32 0.03125, %v2055_v19 }
 0x785   :  { %5774 = vrsqrt.f32 %v2070_v14  ;;  %v2069_v13 = vadd.f32 1e-12, %v2065_v26 }
 0x787   :  { %5776 = vrsqrt.f32 %v2069_v13 }
 0x789   :  { %v2061_v52 = vpop.xlane.xlu0 %2060 }
 0x78a   :  { %v2067_v15 = vmul.f32 0.03125, %v2061_v52 }
 0x78c   :  { %v2071_v16 = vadd.f32 1e-12, %v2067_v15 }
 0x78d   :  { %v2064_v43 = vpop.xlane.xlu1 %2063  ;;  %v2092_v23 = vpop.permute.xlu0 %2091 }
 0x78e   :  { %5778 = vrsqrt.f32 %v2071_v16  ;;  %v2068_v56 = vmul.f32 0.03125, %v2064_v43 }
 0x790   :  { %v2072_v37 = vadd.f32 1e-12, %v2068_v56 }
 0x791   :  { %v2103_v53 = vpop.permute.xlu1 %2102 }
 0x792   :  { %v5775_v0 = vpop.eup %5774  ;;  %5780 = vrsqrt.f32 %v2072_v37 }
 0x793   :  { %v2078_v44 = vmul.f32 %v5775_v0, %v6427_v36  ;;  %v2272_v36 = vpop.permute.xlu0 %2271 }
 0x794   :  { %v5777_v41 = vpop.eup %5776 }
 0x795   :  { %v2077_v17 = vmul.f32 %v5777_v41, %v6429_v3  ;;  %v2088_v21 = vmul.f32 %v6456_v2, %v2078_v44  ;;  %v2276_v35 = vpop.permute.xlu1 %2275 }
 0x796   :  { %5481 = vmatprep.subr.mxu0 %v2276_v35 }
 0x797   :  { %v2087_v24 = vmul.f32 %v6456_v2, %v2077_v17  ;;  %v6506_v55 = vadd.f32 %v2092_v23, %v2088_v21  ;;  %5482 = vmatpush3.msra.mxu0 %v2276_v35  ;;  %v2268_v3 = vpop.permute.xlu0 %2267 }
 0x799   :  { %v6504_v7 = vadd.f32 %v2092_v23, %v2087_v24  ;;  %v2274_v42 = vpop.permute.xlu1 %2273 }
 0x79a   :  { %5483 = vmatprep.subr.mxu0 %v2274_v42 }
 0x79b   :  { %v5779_v61 = vpop.eup %5778  ;;  %5475 = vmatprep.mubr.msk.f32.mxu1 %vm23_vm0, %v6504_v7  ;;  %5484 = vmatpush3.msra.mxu0 %v2274_v42  ;;  %v2264_v60 = vpop.permute.xlu0 %2263 }
 0x79c   :  { %5476 = vmatmul.mubr.msk.f32.vlgmr.msra.gmra.mxu1 %vm23_vm0, %v6506_v55  ;;  %v2079_v25 = vmul.f32 %v5779_v61, %v6437_v54  ;;  %5485 = vmatprep.subr.mxu0 %v2272_v36 }
 0x79d   :  { %v2270_v38 = vpop.permute.xlu1 %2269  ;;  %5486 = vmatpush3.msra.mxu0 %v2272_v36 }
 0x79e   :  { %v2089_v27 = vmul.f32 %v6456_v2, %v2079_v25  ;;  %5487 = vmatprep.subr.mxu0 %v2270_v38  ;;  %v5018_v25 = vld [vmem:[%s7206_s3 + $0x2] ss:$0 sm:$0xff] }
 0x79f   :  { %v5781_v33 = vpop.eup %5780  ;;  %5488 = vmatpush3.msra.mxu0 %v2270_v38 }
 0x7a0   :  { %v6514_v46 = vadd.f32 %v2092_v23, %v2089_v27  ;;  %v2080_v34 = vmul.f32 %v5781_v33, %v6441_v57  ;;  %5489 = vmatprep.subr.mxu0 %v2268_v3 }
 0x7a1   :  { %v2266_v39 = vpop.permute.xlu1 %2265  ;;  %5490 = vmatpush3.msra.mxu0 %v2268_v3 }
 0x7a2   :  { %5478 = vmatprep.mubr.msk.f32.mxu1 %vm23_vm0, %v6514_v46  ;;  %v2090_v58 = vmul.f32 %v6456_v2, %v2080_v34  ;;  %5491 = vmatprep.subr.mxu0 %v2266_v39 }
 0x7a3   :  { %5492 = vmatpush3.msra.mxu0 %v2266_v39 }
 0x7a4   :  { %v6520_v59 = vadd.f32 %v2092_v23, %v2090_v58  ;;  %5493 = vmatprep.subr.mxu0 %v2264_v60 }
 0x7a5   :  { %v2262_v62 = vpop.permute.xlu1 %2261  ;;  %5494 = vmatpush3.msra.mxu0 %v2264_v60 }
 0x7a6   :  { %5479 = vmatmul.mubr.msk.f32.gmra.mxu1 %vm23_vm0, %v6520_v59  ;;  %5495 = vmatprep.subr.mxu0 %v2262_v62 }
 0x7a7   :  { %5496 = vmatpush3.msra.mxu0 %v2262_v62 }
 0x85c   :  { %v5477_v40 = vpop.f32.mrf.mxu1 }
 0x85d   :  { %v2189_v18 = vadd.f32 %v5477_v40, %v2103_v53 }
 0x85e   :  { %v2183_v50 = vpop.f32.mrf.mxu1 }
 0x85f   :  { %v2203_v54 = vmul.f32 %v2189_v18, %v2189_v18  ;;  %v2184_v6 = vadd.f32 %v2183_v50, %v2103_v53 }
 0x861   :  { %v2207_v45 = vmul.f32 %v2203_v54, %v2189_v18  ;;  %v2202_v49 = vmul.f32 %v2184_v6, %v2184_v6 }
 0x863   :  { %v2211_v57 = vmul.f32 0.044715, %v2207_v45  ;;  %v2206_v9 = vmul.f32 %v2202_v49, %v2184_v6 }
 0x865   :  { %v2215_v51 = vadd.f32 %v2211_v57, %v2189_v18  ;;  %v2210_v1 = vmul.f32 0.044715, %v2206_v9 }
 0x866   :  { %v5480_v29 = vpop.f32.mrf.mxu1 }
 0x867   :  { %v2219_v63 = vmul.f32 0.7978846, %v2215_v51  ;;  %v2214_v2 = vadd.f32 %v2210_v1, %v2184_v6  ;;  %v2199_v12 = vadd.f32 %v5480_v29, %v2103_v53 }
 0x868   :  { %v2193_v5 = vpop.f32.mrf.mxu1 }
 0x869   :  { %5782 = vtanh.f32 %v2219_v63  ;;  %v2218_v4 = vmul.f32 0.7978846, %v2214_v2  ;;  %v2205_v31 = vmul.f32 %v2199_v12, %v2199_v12  ;;  %v2194_v30 = vadd.f32 %v2193_v5, %v2103_v53 }
 0x86b   :  { %5784 = vtanh.f32 %v2218_v4  ;;  %v2209_v22 = vmul.f32 %v2205_v31, %v2199_v12  ;;  %v2204_v32 = vmul.f32 %v2194_v30, %v2194_v30 }
 0x86d   :  { %v2213_v8 = vmul.f32 0.044715, %v2209_v22  ;;  %v2208_v28 = vmul.f32 %v2204_v32, %v2194_v30  ;;  %v6546_v22 = vld [vmem:[%s7207_s2 + $0x108] sm:$0xff]  ;;  %v6553_v32 = vld [vmem:[%s7207_s2 + $0xf0] sm:$0xff] }
 0x86e   :  { %5503 = vmatprep.subr.mxu1 %v6546_v22 }
 0x86f   :  { %v2217_v10 = vadd.f32 %v2213_v8, %v2199_v12  ;;  %v2212_v11 = vmul.f32 0.044715, %v2208_v28  ;;  %5504 = vmatpush3.msra.mxu1 %v6546_v22  ;;  %v6562_v8 = vld [vmem:[%s7207_s2 + $0xd8] sm:$0xff]  ;;  %v6569_v28 = vld [vmem:[%s7207_s2 + $0xc0] sm:$0xff] }
 0x870   :  { %5505 = vmatprep.subr.mxu1 %v6553_v32 }
 0x871   :  { %v2221_v20 = vmul.f32 0.7978846, %v2217_v10  ;;  %v2216_v19 = vadd.f32 %v2212_v11, %v2194_v30  ;;  %5506 = vmatpush3.msra.mxu1 %v6553_v32 }
 0x872   :  { %5507 = vmatprep.subr.mxu1 %v6562_v8 }
 0x873   :  { %5786 = vtanh.f32 %v2221_v20  ;;  %v2220_v14 = vmul.f32 0.7978846, %v2216_v19  ;;  %5508 = vmatpush3.msra.mxu1 %v6562_v8 }
 0x874   :  { %5509 = vmatprep.subr.mxu1 %v6569_v28 }
 0x875   :  { %5788 = vtanh.f32 %v2220_v14  ;;  %5510 = vmatpush3.msra.mxu1 %v6569_v28 }
 0x876   :  { %v5783_v26 = vpop.eup %5782 }
 0x877   :  { %v2227_v13 = vadd.f32 1.0, %v5783_v26 }
 0x878   :  { %v5785_v52 = vpop.eup %5784 }
 0x879   :  { %v2226_v15 = vadd.f32 1.0, %v5785_v52  ;;  %v2231_v16 = vmul.f32 0.5, %v2227_v13 }
 0x87b   :  { %v2230_v43 = vmul.f32 0.5, %v2226_v15  ;;  %v2235_v37 = vmul.f32 %v2231_v16, %v2189_v18 }
 0x87d   :  { %v2234_v56 = vmul.f32 %v2230_v43, %v2184_v6 }
 0x87f   :  { %5497 = vmatprep.mubr.msk.f32.mxu0 %vm2285_vm6, %v2234_v56 }
 0x880   :  { %v5787_v0 = vpop.eup %5786  ;;  %5498 = vmatmul.mubr.msk.f32.vlgmr.msra.gmra.mxu0 %vm2285_vm6, %v2235_v37 }
 0x881   :  { %v2229_v44 = vadd.f32 1.0, %v5787_v0 }
 0x882   :  { %v5789_v41 = vpop.eup %5788 }
 0x883   :  { %v2228_v17 = vadd.f32 1.0, %v5789_v41  ;;  %v2233_v21 = vmul.f32 0.5, %v2229_v44 }
 0x885   :  { %v2232_v23 = vmul.f32 0.5, %v2228_v17  ;;  %v2237_v61 = vmul.f32 %v2233_v21, %v2199_v12 }
 0x887   :  { %v2236_v24 = vmul.f32 %v2232_v23, %v2194_v30 }
 0x889   :  { %5500 = vmatprep.mubr.msk.f32.mxu0 %vm2285_vm6, %v2236_v24 }
 0x88a   :  { %5501 = vmatmul.mubr.msk.f32.gmra.mxu0 %vm2285_vm6, %v2237_v61 }
 0x940   :  { %v5499_v27 = vpop.f32.mrf.mxu0 }
 0x941   :  { %v2370_v33 = vadd.f32 %v5499_v27, %v5018_v25 }
 0x942   :  { %v2364_v34 = vpop.f32.mrf.mxu0 }
 0x943   :  { %v2384_v58 = vadd.f32 %v2370_v33, %v6506_v55  ;;  %v2365_v53 = vadd.f32 %v5018_v25, %v2364_v34 }
 0x945   :  { %v2383_v35 = vadd.f32 %v2365_v53, %v6504_v7  ;;  %v2390_v42 = vsel %vm23_vm0, %v2384_v58, 0.0 }
 0x946   :  { %2391 = vadd.xlane.f32.xlu1 %v2390_v42 }
 0x947   :  { %v2387_v36 = vsel %vm23_vm0, %v2383_v35, 0.0 }
 0x948   :  { %2388 = vadd.xlane.f32.xlu0 %v2387_v36 }
 0x94a   :  { %v5502_v38 = vpop.f32.mrf.mxu0 }
 0x94b   :  { %v2380_v39 = vadd.f32 %v5502_v38, %v5018_v25  ;;  %v6592_v38 = vld [vmem:[%s7206_s3 + $0x5] ss:$0 sm:$0xff] }
 0x94c   :  { %v2374_v3 = vpop.f32.mrf.mxu0 }
 0x94d   :  { %v2375_v60 = vadd.f32 %v5018_v25, %v2374_v3  ;;  %v2386_v40 = vadd.f32 %v2380_v39, %v6520_v59 }
 0x94f   :  { %v2385_v62 = vadd.f32 %v2375_v60, %v6514_v46  ;;  %v2396_v55 = vsel %vm23_vm0, %v2386_v40, 0.0 }
 0x951   :  { %v2393_v18 = vsel %vm23_vm0, %v2385_v62, 0.0 }
 0x952   :  { %2394 = vadd.xlane.f32.xlu0 %v2393_v18 }
 0x956   :  { %2397 = vadd.xlane.f32.xlu0 %v2396_v55 }
 0x9cf   :  { %v2392_v7 = vpop.xlane.xlu1 %2391 }
 0x9d0   :  { %v2400_v50 = vmul.f32 0.03125, %v2392_v7 }
 0x9d1   :  { %v2389_v54 = vpop.xlane.xlu0 %2388 }
 0x9d2   :  { %v2404_v6 = vsub.f32 %v2384_v58, %v2400_v50  ;;  %v2399_v45 = vmul.f32 0.03125, %v2389_v54 }
 0x9d4   :  { %v2403_v49 = vsub.f32 %v2383_v35, %v2399_v45  ;;  %v2408_v57 = vmul.f32 %v2404_v6, %v2404_v6 }
 0x9d6   :  { %v2414_v9 = vsel %vm23_vm0, %v2408_v57, 0.0  ;;  %v2407_v51 = vmul.f32 %v2403_v49, %v2403_v49 }
 0x9d7   :  { %2415 = vadd.xlane.f32.xlu1 %v2414_v9 }
 0x9d8   :  { %v2411_v46 = vsel %vm23_vm0, %v2407_v51, 0.0 }
 0x9d9   :  { %2412 = vadd.xlane.f32.xlu0 %v2411_v46 }
 0x9db   :  { %v2395_v59 = vpop.xlane.xlu0 %2394 }
 0x9dc   :  { %v2401_v1 = vmul.f32 0.03125, %v2395_v59 }
 0x9de   :  { %v2405_v29 = vsub.f32 %v2385_v62, %v2401_v1 }
 0x9df   :  { %v2398_v63 = vpop.xlane.xlu0 %2397 }
 0x9e0   :  { %v2402_v2 = vmul.f32 0.03125, %v2398_v63  ;;  %v2409_v12 = vmul.f32 %v2405_v29, %v2405_v29 }
 0x9e2   :  { %v2406_v5 = vsub.f32 %v2386_v40, %v2402_v2  ;;  %v2417_v4 = vsel %vm23_vm0, %v2409_v12, 0.0 }
 0x9e3   :  { %2418 = vadd.xlane.f32.xlu0 %v2417_v4 }
 0x9e4   :  { %v2410_v31 = vmul.f32 %v2406_v5, %v2406_v5 }
 0x9e6   :  { %v2420_v30 = vsel %vm23_vm0, %v2410_v31, 0.0 }
 0x9e7   :  { %2421 = vadd.xlane.f32.xlu1 %v2420_v30 }
 0x9f8   :  { %2446 = vrot.lane.b32.xlu1 %v5018_v25, %s5891_s15 }
 0x9f9   :  { %2439 = vrot.lane.b32.xlu0 %v5018_v25, %s5890_s14 }
 0xa60   :  { %v2416_v10 = vpop.xlane.xlu1 %2415 }
 0xa61   :  { %v2424_v11 = vmul.f32 0.03125, %v2416_v10 }
 0xa62   :  { %v2413_v20 = vpop.xlane.xlu0 %2412 }
 0xa63   :  { %v2428_v19 = vadd.f32 1e-12, %v2424_v11  ;;  %v2423_v14 = vmul.f32 0.03125, %v2413_v20 }
 0xa65   :  { %5790 = vrsqrt.f32 %v2428_v19  ;;  %v2427_v26 = vadd.f32 1e-12, %v2423_v14 }
 0xa67   :  { %5792 = vrsqrt.f32 %v2427_v26 }
 0xa6c   :  { %v2419_v13 = vpop.xlane.xlu0 %2418 }
 0xa6d   :  { %v2425_v52 = vmul.f32 0.03125, %v2419_v13 }
 0xa6f   :  { %v2429_v15 = vadd.f32 1e-12, %v2425_v52 }
 0xa70   :  { %v2422_v16 = vpop.xlane.xlu1 %2421  ;;  %v2440_v44 = vpop.permute.xlu0 %2439 }
 0xa71   :  { %5794 = vrsqrt.f32 %v2429_v15  ;;  %v2426_v43 = vmul.f32 0.03125, %v2422_v16 }
 0xa72   :  { %v5791_v56 = vpop.eup %5790 }
 0xa73   :  { %v2430_v37 = vadd.f32 1e-12, %v2426_v43  ;;  %v2436_v0 = vmul.f32 %v5791_v56, %v2404_v6 }
 0xa74   :  { %v5793_v41 = vpop.eup %5792  ;;  %v2447_v24 = vpop.permute.xlu1 %2446 }
 0xa75   :  { %5796 = vrsqrt.f32 %v2430_v37  ;;  %v2435_v17 = vmul.f32 %v5793_v41, %v2403_v49  ;;  %v2443_v21 = vmul.f32 %v2440_v44, %v2436_v0 }
 0xa77   :  { %v2442_v23 = vmul.f32 %v2440_v44, %v2435_v17  ;;  %v6575_v25 = vadd.f32 %v2447_v24, %v2443_v21 }
 0xa79   :  { %v6573_v61 = vadd.f32 %v2447_v24, %v2442_v23 }
 0xa7b   :  { %5511 = vmatprep.mubr.msk.f32.mxu1 %vm23_vm0, %v6573_v61 }
 0xa7c   :  { %5512 = vmatmul.mubr.msk.f32.vlgmr.msra.gmra.mxu1 %vm23_vm0, %v6575_v25 }
 0xa7e   :  { %v5795_v27 = vpop.eup %5794 }
 0xa7f   :  { %v2437_v33 = vmul.f32 %v5795_v27, %v2405_v29 }
 0xa81   :  { %v2444_v34 = vmul.f32 %v2440_v44, %v2437_v33 }
 0xa82   :  { %v5797_v58 = vpop.eup %5796 }
 0xa83   :  { %v2438_v53 = vmul.f32 %v5797_v58, %v2406_v5  ;;  %v6581_v35 = vadd.f32 %v2447_v24, %v2444_v34 }
 0xa85   :  { %v2445_v42 = vmul.f32 %v2440_v44, %v2438_v53  ;;  %5514 = vmatprep.mubr.msk.f32.mxu1 %vm23_vm0, %v6581_v35 }
 0xa87   :  { %v6585_v36 = vadd.f32 %v2447_v24, %v2445_v42 }
 0xa89   :  { %5515 = vmatmul.mubr.msk.f32.gmra.mxu1 %vm23_vm0, %v6585_v36 }
 0xb3c   :  { %v5513_v3 = vpop.f32.mrf.mxu1 }
 0xb3d   :  { %v6595_v39 = vadd.f32 %v5513_v3, %v6592_v38 }
 0xb3e   :  { %v2544_v60 = vpop.f32.mrf.mxu1 }
 0xb3f   :  { %v2545_v62 = vadd.f32 %v6592_v38, %v2544_v60  ;;  %2569 = vrot.lane.b32.xlu1 %v6595_v39, %s5887_s11 }
 0xb41   :  { %5521 = vmatprep.mubr.msk.f32.mxu1 %vm255_vm1, %v2545_v62 }
 0xb43   :  { %2567 = vrot.lane.b32.xlu1 %v2545_v62, %s5887_s11 }
 0xb49   :  { %v5516_v40 = vpop.f32.mrf.mxu1 }
 0xb4a   :  { %v6603_v18 = vadd.f32 %v5516_v40, %v6592_v38 }
 0xb4b   :  { %v2554_v55 = vpop.f32.mrf.mxu1 }
 0xb4c   :  { %v2555_v7 = vadd.f32 %v6592_v38, %v2554_v55  ;;  %2573 = vrot.lane.b32.xlu0 %v6603_v18, %s5887_s11 }
 0xb4e   :  { %5528 = vmatprep.mubr.msk.f32.mxu0 %vm255_vm1, %v2555_v7  ;;  %2571 = vrot.lane.b32.xlu1 %v2555_v7, %s5887_s11 }
 0xb50   :  { %2577 = vrot.lane.b32.xlu0 %v6595_v39, %s5888_s12 }
 0xb52   :  { %2575 = vrot.lane.b32.xlu1 %v2545_v62, %s5888_s12 }
 0xb54   :  { %2581 = vrot.lane.b32.xlu0 %v6603_v18, %s5888_s12 }
 0xb56   :  { %2579 = vrot.lane.b32.xlu1 %v2555_v7, %s5888_s12 }
 0xb58   :  { %2585 = vrot.lane.b32.xlu0 %v6595_v39, %s5889_s13 }
 0xb5a   :  { %2583 = vrot.lane.b32.xlu1 %v2545_v62, %s5889_s13 }
 0xb5c   :  { %2589 = vrot.lane.b32.xlu0 %v6603_v18, %s5889_s13 }
 0xb5e   :  { %2587 = vrot.lane.b32.xlu1 %v2555_v7, %s5889_s13 }
 0xb60   :  { %2593 = vrot.lane.b32.xlu0 %v6595_v39, %s5890_s14 }
 0xb62   :  { %2591 = vrot.lane.b32.xlu1 %v2545_v62, %s5890_s14 }
 0xb64   :  { %2680 = vrot.lane.b32.xlu0 %v6603_v18, %s5890_s14 }
 0xb66   :  { %2678 = vrot.lane.b32.xlu1 %v2555_v7, %s5890_s14 }
 0xbb1   :  { %v2570_v50 = vpop.permute.xlu1 %2569 }
 0xbb2   :  { %2767 = vrot.lane.b32.xlu0 %v2570_v50, %s5890_s14 }
 0xbb5   :  { %v2568_v54 = vpop.permute.xlu1 %2567 }
 0xbb6   :  { %2765 = vrot.lane.b32.xlu1 %v2568_v54, %s5890_s14 }
 0xbbe   :  { %v6630_v6 = vpop.permute.xlu0 %2573 }
 0xbbf   :  { %2854 = vrot.lane.b32.xlu0 %v6630_v6, %s5890_s14 }
 0xbc0   :  { %v2572_v45 = vpop.permute.xlu1 %2571 }
 0xbc1   :  { %2852 = vrot.lane.b32.xlu1 %v2572_v45, %s5890_s14 }
 0xbc2   :  { %v6635_v49 = vpop.permute.xlu0 %2577 }
 0xbc3   :  { %2941 = vrot.lane.b32.xlu0 %v6635_v49, %s5890_s14 }
 0xbc4   :  { %v2576_v57 = vpop.permute.xlu1 %2575 }
 0xbc5   :  { %2939 = vrot.lane.b32.xlu1 %v2576_v57, %s5890_s14 }
 0xbc6   :  { %v6640_v9 = vpop.permute.xlu0 %2581 }
 0xbc7   :  { %3028 = vrot.lane.b32.xlu0 %v6640_v9, %s5890_s14 }
 0xbc8   :  { %v6644_v51 = vpop.permute.xlu1 %2579 }
 0xbc9   :  { %3026 = vrot.lane.b32.xlu1 %v6644_v51, %s5890_s14 }
 0xbca   :  { %v6648_v46 = vpop.permute.xlu0 %2585 }
 0xbcb   :  { %3115 = vrot.lane.b32.xlu0 %v6648_v46, %s5890_s14 }
 0xbcc   :  { %v6652_v59 = vpop.permute.xlu1 %2583 }
 0xbcd   :  { %3113 = vrot.lane.b32.xlu1 %v6652_v59, %s5890_s14 }
 0xbce   :  { %v6656_v1 = vpop.permute.xlu0 %2589 }
 0xbcf   :  { %3202 = vrot.lane.b32.xlu0 %v6656_v1, %s5890_s14 }
 0xbd0   :  { %v6660_v29 = vpop.permute.xlu1 %2587 }
 0xbd1   :  { %3200 = vrot.lane.b32.xlu1 %v6660_v29, %s5890_s14 }
 0xbd2   :  { %v2594_v63 = vpop.permute.xlu0 %2593 }
 0xbd3   :  { %3449 = vrot.lane.b32.xlu0 %v6595_v39, %s5891_s15  ;;  %5517 = vmatprep.subr.msk.mxu1 %vm255_vm1, %v2594_v63 }
 0xbd4   :  { %5518 = vmatpush3.xpose.msk.msra.mxu1 %vm255_vm1, %v2594_v63  ;;  %v2592_v2 = vpop.permute.xlu1 %2591 }
 0xbd5   :  { %3447 = vrot.lane.b32.xlu1 %v2545_v62, %s5891_s15  ;;  %5519 = vmatprep.subr.msk.mxu1 %vm255_vm1, %v2592_v2 }
 0xbd6   :  { %v2681_v12 = vpop.permute.xlu0 %2680 }
 0xbd7   :  { %5524 = vmatprep.subr.msk.mxu0 %vm255_vm1, %v2681_v12  ;;  %3534 = vrot.lane.b32.xlu0 %v2555_v7, %s5891_s15 }
 0xbd8   :  { %5520 = vmatpush3.xpose.msk.msra.mxu1 %vm255_vm1, %v2592_v2  ;;  %5525 = vmatpush3.xpose.msk.msra.mxu0 %vm255_vm1, %v2681_v12  ;;  %v2679_v5 = vpop.permute.xlu1 %2678 }
 0xbd9   :  { %3536 = vrot.lane.b32.xlu1 %v6603_v18, %s5891_s15  ;;  %5526 = vmatprep.subr.msk.mxu0 %vm255_vm1, %v2679_v5 }
 0xbdb   :  { %3710 = vrot.lane.b32.xlu0 %v6630_v6, %s5891_s15  ;;  %5522 = vmatmul.mubr.msk.f32.vlgmr.msra.gmra.mxu1 %vm255_vm1, %v6595_v39 }
 0xbdc   :  { %5527 = vmatpush3.xpose.msk.msra.mxu0 %vm255_vm1, %v2679_v5  ;;  %5535 = vmatprep.mubr.msk.f32.mxu1 %vm255_vm1, %v2568_v54 }
 0xbdd   :  { %3623 = vrot.lane.b32.xlu1 %v2570_v50, %s5891_s15 }
 0xbdf   :  { %3884 = vrot.lane.b32.xlu0 %v6640_v9, %s5891_s15  ;;  %5529 = vmatmul.mubr.msk.f32.vlgmr.msra.gmra.mxu0 %vm255_vm1, %v6603_v18 }
 0xbe0   :  { %5542 = vmatprep.mubr.msk.f32.mxu0 %vm255_vm1, %v2572_v45 }
 0xbe1   :  { %3621 = vrot.lane.b32.xlu1 %v2568_v54, %s5891_s15 }
 0xbe3   :  { %3708 = vrot.lane.b32.xlu0 %v2572_v45, %s5891_s15 }
 0xbe5   :  { %3797 = vrot.lane.b32.xlu1 %v6635_v49, %s5891_s15 }
 0xbe7   :  { %3882 = vrot.lane.b32.xlu0 %v6644_v51, %s5891_s15 }
 0xbe9   :  { %3795 = vrot.lane.b32.xlu1 %v2576_v57, %s5891_s15 }
 0xbed   :  { %3971 = vrot.lane.b32.xlu1 %v6648_v46, %s5891_s15 }
 0xbf1   :  { %3969 = vrot.lane.b32.xlu1 %v6652_v59, %s5891_s15 }
 0xc24   :  { %v2768_v4 = vpop.permute.xlu0 %2767 }
 0xc25   :  { %5531 = vmatprep.subr.msk.mxu1 %vm255_vm1, %v2768_v4 }
 0xc26   :  { %5532 = vmatpush3.xpose.msk.msra.mxu1 %vm255_vm1, %v2768_v4 }
 0xc28   :  { %v2766_v31 = vpop.permute.xlu1 %2765 }
 0xc29   :  { %5533 = vmatprep.subr.msk.mxu1 %vm255_vm1, %v2766_v31 }
 0xc2a   :  { %5534 = vmatpush3.xpose.msk.msra.mxu1 %vm255_vm1, %v2766_v31 }
 0xc2d   :  { %5536 = vmatmul.mubr.msk.f32.vlgmr.msra.gmra.mxu1 %vm255_vm1, %v2570_v50 }
 0xc2e   :  { %5549 = vmatprep.mubr.msk.f32.mxu1 %vm255_vm1, %v2576_v57 }
 0xc31   :  { %v2855_v30 = vpop.permute.xlu0 %2854 }
 0xc32   :  { %5538 = vmatprep.subr.msk.mxu0 %vm255_vm1, %v2855_v30 }
 0xc33   :  { %5539 = vmatpush3.xpose.msk.msra.mxu0 %vm255_vm1, %v2855_v30  ;;  %v2853_v10 = vpop.permute.xlu1 %2852 }
 0xc34   :  { %5540 = vmatprep.subr.msk.mxu0 %vm255_vm1, %v2853_v10 }
 0xc35   :  { %v2942_v11 = vpop.permute.xlu0 %2941 }
 0xc36   :  { %5545 = vmatprep.subr.msk.mxu1 %vm255_vm1, %v2942_v11 }
 0xc37   :  { %5541 = vmatpush3.xpose.msk.msra.mxu0 %vm255_vm1, %v2853_v10  ;;  %v2940_v20 = vpop.permute.xlu1 %2939  ;;  %5546 = vmatpush3.xpose.msk.msra.mxu1 %vm255_vm1, %v2942_v11 }
 0xc38   :  { %5547 = vmatprep.subr.msk.mxu1 %vm255_vm1, %v2940_v20 }
 0xc39   :  { %v3029_v19 = vpop.permute.xlu0 %3028 }
 0xc3a   :  { %5543 = vmatmul.mubr.msk.f32.vlgmr.msra.gmra.mxu0 %vm255_vm1, %v6630_v6  ;;  %5552 = vmatprep.subr.msk.mxu0 %vm255_vm1, %v3029_v19 }
 0xc3b   :  { %5553 = vmatpush3.xpose.msk.msra.mxu0 %vm255_vm1, %v3029_v19  ;;  %5556 = vmatprep.mubr.msk.f32.mxu0 %vm255_vm1, %v6644_v51  ;;  %v3027_v14 = vpop.permute.xlu1 %3026 }
 0xc3c   :  { %5548 = vmatpush3.xpose.msk.msra.mxu1 %vm255_vm1, %v2940_v20  ;;  %5554 = vmatprep.subr.msk.mxu0 %vm255_vm1, %v3027_v14 }
 0xc3d   :  { %v3116_v26 = vpop.permute.xlu0 %3115 }
 0xc3e   :  { %5559 = vmatprep.subr.msk.mxu1 %vm255_vm1, %v3116_v26 }
 0xc3f   :  { %5550 = vmatmul.mubr.msk.f32.vlgmr.msra.gmra.mxu1 %vm255_vm1, %v6635_v49  ;;  %5555 = vmatpush3.xpose.msk.msra.mxu0 %vm255_vm1, %v3027_v14  ;;  %v3114_v13 = vpop.permute.xlu1 %3113 }
 0xc40   :  { %5560 = vmatpush3.xpose.msk.msra.mxu1 %vm255_vm1, %v3116_v26  ;;  %5563 = vmatprep.mubr.msk.f32.mxu1 %vm255_vm1, %v6652_v59 }
 0xc41   :  { %5561 = vmatprep.subr.msk.mxu1 %vm255_vm1, %v3114_v13  ;;  %v3203_v52 = vpop.permute.xlu0 %3202 }
 0xc42   :  { %5557 = vmatmul.mubr.msk.f32.vlgmr.msra.gmra.mxu0 %vm255_vm1, %v6640_v9  ;;  %5566 = vmatprep.subr.msk.mxu0 %vm255_vm1, %v3203_v52 }
 0xc43   :  { %5567 = vmatpush3.xpose.msk.msra.mxu0 %vm255_vm1, %v3203_v52  ;;  %5570 = vmatprep.mubr.msk.f32.mxu0 %vm255_vm1, %v6660_v29  ;;  %v3201_v15 = vpop.permute.xlu1 %3200 }
 0xc44   :  { %5562 = vmatpush3.xpose.msk.msra.mxu1 %vm255_vm1, %v3114_v13  ;;  %5568 = vmatprep.subr.msk.mxu0 %vm255_vm1, %v3201_v15 }
 0xc45   :  { %v3450_v16 = vpop.permute.xlu0 %3449 }
 0xc46   :  { %5573 = vmatprep.subr.mxu1 %v3450_v16 }
 0xc47   :  { %5564 = vmatmul.mubr.msk.f32.vlgmr.msra.gmra.mxu1 %vm255_vm1, %v6648_v46  ;;  %5569 = vmatpush3.xpose.msk.msra.mxu0 %vm255_vm1, %v3201_v15  ;;  %v3448_v43 = vpop.permute.xlu1 %3447 }
 0xc48   :  { %5574 = vmatpush3.msra.mxu1 %v3450_v16 }
 0xc49   :  { %5575 = vmatprep.subr.mxu1 %v3448_v43  ;;  %v3535_v52 = vpop.permute.xlu0 %3534 }
 0xc4a   :  { %5576 = vmatpush3.msra.mxu1 %v3448_v43  ;;  %5571 = vmatmul.mubr.msk.f32.vlgmr.msra.gmra.mxu0 %vm255_vm1, %v6656_v1 }
 0xc4b   :  { %v6742_v56 = vpop.permute.xlu1 %3536 }
 0xc4c   :  { %5580 = vmatprep.subr.mxu1 %v6742_v56 }
 0xc4f   :  { %v3624_v37 = vpop.permute.xlu1 %3623 }
 0xc50   :  { %5587 = vmatprep.subr.mxu0 %v3624_v37 }
 0xc51   :  { %5588 = vmatpush3.msra.mxu0 %v3624_v37 }
 0xc53   :  { %v3622_v0 = vpop.permute.xlu1 %3621 }
 0xc54   :  { %5589 = vmatprep.subr.mxu0 %v3622_v0 }
 0xc55   :  { %5590 = vmatpush3.msra.mxu0 %v3622_v0  ;;  %v3711_v0 = vpop.permute.xlu0 %3710 }
 0xc57   :  { %v6745_v44 = vpop.permute.xlu1 %3797 }
 0xc58   :  { %5601 = vmatprep.subr.mxu0 %v6745_v44 }
 0xc9b   :  { %v5523_v41 = vpop.f32.mrf.mxu1 }
 0xc9c   :  { %v6750_v17 = vsel %vm113_vm2, -3.4028235e+38, %v5523_v41  ;;  %v6844_v41 = vpop.permute.xlu1 %3795 }
 0xc9d   :  { %v3306_v21 = vsel %vm964_vm3, %v6750_v17, -inf  ;;  %v2669_v23 = vpop.f32.mrf.mxu1 }
 0xc9e   :  { %v6756_v24 = vsel %vm113_vm2, -3.4028235e+38, %v2669_v23  ;;  %3307 = vmax.xlane.f32.xlu1 %v3306_v21  ;;  %v6846_v21 = vpop.permute.xlu0 %3884 }
 0xc9f   :  { %v3303_v27 = vsel %vm964_vm3, %v6756_v24, -inf  ;;  %v5530_v33 = vpop.f32.mrf.mxu0 }
 0xca0   :  { %v6762_v34 = vsel %vm114_vm4, -3.4028235e+38, %v5530_v33  ;;  %3304 = vmax.xlane.f32.xlu0 %v3303_v27  ;;  %v6848_v23 = vpop.permute.xlu1 %3971 }
 0xca1   :  { %v2756_v58 = vpop.f32.mrf.mxu0  ;;  %v3312_v53 = vsel %vm964_vm3, %v6762_v34, -inf }
 0xca2   :  { %v6768_v42 = vsel %vm114_vm4, -3.4028235e+38, %v2756_v58  ;;  %v3709_v27 = vpop.permute.xlu0 %3708 }
 0xca3   :  { %v3309_v3 = vsel %vm964_vm3, %v6768_v42, -inf }
 0xca4   :  { %3313 = vmax.xlane.f32.xlu0 %v3312_v53  ;;  %v6850_v48 = vpop.permute.xlu1 %3969 }
 0xca6   :  { %v6854_v33 = vpop.permute.xlu0 %3882 }
 0xca8   :  { %3310 = vmax.xlane.f32.xlu0 %v3309_v3 }
 0xced   :  { %v5537_v39 = vpop.f32.mrf.mxu1 }
 0xcee   :  { %v6774_v60 = vsel %vm113_vm2, -3.4028235e+38, %v5537_v39 }
 0xcef   :  { %v3318_v62 = vsel %vm964_vm3, %v6774_v60, -inf  ;;  %v2843_v40 = vpop.f32.mrf.mxu1 }
 0xcf0   :  { %v6780_v18 = vsel %vm113_vm2, -3.4028235e+38, %v2843_v40  ;;  %3319 = vmax.xlane.f32.xlu1 %v3318_v62 }
 0xcf1   :  { %v3315_v55 = vsel %vm964_vm3, %v6780_v18, -inf }
 0xcf2   :  { %3316 = vmax.xlane.f32.xlu0 %v3315_v55 }
 0xcfa   :  { %v5544_v7 = vpop.f32.mrf.mxu0 }
 0xcfb   :  { %v6786_v50 = vsel %vm114_vm4, -3.4028235e+38, %v5544_v7 }
 0xcfc   :  { %v3324_v54 = vsel %vm964_vm3, %v6786_v50, -inf  ;;  %v2930_v6 = vpop.f32.mrf.mxu0 }
 0xcfd   :  { %v6792_v45 = vsel %vm114_vm4, -3.4028235e+38, %v2930_v6  ;;  %3325 = vmax.xlane.f32.xlu0 %v3324_v54 }
 0xcfe   :  { %v3321_v57 = vsel %vm964_vm3, %v6792_v45, -inf }
 0xcff   :  { %v5551_v49 = vpop.f32.mrf.mxu1 }
 0xd00   :  { %v6798_v9 = vsel %vm113_vm2, -3.4028235e+38, %v5551_v49 }
 0xd01   :  { %v3330_v51 = vsel %vm964_vm3, %v6798_v9, -inf  ;;  %v3017_v46 = vpop.f32.mrf.mxu1  ;;  %3322 = vmax.xlane.f32.xlu0 %v3321_v57 }
 0xd02   :  { %v6804_v59 = vsel %vm113_vm2, -3.4028235e+38, %v3017_v46  ;;  %3331 = vmax.xlane.f32.xlu1 %v3330_v51  ;;  %v5558_v63 = vpop.f32.mrf.mxu0 }
 0xd03   :  { %v6808_v2 = vsel %vm114_vm4, -3.4028235e+38, %v5558_v63  ;;  %v3327_v4 = vsel %vm964_vm3, %v6804_v59, -inf }
 0xd04   :  { %v3336_v12 = vsel %vm964_vm3, %v6808_v2, -inf  ;;  %v3104_v5 = vpop.f32.mrf.mxu0 }
 0xd05   :  { %v6816_v31 = vsel %vm114_vm4, -3.4028235e+38, %v3104_v5  ;;  %3337 = vmax.xlane.f32.xlu0 %v3336_v12 }
 0xd06   :  { %3328 = vmax.xlane.f32.xlu1 %v3327_v4  ;;  %v3333_v10 = vsel %vm964_vm3, %v6816_v31, -inf }
 0xd07   :  { %v5565_v30 = vpop.f32.mrf.mxu1 }
 0xd08   :  { %v6822_v11 = vsel %vm113_vm2, -3.4028235e+38, %v5565_v30 }
 0xd09   :  { %v3342_v20 = vsel %vm964_vm3, %v6822_v11, -inf  ;;  %v3191_v19 = vpop.f32.mrf.mxu1  ;;  %3334 = vmax.xlane.f32.xlu0 %v3333_v10 }
 0xd0a   :  { %v6828_v14 = vsel %vm113_vm2, -3.4028235e+38, %v3191_v19  ;;  %3343 = vmax.xlane.f32.xlu1 %v3342_v20  ;;  %v5572_v26 = vpop.f32.mrf.mxu0 }
 0xd0b   :  { %v3339_v15 = vsel %vm964_vm3, %v6828_v14, -inf  ;;  %v6838_v43 = vsel %vm114_vm4, -3.4028235e+38, %v5572_v26 }
 0xd0c   :  { %v3278_v13 = vpop.f32.mrf.mxu0  ;;  %v3348_v37 = vsel %vm964_vm3, %v6838_v43, -inf }
 0xd0d   :  { %v6834_v16 = vsel %vm114_vm4, -3.4028235e+38, %v3278_v13 }
 0xd0e   :  { %v3345_v47 = vsel %vm964_vm3, %v6834_v16, -inf  ;;  %3340 = vmax.xlane.f32.xlu1 %v3339_v15 }
 0xd0f   :  { %3346 = vmax.xlane.f32.xlu0 %v3345_v47 }
 0xd12   :  { %3349 = vmax.xlane.f32.xlu1 %v3348_v37 }
 0xd23   :  { %4056 = vrot.lane.b32.xlu1 %v6660_v29, %s5891_s15 }
 0xd25   :  { %4058 = vrot.lane.b32.xlu0 %v6656_v1, %s5891_s15 }
 0xd27   :  { %v3308_v58 = vpop.xlane.xlu1 %3307 }
 0xd28   :  { %v3352_v53 = vsub.f32 %v6750_v17, %v3308_v58 }
 0xd29   :  { %v3305_v3 = vpop.xlane.xlu0 %3304 }
 0xd2a   :  { %v3351_v39 = vsub.f32 %v6756_v24, %v3305_v3  ;;  %v3369_v62 = vmul.f32 1.442695, %v3352_v53 }
 0xd2c   :  { %v3367_v40 = vmul.f32 1.442695, %v3351_v39 }
 0xd2d   :  { %v3314_v55 = vpop.xlane.xlu0 %3313 }
 0xd2e   :  { %5798 = vpow2.f32 %v3367_v40  ;;  %v3354_v7 = vsub.f32 %v6762_v34, %v3314_v55 }
 0xd2f   :  { %5800 = vpow2.f32 %v3369_v62 }
 0xd30   :  { %v3373_v6 = vmul.f32 1.442695, %v3354_v7 }
 0xd31   :  { %v3311_v54 = vpop.xlane.xlu0 %3310 }
 0xd32   :  { %v3353_v29 = vsub.f32 %v6768_v42, %v3311_v54 }
 0xd34   :  { %v3371_v49 = vmul.f32 1.442695, %v3353_v29 }
 0xd36   :  { %5802 = vpow2.f32 %v3371_v49 }
 0xd37   :  { %5804 = vpow2.f32 %v3373_v6 }
 0xd3b   :  { %v6862_v1 = vpop.eup %5798 }
 0xd3c   :  { %v6864_v17 = vpop.eup %5800  ;;  %5577 = vmatprep.mubr.msk.f32.mxu1 %vm964_vm3, %v6862_v1 }
 0xd3d   :  { %5578 = vmatmul.mubr.msk.f32.vlgmr.msra.gmra.mxu1 %vm964_vm3, %v6864_v17 }
 0xd3e   :  { %5581 = vmatpush3.msra.mxu1 %v6742_v56 }
 0xd3f   :  { %5582 = vmatprep.subr.mxu1 %v3535_v52 }
 0xd40   :  { %5583 = vmatpush3.msra.mxu1 %v3535_v52 }
 0xd41   :  { %5594 = vmatprep.subr.mxu1 %v3711_v0 }
 0xd43   :  { %v6871_v24 = vpop.eup %5802 }
 0xd44   :  { %v6873_v34 = vpop.eup %5804  ;;  %5584 = vmatprep.mubr.msk.f32.mxu1 %vm964_vm3, %v6871_v24 }
 0xd45   :  { %5585 = vmatmul.mubr.msk.f32.vlgmr.msra.gmra.mxu1 %vm964_vm3, %v6873_v34 }
 0xd46   :  { %5595 = vmatpush3.msra.mxu1 %v3711_v0 }
 0xd47   :  { %5596 = vmatprep.subr.mxu1 %v3709_v27 }
 0xd48   :  { %5597 = vmatpush3.msra.mxu1 %v3709_v27 }
 0xd49   :  { %5608 = vmatprep.subr.mxu1 %v6846_v21 }
 0xd79   :  { %v3320_v42 = vpop.xlane.xlu1 %3319 }
 0xd7a   :  { %v3356_v56 = vsub.f32 %v6774_v60, %v3320_v42 }
 0xd7b   :  { %v3317_v57 = vpop.xlane.xlu0 %3316 }
 0xd7c   :  { %v3377_v51 = vmul.f32 1.442695, %v3356_v56  ;;  %v3355_v46 = vsub.f32 %v6780_v18, %v3317_v57 }
 0xd7e   :  { %5806 = vpow2.f32 %v3377_v51  ;;  %v3375_v63 = vmul.f32 1.442695, %v3355_v46 }
 0xd80   :  { %5808 = vpow2.f32 %v3375_v63 }
 0xd86   :  { %v3326_v12 = vpop.xlane.xlu0 %3325 }
 0xd87   :  { %v3358_v5 = vsub.f32 %v6786_v50, %v3326_v12 }
 0xd89   :  { %v3381_v4 = vmul.f32 1.442695, %v3358_v5 }
 0xd8a   :  { %v3323_v30 = vpop.xlane.xlu0 %3322 }
 0xd8b   :  { %v5807_v10 = vpop.eup %5806  ;;  %5810 = vpow2.f32 %v3381_v4  ;;  %v3357_v20 = vsub.f32 %v6792_v45, %v3323_v30  ;;  %v3332_v19 = vpop.xlane.xlu1 %3331 }
 0xd8c   :  { %v3360_v26 = vsub.f32 %v6798_v9, %v3332_v19  ;;  %v3414_v60 = vsel %vm964_vm3, %v5807_v10, 0.0  ;;  %v3399_v19 = vsel %vm964_vm3, %v6862_v1, 0.0 }
 0xd8d   :  { %v5809_v13 = vpop.eup %5808  ;;  %v3379_v52 = vmul.f32 1.442695, %v3357_v20  ;;  %3415 = vadd.xlane.f32.xlu1 %v3414_v60  ;;  %v3402_v20 = vsel %vm964_vm3, %v6864_v17, 0.0  ;;  %v3405_v60 = vsel %vm964_vm3, %v6871_v24, 0.0 }
 0xd8e   :  { %v3385_v18 = vmul.f32 1.442695, %v3360_v26  ;;  %5591 = vmatprep.mubr.msk.f32.mxu0 %vm964_vm3, %v5809_v13  ;;  %v3338_v15 = vpop.xlane.xlu0 %3337  ;;  %v3411_v50 = vsel %vm964_vm3, %v5809_v13, 0.0  ;;  %v3408_v26 = vsel %vm964_vm3, %v6873_v34, 0.0 }
 0xd8f   :  { %5812 = vpow2.f32 %v3379_v52  ;;  %v3362_v47 = vsub.f32 %v6808_v2, %v3338_v15  ;;  %v3329_v37 = vpop.xlane.xlu1 %3328  ;;  %5592 = vmatmul.mubr.msk.f32.vlgmr.msra.gmra.mxu0 %vm964_vm3, %v5807_v10  ;;  %3412 = vadd.xlane.f32.xlu0 %v3411_v50 }
 0xd90   :  { %v3359_v45 = vsub.f32 %v6804_v59, %v3329_v37  ;;  %5602 = vmatpush3.msra.mxu0 %v6745_v44  ;;  %5814 = vpow2.f32 %v3385_v18 }
 0xd91   :  { %v3389_v9 = vmul.f32 1.442695, %v3362_v47  ;;  %5603 = vmatprep.subr.mxu0 %v6844_v41 }
 0xd92   :  { %v3383_v0 = vmul.f32 1.442695, %v3359_v45  ;;  %5604 = vmatpush3.msra.mxu0 %v6844_v41  ;;  %v3335_v27 = vpop.xlane.xlu0 %3334 }
 0xd93   :  { %5816 = vpow2.f32 %v3389_v9  ;;  %5615 = vmatprep.subr.mxu0 %v6848_v23  ;;  %v3361_v2 = vsub.f32 %v6816_v31, %v3335_v27  ;;  %v3344_v58 = vpop.xlane.xlu1 %3343 }
 0xd94   :  { %5818 = vpow2.f32 %v3383_v0  ;;  %v3364_v53 = vsub.f32 %v6822_v11, %v3344_v58 }
 0xd95   :  { %v3387_v59 = vmul.f32 1.442695, %v3361_v2 }
 0xd96   :  { %v3393_v3 = vmul.f32 1.442695, %v3364_v53 }
 0xd97   :  { %5820 = vpow2.f32 %v3387_v59  ;;  %v3341_v44 = vpop.xlane.xlu1 %3340 }
 0xd98   :  { %v5811_v39 = vpop.eup %5810  ;;  %5822 = vpow2.f32 %v3393_v3  ;;  %v3363_v62 = vsub.f32 %v6828_v14, %v3341_v44  ;;  %v3347_v40 = vpop.xlane.xlu0 %3346 }
 0xd99   :  { %v3365_v41 = vsub.f32 %v6834_v16, %v3347_v40  ;;  %v3420_v55 = vsel %vm964_vm3, %v5811_v39, 0.0 }
 0xd9a   :  { %v3391_v7 = vmul.f32 1.442695, %v3363_v62  ;;  %3421 = vadd.xlane.f32.xlu1 %v3420_v55 }
 0xd9b   :  { %v3395_v31 = vmul.f32 1.442695, %v3365_v41  ;;  %v3350_v54 = vpop.xlane.xlu1 %3349 }
 0xd9c   :  { %v5813_v29 = vpop.eup %5812  ;;  %5824 = vpow2.f32 %v3391_v7  ;;  %v3366_v11 = vsub.f32 %v6838_v43, %v3350_v54  ;;  %v4059_v56 = vpop.permute.xlu0 %4058 }
 0xd9d   :  { %5826 = vpow2.f32 %v3395_v31  ;;  %5598 = vmatprep.mubr.msk.f32.mxu1 %vm964_vm3, %v5813_v29  ;;  %v3417_v6 = vsel %vm964_vm3, %v5813_v29, 0.0  ;;  %v5815_v14 = vpop.eup %5814 }
 0xd9e   :  { %v3397_v49 = vmul.f32 1.442695, %v3366_v11  ;;  %5599 = vmatmul.mubr.msk.f32.vlgmr.msra.gmra.mxu1 %vm964_vm3, %v5811_v39  ;;  %3418 = vadd.xlane.f32.xlu0 %v3417_v6  ;;  %v3426_v57 = vsel %vm964_vm3, %v5815_v14, 0.0 }
 0xd9f   :  { %5609 = vmatpush3.msra.mxu1 %v6846_v21  ;;  %v4057_v63 = vpop.permute.xlu1 %4056 }
 0xda0   :  { %v5817_v16 = vpop.eup %5816  ;;  %5828 = vpow2.f32 %v3397_v49  ;;  %5610 = vmatprep.subr.mxu1 %v6854_v33 }
 0xda1   :  { %v5819_v42 = vpop.eup %5818  ;;  %5611 = vmatpush3.msra.mxu1 %v6854_v33  ;;  %v3432_v43 = vsel %vm964_vm3, %v5817_v16, 0.0 }
 0xda2   :  { %5605 = vmatprep.mubr.msk.f32.mxu0 %vm964_vm3, %v5819_v42  ;;  %5622 = vmatprep.subr.mxu1 %v4059_v56  ;;  %v3423_v33 = vsel %vm964_vm3, %v5819_v42, 0.0 }
 0xda3   :  { %3427 = vadd.xlane.f32.xlu0 %v3426_v57  ;;  %5606 = vmatmul.mubr.msk.f32.vlgmr.msra.gmra.mxu0 %vm964_vm3, %v5815_v14 }
 0xda4   :  { %v5821_v51 = vpop.eup %5820  ;;  %5616 = vmatpush3.msra.mxu0 %v6848_v23  ;;  %3433 = vadd.xlane.f32.xlu1 %v3432_v43 }
 0xda5   :  { %v5823_v21 = vpop.eup %5822  ;;  %5617 = vmatprep.subr.mxu0 %v6850_v48  ;;  %5612 = vmatprep.mubr.msk.f32.mxu1 %vm964_vm3, %v5821_v51  ;;  %v3429_v5 = vsel %vm964_vm3, %v5821_v51, 0.0 }
 0xda6   :  { %5618 = vmatpush3.msra.mxu0 %v6850_v48  ;;  %5613 = vmatmul.mubr.msk.f32.vlgmr.msra.gmra.mxu1 %vm964_vm3, %v5817_v16  ;;  %v3438_v46 = vsel %vm964_vm3, %v5823_v21, 0.0 }
 0xda7   :  { %5623 = vmatpush3.msra.mxu1 %v4059_v56  ;;  %3424 = vadd.xlane.f32.xlu0 %v3423_v33 }
 0xda8   :  { %3439 = vadd.xlane.f32.xlu1 %v3438_v46  ;;  %5624 = vmatprep.subr.mxu1 %v4057_v63 }
 0xda9   :  { %v5825_v23 = vpop.eup %5824  ;;  %5625 = vmatpush3.msra.mxu1 %v4057_v63 }
 0xdaa   :  { %v5827_v12 = vpop.eup %5826  ;;  %5619 = vmatprep.mubr.msk.f32.mxu0 %vm964_vm3, %v5825_v23  ;;  %v3435_v4 = vsel %vm964_vm3, %v5825_v23, 0.0 }
 0xdab   :  { %3430 = vadd.xlane.f32.xlu0 %v3429_v5  ;;  %5620 = vmatmul.mubr.msk.f32.vlgmr.msra.gmra.mxu0 %vm964_vm3, %v5823_v21  ;;  %v3441_v10 = vsel %vm964_vm3, %v5827_v12, 0.0 }
 0xdac   :  { %5626 = vmatprep.mubr.msk.f32.mxu1 %vm964_vm3, %v5827_v12 }
 0xdad   :  { %v5829_v48 = vpop.eup %5828 }
 0xdae   :  { %5627 = vmatmul.mubr.msk.f32.vlgmr.msra.gmra.mxu1 %vm964_vm3, %v5829_v48  ;;  %v3444_v30 = vsel %vm964_vm3, %v5829_v48, 0.0 }
 0xdaf   :  { %3436 = vadd.xlane.f32.xlu0 %v3435_v4  ;;  %3445 = vadd.xlane.f32.xlu1 %v3444_v30 }
 0xdb3   :  { %3442 = vadd.xlane.f32.xlu0 %v3441_v10  ;;  %3403 = vadd.xlane.f32.xlu1 %v3402_v20 }
 0xdb7   :  { %3400 = vadd.xlane.f32.xlu0 %v3399_v19  ;;  %3409 = vadd.xlane.f32.xlu1 %v3408_v26 }
 0xdbb   :  { %3406 = vadd.xlane.f32.xlu0 %v3405_v60 }
 0xdc8   :  { %4253 = vrot.lane.b32.xlu1 %v6553_v32, %s5886_s24 }
 0xdcc   :  { %4251 = vrot.lane.b32.xlu1 %v6562_v8, %s5886_s24 }
 0xdd1   :  { %4255 = vrot.lane.b32.xlu0 %v6546_v22, %s5886_s24 }
 0xdd5   :  { %4249 = vrot.lane.b32.xlu0 %v6569_v28, %s5886_s24 }
 0xdfd   :  { %v6950_v0 = vpop.f32.mrf.mxu1 }
 0xdff   :  { %v6952_v2 = vpop.f32.mrf.mxu1 }
 0xe05   :  { %v6954_v53 = vpop.f32.mrf.mxu1 }
 0xe07   :  { %v3612_v55 = vpop.f32.mrf.mxu1 }
 0xe16   :  { %v3416_v17 = vpop.xlane.xlu1 %3415 }
 0xe17   :  { %5830 = vrcp.f32 %v3416_v17 }
 0xe18   :  { %v3413_v1 = vpop.xlane.xlu0 %3412 }
 0xe19   :  { %5832 = vrcp.f32 %v3413_v1 }
 0xe23   :  { %v3422_v13 = vpop.xlane.xlu1 %3421 }
 0xe24   :  { %v5831_v3 = vpop.eup %5830 }
 0xe26   :  { %v5833_v62 = vpop.eup %5832 }
 0xe27   :  { %v3419_v34 = vpop.xlane.xlu0 %3418 }
 0xe2c   :  { %v3428_v52 = vpop.xlane.xlu0 %3427 }
 0xe2d   :  { %v3434_v18 = vpop.xlane.xlu1 %3433 }
 0xe30   :  { %v3425_v24 = vpop.xlane.xlu0 %3424 }
 0xe31   :  { %v3440_v15 = vpop.xlane.xlu1 %3439 }
 0xe34   :  { %v3431_v50 = vpop.xlane.xlu0 %3430 }
 0xe38   :  { %v3437_v47 = vpop.xlane.xlu0 %3436  ;;  %v6942_v32 = vpop.xlane.xlu1 %3445 }
 0xe3c   :  { %v3443_v37 = vpop.xlane.xlu0 %3442  ;;  %v6944_v8 = vpop.xlane.xlu1 %3403 }
 0xe40   :  { %v6946_v45 = vpop.xlane.xlu0 %3400  ;;  %v6948_v22 = vpop.xlane.xlu1 %3409 }
 0xe44   :  { %v3407_v28 = vpop.xlane.xlu0 %3406  ;;  %v4254_v9 = vpop.permute.xlu1 %4253 }
 0xe45   :  { %5834 = vrcp.f32 %v3407_v28 }
 0xe46   :  { %5836 = vrcp.f32 %v3422_v13 }
 0xe47   :  { %5838 = vrcp.f32 %v3419_v34 }
 0xe48   :  { %v4256_v27 = vpop.permute.xlu0 %4255  ;;  %v4252_v58 = vpop.permute.xlu1 %4251  ;;  %5840 = vrcp.f32 %v3428_v52 }
 0xe49   :  { %5629 = vmatprep.subr.mxu0 %v4256_v27  ;;  %5842 = vrcp.f32 %v3425_v24 }
 0xe4a   :  { %5630 = vmatpush3.msra.mxu0 %v4256_v27  ;;  %5844 = vrcp.f32 %v3431_v50 }
 0xe4b   :  { %5631 = vmatprep.subr.mxu0 %v4254_v9  ;;  %5846 = vrcp.f32 %v3440_v15 }
 0xe4c   :  { %5632 = vmatpush3.msra.mxu0 %v4254_v9  ;;  %v4250_v59 = vpop.permute.xlu0 %4249  ;;  %5848 = vrcp.f32 %v3437_v47 }
 0xe4d   :  { %5633 = vmatprep.subr.mxu0 %v4252_v58  ;;  %5850 = vrcp.f32 %v3443_v37 }
 0xe4e   :  { %5634 = vmatpush3.msra.mxu0 %v4252_v58  ;;  %5852 = vrcp.f32 %v3434_v18 }
 0xe4f   :  { %v5593_v44 = vpop.f32.mrf.mxu0  ;;  %5635 = vmatprep.subr.mxu0 %v4250_v59  ;;  %5854 = vrcp.f32 %v6942_v32 }
 0xe50   :  { %v4164_v39 = vmul.f32 %v5831_v3, %v5593_v44  ;;  %5636 = vmatpush3.msra.mxu0 %v4250_v59  ;;  %5856 = vrcp.f32 %v6946_v45 }
 0xe51   :  { %v3699_v40 = vpop.f32.mrf.mxu0  ;;  %5858 = vrcp.f32 %v6944_v8 }
 0xe52   :  { %v5835_v41 = vpop.eup %5834  ;;  %v4163_v7 = vmul.f32 %v5833_v62, %v3699_v40  ;;  %4181 = vrot.lane.b32.xlu0 %v4164_v39, %s5892_s1  ;;  %5860 = vrcp.f32 %v6948_v22 }
 0xe53   :  { %v6957_v31 = vmul.f32 %v5835_v41, %v3612_v55  ;;  %v5837_v54 = vpop.eup %5836 }
 0xe54   :  { %4179 = vrot.lane.b32.xlu1 %v4163_v7, %s5892_s1  ;;  %v5839_v6 = vpop.eup %5838 }
 0xe55   :  { %v5841_v42 = vpop.eup %5840 }
 0xe56   :  { %v5843_v56 = vpop.eup %5842 }
 0xe57   :  { %v5845_v33 = vpop.eup %5844 }
 0xe58   :  { %v5847_v23 = vpop.eup %5846 }
 0xe59   :  { %v5849_v30 = vpop.eup %5848 }
 0xe5a   :  { %v5851_v10 = vpop.eup %5850 }
 0xe5b   :  { %v5853_v60 = vpop.eup %5852 }
 0xe5c   :  { %v5855_v17 = vpop.eup %5854 }
 0xe5d   :  { %v5857_v47 = vpop.eup %5856 }
 0xe5e   :  { %v5600_v29 = vpop.f32.mrf.mxu1  ;;  %v5859_v32 = vpop.eup %5858 }
 0xe5f   :  { %v4166_v11 = vmul.f32 %v5837_v54, %v5600_v29  ;;  %v4160_v9 = vmul.f32 %v5859_v32, %v6950_v0  ;;  %v5861_v39 = vpop.eup %5860  ;;  %v5093_v32 = vld [vmem:[%s7207_s2 + $0xc8] sm:$0xff] }
 0xe60   :  { %v3786_v49 = vpop.f32.mrf.mxu1  ;;  %v4162_v41 = vmul.f32 %v5861_v39, %v6954_v53 }
 0xe61   :  { %v4165_v14 = vmul.f32 %v5839_v6, %v3786_v49  ;;  %4185 = vrot.lane.b32.xlu1 %v4166_v11, %s5892_s1 }
 0xe63   :  { %v5607_v16 = vpop.f32.mrf.mxu0  ;;  %4183 = vrot.lane.b32.xlu0 %v4165_v14, %s5892_s1 }
 0xe64   :  { %v4168_v43 = vmul.f32 %v5841_v42, %v5607_v16 }
 0xe65   :  { %v3873_v57 = vpop.f32.mrf.mxu0 }
 0xe66   :  { %v4167_v51 = vmul.f32 %v5843_v56, %v3873_v57  ;;  %v5614_v21 = vpop.f32.mrf.mxu1 }
 0xe67   :  { %4197 = vrot.lane.b32.xlu0 %v4168_v43, %s5893_s20  ;;  %v4170_v1 = vmul.f32 %v5853_v60, %v5614_v21 }
 0xe68   :  { %4195 = vrot.lane.b32.xlu1 %v4167_v51, %s5893_s20  ;;  %v3960_v46 = vpop.f32.mrf.mxu1 }
 0xe69   :  { %v4169_v63 = vmul.f32 %v5845_v33, %v3960_v46 }
 0xe6b   :  { %v5621_v12 = vpop.f32.mrf.mxu0  ;;  %4199 = vrot.lane.b32.xlu0 %v4169_v63, %s5893_s20 }
 0xe6c   :  { %v4172_v5 = vmul.f32 %v5847_v23, %v5621_v12 }
 0xe6d   :  { %v4047_v48 = vpop.f32.mrf.mxu0 }
 0xe6e   :  { %v5628_v4 = vpop.f32.mrf.mxu1  ;;  %4213 = vrot.lane.b32.xlu1 %v4172_v5, %s5894_s21  ;;  %v4171_v20 = vmul.f32 %v5849_v30, %v4047_v48 }
 0xe6f   :  { %v4174_v34 = vmul.f32 %v5855_v17, %v5628_v4 }
 0xe70   :  { %v4134_v19 = vpop.f32.mrf.mxu1 }
 0xe71   :  { %v4173_v26 = vmul.f32 %v5851_v10, %v4134_v19 }
 0xe72   :  { %4211 = vrot.lane.b32.xlu1 %v4171_v20, %s5894_s21 }
 0xe73   :  { %4215 = vrot.lane.b32.xlu0 %v4173_v26, %s5894_s21 }
 0xe76   :  { %4201 = vrot.lane.b32.xlu1 %v4170_v1, %s5893_s20 }
 0xe77   :  { %4261 = vrot.lane.b32.xlu0 %v6592_v38, %s5886_s24  ;;  %v4159_v38 = vmul.f32 %v5857_v47, %v6952_v2  ;;  %v5094_v47 = vld [vmem:[%s7207_s2 + $0xe0] sm:$0xff] }
 0xe7a   :  { %4217 = vrot.lane.b32.xlu1 %v4174_v34, %s5894_s21 }
 0xec4   :  { %v4182_v13 = vpop.permute.xlu0 %4181 }
 0xec5   :  { %v4224_v27 = vsel %vm255_vm1, %v4160_v9, %v4182_v13  ;;  %v5103_v9 = vld [vmem:[%s7207_s2 + $0x100] sm:$0xff] }
 0xec6   :  { %v4180_v52 = vpop.permute.xlu1 %4179 }
 0xec7   :  { %v4223_v45 = vsel %vm255_vm1, %v4159_v38, %v4180_v52  ;;  %v5105_v38 = vld [vmem:[%s7207_s2 + $0x130] sm:$0xff] }
 0xed3   :  { %v4186_v24 = vpop.permute.xlu1 %4185 }
 0xed4   :  { %v4226_v55 = vsel %vm255_vm1, %v4162_v41, %v4186_v24  ;;  %v7027_v24 = vld [vmem:[%s7206_s3 + $0x6] ss:$0 sm:$0xff] }
 0xed5   :  { %v4184_v18 = vpop.permute.xlu0 %4183 }
 0xed6   :  { %v4225_v8 = vsel %vm255_vm1, %v6957_v31, %v4184_v18 }
 0xed9   :  { %v4198_v15 = vpop.permute.xlu0 %4197 }
 0xeda   :  { %v4196_v50 = vpop.permute.xlu1 %4195  ;;  %v4228_v59 = vsel %vm964_vm3, %v4224_v27, %v4198_v15  ;;  %v5096_v15 = vld [vmem:[%s7207_s2 + $0x110] sm:$0xff] }
 0xedb   :  { %v4227_v58 = vsel %vm964_vm3, %v4223_v45, %v4196_v50  ;;  %v5095_v50 = vld [vmem:[%s7207_s2 + $0xf8] sm:$0xff]  ;;  %5643 = vmatprep.subr.mxu1 %v5096_v15  ;;  %v5106_v45 = vld [vmem:[%s7207_s2 + $0x148] sm:$0xff]  ;;  %v5101_v27 = vld [vmem:[%s7207_s2 + $0xd0] sm:$0xff] }
 0xedc   :  { %5644 = vmatpush3.msra.mxu1 %v5096_v15 }
 0xedd   :  { %v4200_v28 = vpop.permute.xlu0 %4199  ;;  %5645 = vmatprep.subr.mxu1 %v5095_v50 }
 0xede   :  { %v4229_v3 = vsel %vm964_vm3, %v4225_v8, %v4200_v28  ;;  %5646 = vmatpush3.msra.mxu1 %v5095_v50  ;;  %v5107_v28 = vld [vmem:[%s7207_s2 + $0x160] sm:$0xff]  ;;  %v5104_v8 = vld [vmem:[%s7207_s2 + $0x118] sm:$0xff] }
 0xedf   :  { %5647 = vmatprep.subr.mxu1 %v5094_v47 }
 0xee0   :  { %v4214_v37 = vpop.permute.xlu1 %4213  ;;  %5648 = vmatpush3.msra.mxu1 %v5094_v47 }
 0xee1   :  { %v4232_v0 = vsel %vm1893_vm5, %v4228_v59, %v4214_v37  ;;  %5649 = vmatprep.subr.mxu1 %v5093_v32  ;;  %v5108_v37 = vld [vmem:[%s7207_s2 + $0x178] sm:$0xff] }
 0xee2   :  { %5650 = vmatpush3.msra.mxu1 %v5093_v32 }
 0xee4   :  { %v4212_v22 = vpop.permute.xlu1 %4211 }
 0xee5   :  { %v4231_v44 = vsel %vm1893_vm5, %v4227_v58, %v4212_v22  ;;  %v4216_v2 = vpop.permute.xlu0 %4215  ;;  %v5102_v58 = vld [vmem:[%s7207_s2 + $0xe8] sm:$0xff] }
 0xee6   :  { %v4233_v62 = vsel %vm1893_vm5, %v4229_v3, %v4216_v2  ;;  %5637 = vmatprep.mubr.msk.f32.mxu0 %vm23_vm0, %v4231_v44 }
 0xee7   :  { %5638 = vmatmul.mubr.msk.f32.vlgmr.msra.gmra.mxu0 %vm23_vm0, %v4232_v0 }
 0xee8   :  { %5640 = vmatprep.mubr.msk.f32.mxu0 %vm23_vm0, %v4233_v62  ;;  %v4202_v40 = vpop.permute.xlu1 %4201 }
 0xee9   :  { %v4230_v7 = vsel %vm964_vm3, %v4226_v55, %v4202_v40  ;;  %v4262_v29 = vpop.permute.xlu0 %4261 }
 0xeec   :  { %v4218_v31 = vpop.permute.xlu1 %4217 }
 0xeed   :  { %v4234_v54 = vsel %vm1893_vm5, %v4230_v7, %v4218_v31 }
 0xeee   :  { %5641 = vmatmul.mubr.msk.f32.gmra.mxu0 %vm23_vm0, %v4234_v54 }
 0xfa7   :  { %v5639_v11 = vpop.f32.mrf.mxu0 }
 0xfa8   :  { %v4348_v6 = vadd.f32 %v5639_v11, %v4262_v29 }
 0xfa9   :  { %v4342_v49 = vpop.f32.mrf.mxu0 }
 0xfaa   :  { %v4362_v14 = vadd.f32 %v4348_v6, %v6575_v25  ;;  %v4343_v16 = vadd.f32 %v4342_v49, %v4262_v29 }
 0xfac   :  { %v4361_v42 = vadd.f32 %v4343_v16, %v6573_v61  ;;  %v4369_v53 = vsel %vm23_vm0, %v4362_v14, 0.0 }
 0xfad   :  { %4370 = vadd.xlane.f32.xlu0 %v4369_v53 }
 0xfae   :  { %v5642_v56 = vpop.f32.mrf.mxu0  ;;  %v4366_v43 = vsel %vm23_vm0, %v4361_v42, 0.0 }
 0xfaf   :  { %4367 = vadd.xlane.f32.xlu1 %v4366_v43  ;;  %v4358_v51 = vadd.f32 %v5642_v56, %v4262_v29 }
 0xfb0   :  { %v4352_v57 = vpop.f32.mrf.mxu0 }
 0xfb1   :  { %v4353_v21 = vadd.f32 %v4352_v57, %v4262_v29  ;;  %v4364_v46 = vadd.f32 %v4358_v51, %v6585_v36 }
 0xfb3   :  { %v4363_v33 = vadd.f32 %v4353_v21, %v6581_v35  ;;  %v4375_v25 = vsel %vm23_vm0, %v4364_v46, 0.0 }
 0xfb5   :  { %v4372_v63 = vsel %vm23_vm0, %v4363_v33, 0.0 }
 0xfb6   :  { %4373 = vadd.xlane.f32.xlu0 %v4372_v63 }
 0xfba   :  { %4376 = vadd.xlane.f32.xlu0 %v4375_v25 }
0x1036   :  { %v4371_v61 = vpop.xlane.xlu0 %4370 }
0x1037   :  { %v4379_v23 = vmul.f32 0.03125, %v4371_v61 }
0x1038   :  { %v4368_v12 = vpop.xlane.xlu1 %4367 }
0x1039   :  { %v7004_v5 = vsub.f32 %v4362_v14, %v4379_v23  ;;  %v4378_v48 = vmul.f32 0.03125, %v4368_v12 }
0x103b   :  { %v7006_v4 = vsub.f32 %v4361_v42, %v4378_v48  ;;  %v4387_v30 = vmul.f32 %v7004_v5, %v7004_v5 }
0x103d   :  { %v4393_v35 = vsel %vm23_vm0, %v4387_v30, 0.0  ;;  %v4386_v36 = vmul.f32 %v7006_v4, %v7006_v4 }
0x103e   :  { %4394 = vadd.xlane.f32.xlu0 %v4393_v35 }
0x103f   :  { %v4374_v10 = vpop.xlane.xlu0 %4373  ;;  %v4390_v20 = vsel %vm23_vm0, %v4386_v36, 0.0 }
0x1040   :  { %v4380_v19 = vmul.f32 0.03125, %v4374_v10  ;;  %4391 = vadd.xlane.f32.xlu1 %v4390_v20 }
0x1042   :  { %v7014_v26 = vsub.f32 %v4363_v33, %v4380_v19 }
0x1043   :  { %v4377_v60 = vpop.xlane.xlu0 %4376 }
0x1044   :  { %v4381_v1 = vmul.f32 0.03125, %v4377_v60  ;;  %v4388_v17 = vmul.f32 %v7014_v26, %v7014_v26 }
0x1046   :  { %v7018_v34 = vsub.f32 %v4364_v46, %v4381_v1  ;;  %v4396_v13 = vsel %vm23_vm0, %v4388_v17, 0.0 }
0x1047   :  { %4397 = vadd.xlane.f32.xlu1 %v4396_v13 }
0x1048   :  { %v4389_v52 = vmul.f32 %v7018_v34, %v7018_v34 }
0x104a   :  { %v4399_v18 = vsel %vm23_vm0, %v4389_v52, 0.0 }
0x104b   :  { %4400 = vadd.xlane.f32.xlu0 %v4399_v18 }
0x1058   :  { %4428 = vrot.lane.b32.xlu1 %v7027_v24, %s5890_s14 }
0x105c   :  { %4612 = vrot.lane.b32.xlu1 %v5108_v37, %s5891_s15 }
0x1060   :  { %4610 = vrot.lane.b32.xlu1 %v5107_v28, %s5891_s15 }
0x1061   :  { %4439 = vrot.lane.b32.xlu0 %v7027_v24, %s5891_s15 }
0x1064   :  { %4608 = vrot.lane.b32.xlu1 %v5106_v45, %s5891_s15 }
0x1065   :  { %4606 = vrot.lane.b32.xlu0 %v5105_v38, %s5891_s15 }
0x1068   :  { %4604 = vrot.lane.b32.xlu1 %v5104_v8, %s5891_s15 }
0x1069   :  { %4602 = vrot.lane.b32.xlu0 %v5103_v9, %s5891_s15 }
0x106c   :  { %4600 = vrot.lane.b32.xlu1 %v5102_v58, %s5891_s15 }
0x106d   :  { %4598 = vrot.lane.b32.xlu0 %v5101_v27, %s5891_s15 }
0x10c7   :  { %v4395_v22 = vpop.xlane.xlu0 %4394 }
0x10c8   :  { %v4403_v59 = vmul.f32 0.03125, %v4395_v22 }
0x10c9   :  { %v4392_v3 = vpop.xlane.xlu1 %4391 }
0x10ca   :  { %v4407_v44 = vadd.f32 1e-12, %v4403_v59  ;;  %v4402_v2 = vmul.f32 0.03125, %v4392_v3 }
0x10cc   :  { %5862 = vrsqrt.f32 %v4407_v44  ;;  %v4406_v39 = vadd.f32 1e-12, %v4402_v2 }
0x10ce   :  { %5864 = vrsqrt.f32 %v4406_v39 }
0x10d0   :  { %v4398_v0 = vpop.xlane.xlu1 %4397 }
0x10d1   :  { %v4404_v62 = vmul.f32 0.03125, %v4398_v0 }
0x10d3   :  { %v4408_v40 = vadd.f32 1e-12, %v4404_v62 }
0x10d4   :  { %v4401_v41 = vpop.xlane.xlu0 %4400  ;;  %v4429_v14 = vpop.permute.xlu1 %4428 }
0x10d5   :  { %5866 = vrsqrt.f32 %v4408_v40  ;;  %v4405_v55 = vmul.f32 0.03125, %v4401_v41 }
0x10d7   :  { %v4409_v7 = vadd.f32 1e-12, %v4405_v55 }
0x10d8   :  { %v4613_v63 = vpop.permute.xlu1 %4612  ;;  %v4440_v61 = vpop.permute.xlu0 %4439 }
0x10d9   :  { %v5863_v31 = vpop.eup %5862  ;;  %5868 = vrsqrt.f32 %v4409_v7  ;;  %5657 = vmatprep.subr.mxu0 %v4613_v63 }
0x10da   :  { %v4415_v54 = vmul.f32 %v5863_v31, %v7004_v5  ;;  %5658 = vmatpush3.msra.mxu0 %v4613_v63 }
0x10db   :  { %v5865_v29 = vpop.eup %5864 }
0x10dc   :  { %v4414_v11 = vmul.f32 %v5865_v29, %v7006_v4  ;;  %v4425_v6 = vmul.f32 %v7027_v24, %v4415_v54  ;;  %v4611_v25 = vpop.permute.xlu1 %4610  ;;  %v4607_v12 = vpop.permute.xlu0 %4606 }
0x10dd   :  { %5659 = vmatprep.subr.mxu0 %v4611_v25 }
0x10de   :  { %v4424_v49 = vmul.f32 %v7027_v24, %v4414_v11  ;;  %v7083_v42 = vadd.f32 %v4429_v14, %v4425_v6  ;;  %5660 = vmatpush3.msra.mxu0 %v4611_v25 }
0x10e0   :  { %v7081_v16 = vadd.f32 %v4429_v14, %v4424_v49  ;;  %v4609_v23 = vpop.permute.xlu1 %4608  ;;  %v4603_v48 = vpop.permute.xlu0 %4602 }
0x10e1   :  { %5661 = vmatprep.subr.mxu0 %v4609_v23 }
0x10e2   :  { %v5867_v53 = vpop.eup %5866  ;;  %5651 = vmatprep.mubr.msk.f32.mxu1 %vm23_vm0, %v7081_v16  ;;  %5662 = vmatpush3.msra.mxu0 %v4609_v23 }
0x10e3   :  { %v4416_v56 = vmul.f32 %v5867_v53, %v7014_v26  ;;  %5652 = vmatmul.mubr.msk.f32.vlgmr.msra.gmra.mxu1 %vm23_vm0, %v7083_v42  ;;  %5663 = vmatprep.subr.mxu0 %v4607_v12 }
0x10e4   :  { %5664 = vmatpush3.msra.mxu0 %v4607_v12  ;;  %v4605_v5 = vpop.permute.xlu1 %4604  ;;  %v4599_v30 = vpop.permute.xlu0 %4598 }
0x10e5   :  { %v4426_v43 = vmul.f32 %v7027_v24, %v4416_v56  ;;  %5665 = vmatprep.subr.mxu0 %v4605_v5 }
0x10e6   :  { %v5869_v57 = vpop.eup %5868  ;;  %5666 = vmatpush3.msra.mxu0 %v4605_v5 }
0x10e7   :  { %v4417_v51 = vmul.f32 %v5869_v57, %v7018_v34  ;;  %v7092_v21 = vadd.f32 %v4429_v14, %v4426_v43  ;;  %5667 = vmatprep.subr.mxu0 %v4603_v48 }
0x10e8   :  { %5668 = vmatpush3.msra.mxu0 %v4603_v48  ;;  %v4601_v4 = vpop.permute.xlu1 %4600 }
0x10e9   :  { %v4427_v33 = vmul.f32 %v7027_v24, %v4417_v51  ;;  %5654 = vmatprep.mubr.msk.f32.mxu1 %vm23_vm0, %v7092_v21  ;;  %5669 = vmatprep.subr.mxu0 %v4601_v4 }
0x10ea   :  { %5670 = vmatpush3.msra.mxu0 %v4601_v4 }
0x10eb   :  { %v7097_v46 = vadd.f32 %v4429_v14, %v4427_v33  ;;  %5671 = vmatprep.subr.mxu0 %v4599_v30  ;;  %v5110_v14 = vld [vmem:[%s7206_s3 + $0x7] ss:$0 sm:$0xff] }
0x10ec   :  { %5672 = vmatpush3.msra.mxu0 %v4599_v30 }
0x10ed   :  { %5655 = vmatmul.mubr.msk.f32.gmra.mxu1 %vm23_vm0, %v7097_v46 }
0x11a3   :  { %v5653_v35 = vpop.f32.mrf.mxu1 }
0x11a4   :  { %v4526_v36 = vadd.f32 %v5653_v35, %v4440_v61  ;;  %v4793_v35 = vld [vmem:[%s7207_s2 + $0x38] sm:$0xff] }
0x11a5   :  { %v4520_v10 = vpop.f32.mrf.mxu1 }
0x11a6   :  { %v4540_v20 = vmul.f32 %v4526_v36, %v4526_v36  ;;  %v4521_v19 = vadd.f32 %v4520_v10, %v4440_v61  ;;  %v4791_v10 = vld [vmem:[%s7207_s2 + $0x20] sm:$0xff] }
0x11a8   :  { %v4544_v26 = vmul.f32 %v4540_v20, %v4526_v36  ;;  %v4539_v60 = vmul.f32 %v4521_v19, %v4521_v19 }
0x11aa   :  { %v4548_v1 = vmul.f32 0.044715, %v4544_v26  ;;  %v4543_v17 = vmul.f32 %v4539_v60, %v4521_v19 }
0x11ac   :  { %v4552_v34 = vadd.f32 %v4548_v1, %v4526_v36  ;;  %v4547_v13 = vmul.f32 0.044715, %v4543_v17 }
0x11ad   :  { %v5656_v52 = vpop.f32.mrf.mxu1 }
0x11ae   :  { %v4556_v18 = vmul.f32 0.7978846, %v4552_v34  ;;  %v4551_v24 = vadd.f32 %v4547_v13, %v4521_v19  ;;  %v4536_v15 = vadd.f32 %v5656_v52, %v4440_v61 }
0x11af   :  { %v4530_v50 = vpop.f32.mrf.mxu1 }
0x11b0   :  { %5870 = vtanh.f32 %v4556_v18  ;;  %v4555_v47 = vmul.f32 0.7978846, %v4551_v24  ;;  %v4542_v32 = vmul.f32 %v4536_v15, %v4536_v15  ;;  %v4531_v37 = vadd.f32 %v4530_v50, %v4440_v61 }
0x11b2   :  { %5872 = vtanh.f32 %v4555_v47  ;;  %v4546_v38 = vmul.f32 %v4542_v32, %v4536_v15  ;;  %v4541_v28 = vmul.f32 %v4531_v37, %v4531_v37 }
0x11b4   :  { %v4550_v9 = vmul.f32 0.044715, %v4546_v38  ;;  %v4545_v45 = vmul.f32 %v4541_v28, %v4531_v37 }
0x11b6   :  { %v4554_v27 = vadd.f32 %v4550_v9, %v4536_v15  ;;  %v4549_v8 = vmul.f32 0.044715, %v4545_v45 }
0x11b8   :  { %v4558_v58 = vmul.f32 0.7978846, %v4554_v27  ;;  %v4553_v22 = vadd.f32 %v4549_v8, %v4531_v37 }
0x11ba   :  { %5874 = vtanh.f32 %v4558_v58  ;;  %v4557_v59 = vmul.f32 0.7978846, %v4553_v22 }
0x11bc   :  { %5876 = vtanh.f32 %v4557_v59 }
0x11bd   :  { %v5871_v3 = vpop.eup %5870 }
0x11be   :  { %v4564_v44 = vadd.f32 1.0, %v5871_v3 }
0x11bf   :  { %v5873_v2 = vpop.eup %5872 }
0x11c0   :  { %v4563_v39 = vadd.f32 1.0, %v5873_v2  ;;  %v4568_v0 = vmul.f32 0.5, %v4564_v44 }
0x11c2   :  { %v4567_v62 = vmul.f32 0.5, %v4563_v39  ;;  %v4572_v41 = vmul.f32 %v4568_v0, %v4526_v36  ;;  %v4796_v36 = vld [vmem:[%s7207_s2 + $0x58] sm:$0xff] }
0x11c4   :  { %v4571_v40 = vmul.f32 %v4567_v62, %v4521_v19  ;;  %v4789_v62 = vld [vmem:[%s7207_s2 + $0x8] sm:$0xff] }
0x11c6   :  { %5673 = vmatprep.mubr.msk.f32.mxu0 %vm2285_vm6, %v4571_v40  ;;  %v4790_v40 = vld [vmem:[%s7207_s2 + $0x10] sm:$0xff] }
0x11c7   :  { %v5875_v55 = vpop.eup %5874  ;;  %5674 = vmatmul.mubr.msk.f32.vlgmr.msra.gmra.mxu0 %vm2285_vm6, %v4572_v41  ;;  %v4799_v41 = vlaneseq }
0x11c8   :  { %v4566_v7 = vadd.f32 1.0, %v5875_v55 }
0x11c9   :  { %v5877_v31 = vpop.eup %5876  ;;  %v4800_v55 = vshrl.u32 %v4799_v41, 7 }
0x11ca   :  { %v4565_v54 = vadd.f32 1.0, %v5877_v31  ;;  %v4570_v29 = vmul.f32 0.5, %v4566_v7  ;;  %v4797_v7 = vld [vmem:[%s7206_s3 + $0x3] sm:$0x3] }
0x11cb   :  { %v4805_v31 = vsub.s32 1, %v4800_v55 }
0x11cc   :  { %v4569_v11 = vmul.f32 0.5, %v4565_v54  ;;  %v4574_v49 = vmul.f32 %v4570_v29, %v4536_v15  ;;  %v4801_v54 = vsub.s32 0, %v4800_v55 }
0x11cd   :  { %v4806_v29 = vrot.slane %v4797_v7, %v4805_v31 }
0x11ce   :  { %v4573_v6 = vmul.f32 %v4569_v11, %v4531_v37  ;;  %v4802_v11 = vrot.slane %v4797_v7, %v4801_v54 }
0x11d0   :  { %5676 = vmatprep.mubr.msk.f32.mxu0 %vm2285_vm6, %v4573_v6 }
0x11d1   :  { %5677 = vmatmul.mubr.msk.f32.gmra.mxu0 %vm2285_vm6, %v4574_v49 }
0x1287   :  { %v5675_v53 = vpop.f32.mrf.mxu0 }
0x1288   :  { %v4706_v56 = vadd.f32 %v5675_v53, %v5110_v14 }
0x1289   :  { %v4700_v43 = vpop.f32.mrf.mxu0 }
0x128a   :  { %v4720_v57 = vadd.f32 %v4706_v56, %v7083_v42  ;;  %v4701_v51 = vadd.f32 %v5110_v14, %v4700_v43 }
0x128c   :  { %v4719_v33 = vadd.f32 %v4701_v51, %v7081_v16  ;;  %v4726_v63 = vsel %vm23_vm0, %v4720_v57, 0.0  ;;  %v4795_v16 = vld [vmem:[%s7207_s2 + $0x50] sm:$0xff] }
0x128d   :  { %4727 = vadd.xlane.f32.xlu0 %v4726_v63 }
0x128e   :  { %v4723_v25 = vsel %vm23_vm0, %v4719_v33, 0.0 }
0x128f   :  { %4724 = vadd.xlane.f32.xlu1 %v4723_v25 }
0x1291   :  { %v5678_v61 = vpop.f32.mrf.mxu0 }
0x1292   :  { %v4716_v12 = vadd.f32 %v5678_v61, %v5110_v14 }
0x1293   :  { %v4710_v23 = vpop.f32.mrf.mxu0 }
0x1294   :  { %v4711_v5 = vadd.f32 %v5110_v14, %v4710_v23  ;;  %v4722_v4 = vadd.f32 %v4716_v12, %v7097_v46  ;;  %v4792_v46 = vld [vmem:[%s7207_s2 + $0x28] sm:$0xff] }
0x1296   :  { %v4721_v48 = vadd.f32 %v4711_v5, %v7092_v21  ;;  %v4732_v42 = vsel %vm23_vm0, %v4722_v4, 0.0  ;;  %v4794_v21 = vld [vmem:[%s7207_s2 + $0x40] sm:$0xff] }
0x1298   :  { %v4729_v30 = vsel %vm23_vm0, %v4721_v48, 0.0 }
0x1299   :  { %4730 = vadd.xlane.f32.xlu0 %v4729_v30 }
0x129d   :  { %4733 = vadd.xlane.f32.xlu0 %v4732_v42 }
0x12a0   :  { %4827 = vrot.lane.b32.xlu1 %v4795_v16, %s5891_s15 }
0x12a4   :  { %4823 = vrot.lane.b32.xlu1 %v4793_v35, %s5891_s15 }
0x12a8   :  { %4825 = vrot.lane.b32.xlu1 %v4794_v21, %s5891_s15 }
0x12ac   :  { %4775 = vrot.lane.b32.xlu1 %v5110_v14, %s5890_s14 }
0x12b0   :  { %4821 = vrot.lane.b32.xlu1 %v4792_v46, %s5891_s15 }
0x12b3   :  { %4829 = vrot.lane.b32.xlu0 %v4796_v36, %s5891_s15 }
0x12b7   :  { %4819 = vrot.lane.b32.xlu0 %v4791_v10, %s5891_s15 }
0x12bb   :  { %4782 = vrot.lane.b32.xlu0 %v5110_v14, %s5891_s15 }
0x1316   :  { %v4728_v20 = vpop.xlane.xlu0 %4727 }
0x1317   :  { %v4736_v19 = vmul.f32 0.03125, %v4728_v20 }
0x1318   :  { %v4725_v26 = vpop.xlane.xlu1 %4724 }
0x1319   :  { %v7142_v60 = vsub.f32 %v4720_v57, %v4736_v19  ;;  %v4735_v1 = vmul.f32 0.03125, %v4725_v26 }
0x131b   :  { %v7144_v17 = vsub.f32 %v4719_v33, %v4735_v1  ;;  %v4744_v34 = vmul.f32 %v7142_v60, %v7142_v60 }
0x131c   :  { %v4828_v13 = vpop.permute.xlu1 %4827 }
0x131d   :  { %v4750_v52 = vsel %vm23_vm0, %v4744_v34, 0.0  ;;  %v4743_v18 = vmul.f32 %v7144_v17, %v7144_v17 }
0x131e   :  { %4751 = vadd.xlane.f32.xlu0 %v4750_v52 }
0x131f   :  { %v4747_v24 = vsel %vm23_vm0, %v4743_v18, 0.0 }
0x1320   :  { %4748 = vadd.xlane.f32.xlu1 %v4747_v24  ;;  %v4824_v15 = vpop.permute.xlu1 %4823 }
0x1322   :  { %v4731_v50 = vpop.xlane.xlu0 %4730 }
0x1323   :  { %v4737_v47 = vmul.f32 0.03125, %v4731_v50 }
0x1324   :  { %v4826_v32 = vpop.permute.xlu1 %4825 }
0x1325   :  { %v7152_v37 = vsub.f32 %v4721_v48, %v4737_v47  ;;  %v4833_v3 = vsel %vm2285_vm6, %v4824_v15, %v4826_v32 }
0x1326   :  { %v4734_v38 = vpop.xlane.xlu0 %4733 }
0x1327   :  { %v4738_v28 = vmul.f32 0.03125, %v4734_v38  ;;  %v4745_v9 = vmul.f32 %v7152_v37, %v7152_v37 }
0x1328   :  { %v7156_v45 = vpop.permute.xlu1 %4775 }
0x1329   :  { %v7158_v27 = vsub.f32 %v4722_v4, %v4738_v28  ;;  %v4753_v8 = vsel %vm23_vm0, %v4745_v9, 0.0 }
0x132a   :  { %4754 = vadd.xlane.f32.xlu1 %v4753_v8  ;;  %v4830_v58 = vpop.permute.xlu0 %4829 }
0x132b   :  { %v4746_v22 = vmul.f32 %v7158_v27, %v7158_v27  ;;  %v4834_v59 = vsel %vm2285_vm6, %v4828_v13, %v4830_v58 }
0x132c   :  { %5679 = vmatprep.subr.mxu1 %v4834_v59  ;;  %v4822_v44 = vpop.permute.xlu1 %4821 }
0x132d   :  { %v4756_v2 = vsel %vm23_vm0, %v4746_v22, 0.0  ;;  %5680 = vmatpush3.msra.mxu1 %v4834_v59 }
0x132e   :  { %4757 = vadd.xlane.f32.xlu0 %v4756_v2  ;;  %5681 = vmatprep.subr.mxu1 %v4833_v3  ;;  %v4820_v39 = vpop.permute.xlu0 %4819 }
0x132f   :  { %5682 = vmatpush3.msra.mxu1 %v4833_v3  ;;  %v4832_v0 = vsel %vm2285_vm6, %v4820_v39, %v4822_v44 }
0x1330   :  { %5683 = vmatprep.subr.mxu1 %v4832_v0 }
0x1331   :  { %5684 = vmatpush3.msra.mxu1 %v4832_v0 }
0x1332   :  { %v4783_v6 = vpop.permute.xlu0 %4782 }
0x133b   :  { %4815 = vrot.lane.b32.xlu1 %v4789_v62, %s5891_s15 }
0x133f   :  { %4839 = vrot.lane.b32.xlu1 %v4802_v11, %s5890_s14 }
0x1344   :  { %4817 = vrot.lane.b32.xlu0 %v4790_v40, %s5891_s15 }
0x1348   :  { %4841 = vrot.lane.b32.xlu0 %v4806_v29, %s5890_s14 }
0x13a7   :  { %v4752_v49 = vpop.xlane.xlu0 %4751 }
0x13a8   :  { %v4760_v14 = vmul.f32 0.03125, %v4752_v49 }
0x13a9   :  { %v4749_v53 = vpop.xlane.xlu1 %4748 }
0x13aa   :  { %v4764_v56 = vadd.f32 1e-12, %v4760_v14  ;;  %v4759_v43 = vmul.f32 0.03125, %v4749_v53 }
0x13ac   :  { %5878 = vrsqrt.f32 %v4764_v56  ;;  %v4763_v57 = vadd.f32 1e-12, %v4759_v43 }
0x13ae   :  { %5880 = vrsqrt.f32 %v4763_v57 }
0x13b3   :  { %v4755_v51 = vpop.xlane.xlu1 %4754 }
0x13b4   :  { %v4761_v33 = vmul.f32 0.03125, %v4755_v51 }
0x13b6   :  { %v4765_v63 = vadd.f32 1e-12, %v4761_v33 }
0x13b7   :  { %v4758_v25 = vpop.xlane.xlu0 %4757  ;;  %v4816_v12 = vpop.permute.xlu1 %4815 }
0x13b8   :  { %5882 = vrsqrt.f32 %v4765_v63  ;;  %v4762_v61 = vmul.f32 0.03125, %v4758_v25 }
0x13b9   :  { %v5879_v23 = vpop.eup %5878 }
0x13ba   :  { %v4772_v5 = vmul.f32 %v5879_v23, %v7142_v60  ;;  %v4766_v48 = vadd.f32 1e-12, %v4762_v61 }
0x13bb   :  { %v5881_v4 = vpop.eup %5880  ;;  %v4818_v30 = vpop.permute.xlu0 %4817 }
0x13bc   :  { %5884 = vrsqrt.f32 %v4766_v48  ;;  %v4831_v42 = vsel %vm2285_vm6, %v4816_v12, %v4818_v30  ;;  %v4771_v16 = vmul.f32 %v5881_v4, %v7144_v17  ;;  %v4779_v35 = vmul.f32 %v7156_v45, %v4772_v5  ;;  %v4840_v52 = vpop.permute.xlu1 %4839 }
0x13bd   :  { %5685 = vmatprep.subr.mxu1 %v4831_v42 }
0x13be   :  { %5686 = vmatpush3.msra.mxu1 %v4831_v42  ;;  %v4778_v21 = vmul.f32 %v7156_v45, %v4771_v16  ;;  %v4786_v36 = vadd.f32 %v4783_v6, %v4779_v35 }
0x13bf   :  { %v4842_v13 = vpop.permute.xlu0 %4841 }
0x13c0   :  { %v4785_v46 = vadd.f32 %v4783_v6, %v4778_v21  ;;  %v4844_v18 = vsel %vm4843_vm7, %v4840_v52, %v4842_v13 }
0x13c2   :  { %5687 = vmatprep.mubr.msk.f32.mxu1 %vm23_vm0, %v4785_v46 }
0x13c3   :  { %5688 = vmatmul.mubr.msk.f32.vlgmr.msra.gmra.mxu1 %vm23_vm0, %v4786_v36 }
0x13c5   :  { %v5883_v10 = vpop.eup %5882 }
0x13c6   :  { %v4773_v20 = vmul.f32 %v5883_v10, %v7152_v37 }
0x13c8   :  { %v4780_v19 = vmul.f32 %v7156_v45, %v4773_v20 }
0x13c9   :  { %v5885_v26 = vpop.eup %5884 }
0x13ca   :  { %v4787_v60 = vadd.f32 %v4783_v6, %v4780_v19  ;;  %v4774_v1 = vmul.f32 %v5885_v26, %v7158_v27 }
0x13cc   :  { %5690 = vmatprep.mubr.msk.f32.mxu1 %vm23_vm0, %v4787_v60  ;;  %v4781_v17 = vmul.f32 %v7156_v45, %v4774_v1 }
0x13ce   :  { %v4788_v34 = vadd.f32 %v4783_v6, %v4781_v17 }
0x13d0   :  { %5691 = vmatmul.mubr.msk.f32.gmra.mxu1 %vm23_vm0, %v4788_v34 }
0x1483   :  { %v5689_v24 = vpop.f32.mrf.mxu1 }
0x1484   :  { %v4930_v15 = vadd.f32 %v5689_v24, %v4844_v18 }
0x1485   :  { %v4924_v50 = vpop.f32.mrf.mxu1 }
0x1486   :  { %4944 = vst [vmem:[%s7209_s4 + $0x8] sm:$0xff] %v4930_v15  ;;  %v4925_v47 = vadd.f32 %v4924_v50, %v4844_v18 }
0x1488   :  { %4943 = vst [vmem:[%s7209_s4] sm:$0xff] %v4925_v47 }
0x1490   :  { %v5692_v32 = vpop.f32.mrf.mxu1 }
0x1491   :  { %v4940_v37 = vadd.f32 %v5692_v32, %v4844_v18 }
0x1492   :  { %v4934_v38 = vpop.f32.mrf.mxu1 }
0x1493   :  { %4946 = vst [vmem:[%s7209_s4 + $0x18] sm:$0xff] %v4940_v37  ;;  %v4935_v28 = vadd.f32 %v4934_v38, %v4844_v18 }
0x1495   :  { %4945 = vst [vmem:[%s7209_s4 + $0x10] sm:$0xff] %v4935_v28 }

</bundles_post_ra>
